<compile_context>
chip_gen: v6e
topology: v6e:2x2x1
jax: 0.10.0
libtpu: 0.0.40
codegen_flags: <defaults>
</compile_context>

<pallas_src>
import functools

import jax
import jax.numpy as jnp
from jax.experimental import pallas as pl
from jax.experimental.pallas import tpu as pltpu

NEG_SLOPE = 0.01
BN_EPS = 1e-5
HIGH = jax.lax.Precision.HIGHEST


# ----------------------------- Pallas kernel --------------------------------
def _fused_forward_kernel(*refs, n_conv, n_fc):
    """Whole-network forward.  refs layout (all f32, 2-D, VMEM):
       x_map_flat, rState, rAction,
       [conv_i: W_i, b_i] * n_conv,
       fc0: W_map, W_state, W_action, b0,
       [fc_j: W_j, b_j] * (n_fc - 1),
       heads: W_h, b_h,
       out_ref
    """
    it = iter(refs)
    x_ref = next(it)          # [B, Cin*H*W]  (NCHW-flattened map)
    state_ref = next(it)      # [B, inStateDim]
    action_ref = next(it)     # [B, inActionDim]
    conv_refs = [(next(it), next(it)) for _ in range(n_conv)]
    fc0 = (next(it), next(it), next(it), next(it))
    fc_rest = [(next(it), next(it)) for _ in range(n_fc - 1)]
    head_w_ref, head_b_ref = next(it), next(it)
    o_ref = next(it)

    def mm(a, b):
        return jnp.dot(a, b, preferred_element_type=jnp.float32)

    def lrelu(y):
        return jnp.where(y >= 0.0, y, NEG_SLOPE * y)

    # conv stack (BN folded, conv lowered to dense matmul on flattened map)
    h = x_ref[...]
    for w_ref, b_ref in conv_refs:
        h = lrelu(mm(h, w_ref[...]) + b_ref[...])

    # fc1: concat(mapFlat, state, action) @ W  ==  sum of three matmuls
    wm_ref, ws_ref, wa_ref, b0_ref = fc0
    h = lrelu(mm(h, wm_ref[...]) + mm(state_ref[...], ws_ref[...])
              + mm(action_ref[...], wa_ref[...]) + b0_ref[...])

    # remaining fc layers
    for w_ref, b_ref in fc_rest:
        h = lrelu(mm(h, w_ref[...]) + b_ref[...])

    # merged heads (mean | logLDiag | LOffDiag), no activation
    o_ref[...] = mm(h, head_w_ref[...]) + head_b_ref[...]


# ------------------------------ fold helpers ---------------------------------
def bn_affine(bn):
    scale = bn["gamma"] / jnp.sqrt(bn["rv"] + BN_EPS)
    shift = bn["beta"] - bn["rm"] * scale
    return scale, shift


def prepare_fused_params(params, cfg):
    """One-time prep: fold BN into weights, lower convs to dense matrices,
    split fc1 by input segment, merge the three heads."""
    in_state, in_map, in_action, out_state = cfg["argDim"]

    conv_mats = []
    C, HW = 1, in_map
    for layer in params["convs"]:
        k, cout = layer["k"], layer["cout"]
        sc, sh = bn_affine(layer["bn"])                     # per input channel
        w = layer["w"]                                      # [cout, C, k, k]
        w_f = w * sc[None, :, None, None]                   # fold BN scale
        b_f = layer["b"] + jnp.einsum("oikl,i->o", w, sh, precision=HIGH)
        Ho = HW - k + 1
        din = C * HW * HW
        # dense conv matrix: conv applied to the identity batch (exact).
        eye = jnp.eye(din, dtype=jnp.float32).reshape(din, C, HW, HW)
        m = jax.lax.conv_general_dilated(
            eye, w_f, (1, 1), "VALID",
            dimension_numbers=("NCHW", "OIHW", "NCHW"), precision=HIGH)
        m = m.reshape(din, cout * Ho * Ho)                  # [Cin*H*W, Cout*Ho*Wo]
        b_row = jnp.repeat(b_f, Ho * Ho).reshape(1, -1)
        conv_mats.append((m, b_row))
        C, HW = cout, Ho
    conv_out_dim = C * HW * HW

    fc_mats = []
    for i, layer in enumerate(params["fcs"]):
        sc, sh = bn_affine(layer["bn"])                     # per input feature
        w = layer["w"]                                      # [out, in]
        wmat = (w * sc[None, :]).T                          # [in, out], BN folded
        b_f = layer["b"] + jnp.dot(w, sh, precision=HIGH)
        if i == 0:
            fc_mats.append((wmat[:conv_out_dim],
                            wmat[conv_out_dim:conv_out_dim + in_state],
                            wmat[conv_out_dim + in_state:],
                            b_f.reshape(1, -1)))
        else:
            fc_mats.append((wmat, b_f.reshape(1, -1)))

    head_w = jnp.concatenate([params["fcMean"]["w"].T,
                              params["fcDiag"]["w"].T,
                              params["fcOffDiag"]["w"].T], axis=1)
    head_b = jnp.concatenate([params["fcMean"]["b"],
                              params["fcDiag"]["b"],
                              params["fcOffDiag"]["b"]]).reshape(1, -1)

    return dict(conv_mats=conv_mats, fc_mats=fc_mats,
                head_w=head_w, head_b=head_b, out_state=out_state)


# --------------------------------- forward -----------------------------------
def forward(fused, data):
    rState, rMap, rAction = data
    B = rMap.shape[0]
    x_flat = rMap.reshape(B, -1)                            # NCHW flatten (view)

    inputs = [x_flat, rState, rAction]
    for m, b in fused["conv_mats"]:
        inputs += [m, b]
    w_map, w_state, w_action, b0 = fused["fc_mats"][0]
    inputs += [w_map, w_state, w_action, b0]
    for m, b in fused["fc_mats"][1:]:
        inputs += [m, b]
    inputs += [fused["head_w"], fused["head_b"]]

    n_out = fused["head_w"].shape[1]
    kern = functools.partial(_fused_forward_kernel,
                             n_conv=len(fused["conv_mats"]),
                             n_fc=len(fused["fc_mats"]))
    out = pl.pallas_call(
        kern,
        out_shape=jax.ShapeDtypeStruct((B, n_out), jnp.float32),
        in_specs=[pl.BlockSpec(memory_space=pltpu.MemorySpace.VMEM)
                  for _ in inputs],
        out_specs=pl.BlockSpec(memory_space=pltpu.MemorySpace.VMEM),
        compiler_params=pltpu.CompilerParams(
            vmem_limit_bytes=32 * 1024 * 1024),
    )(*inputs)

    s = fused["out_state"]
    return out[:, :s], out[:, s:2 * s], out[:, 2 * s:]


# --------------------------- parameter construction --------------------------
def init_params(key, cfg):
    in_state, in_map, in_action, out_state = cfg["argDim"]
    conv_size, fc_size = cfg["convSize"], cfg["fcSize"]

    def nrm(k, shape, s):
        return (jax.random.normal(k, shape, jnp.float32) * s).astype(jnp.float32)

    def bn_init(k, c):
        k1, k2, k3, k4 = jax.random.split(k, 4)
        return dict(gamma=1.0 + 0.1 * jax.random.normal(k1, (c,), jnp.float32),
                    beta=0.1 * jax.random.normal(k2, (c,), jnp.float32),
                    rm=0.1 * jax.random.normal(k3, (c,), jnp.float32),
                    rv=0.5 + jnp.abs(jax.random.normal(k4, (c,), jnp.float32)))

    params = {"convs": [], "fcs": []}
    last_c, last_hw = 1, in_map
    keys = iter(jax.random.split(key, 64))
    for cout, k in conv_size:
        fan_in = last_c * k * k
        params["convs"].append(dict(
            k=k, cout=cout,
            bn=bn_init(next(keys), last_c),
            w=nrm(next(keys), (cout, last_c, k, k), 1.0 / jnp.sqrt(fan_in)),
            b=nrm(next(keys), (cout,), 0.1)))
        last_c, last_hw = cout, last_hw - k + 1

    conv_out_dim = last_c * last_hw * last_hw
    last_dim = conv_out_dim + in_state + in_action
    for h in fc_size:
        params["fcs"].append(dict(
            bn=bn_init(next(keys), last_dim),
            w=nrm(next(keys), (h, last_dim), 1.0 / jnp.sqrt(last_dim)),
            b=nrm(next(keys), (h,), 0.1)))
        last_dim = h

    def head(k, n_out):
        k1, k2 = jax.random.split(k)
        return dict(w=nrm(k1, (n_out, last_dim), 1.0 / jnp.sqrt(last_dim)),
                    b=nrm(k2, (n_out,), 0.1))

    params["fcMean"] = head(next(keys), out_state)
    params["fcDiag"] = head(next(keys), out_state)
    params["fcOffDiag"] = head(next(keys), out_state * (out_state - 1) // 2)
    params["convOutputDim"] = conv_out_dim
    return params


# ---------------------------- pure-JAX reference ------------------------------
def reference_forward(params, data):
    rState, rMap, rAction = data
    x = rMap
    for layer in params["convs"]:
        sc, sh = bn_affine(layer["bn"])
        x = x * sc[None, :, None, None] + sh[None, :, None, None]
        x = jax.lax.conv_general_dilated(
            x, layer["w"], (1, 1), "VALID",
            dimension_numbers=("NCHW", "OIHW", "NCHW"), precision=HIGH)
        x = x + layer["b"][None, :, None, None]
        x = jnp.where(x >= 0.0, x, NEG_SLOPE * x)
    connected = jnp.concatenate([x.reshape(x.shape[0], -1), rState, rAction],
                                axis=1)
    for layer in params["fcs"]:
        sc, sh = bn_affine(layer["bn"])
        c = connected * sc + sh
        connected = jnp.dot(c, layer["w"].T, precision=HIGH) + layer["b"]
        connected = jnp.where(connected >= 0.0, connected, NEG_SLOPE * connected)

    def head(p):
        return jnp.dot(connected, p["w"].T, precision=HIGH) + p["b"]

    return head(params["fcMean"]), head(params["fcDiag"]), head(params["fcOffDiag"])


# ----------------------------------- main -------------------------------------
if __name__ == "__main__":
    # motionModelArgs equivalent:
    #   argDim   = [inStateDim=4, inMapDim=16, inActionDim=2, outStateDim=3]
    #   convSize = [[4, 3], [8, 3]]   fcSize = [64, 32]   dropout_ps = [0.1, 0.1]
    cfg = dict(argDim=(4, 16, 2, 3),
               convSize=[(4, 3), (8, 3)],
               fcSize=[64, 32])

    root = jax.random.PRNGKey(0)
    kp, ks, km, ka = jax.random.split(root, 4)
    params = init_params(kp, cfg)
    fused = prepare_fused_params(params, cfg)   # one-time BN fold / conv lowering

    B = 2
    rState = jax.random.normal(ks, (B, cfg["argDim"][0]), jnp.float32)
    rMap = jax.random.normal(km, (B, 1, cfg["argDim"][1], cfg["argDim"][1]),
                             jnp.float32)
    rAction = jax.random.normal(ka, (B, cfg["argDim"][2]), jnp.float32)
    data = (rState, rMap, rAction)

    means, logLDiags, LOffDiags = forward(fused, data)
    jax.block_until_ready((means, logLDiags, LOffDiags))

    r_means, r_diag, r_off = reference_forward(params, data)
    assert means.shape == (B, 3) and logLDiags.shape == (B, 3) and LOffDiags.shape == (B, 3)
    assert jnp.allclose(means, r_means, atol=1e-2, rtol=1e-2)
    assert jnp.allclose(logLDiags, r_diag, atol=1e-2, rtol=1e-2)
    assert jnp.allclose(LOffDiags, r_off, atol=1e-2, rtol=1e-2)

    print("KERNEL_OK")
</pallas_src>

<mosaic_0001>
module attributes {stable_mosaic.version = 11 : i64} {
  func.func @_fused_forward_kernel(%arg0: memref<2x256xf32, #tpu.memory_space<vmem>>, %arg1: memref<2x4xf32, #tpu.memory_space<vmem>>, %arg2: memref<2x2xf32, #tpu.memory_space<vmem>>, %arg3: memref<256x784xf32, #tpu.memory_space<vmem>>, %arg4: memref<1x784xf32, #tpu.memory_space<vmem>>, %arg5: memref<784x1152xf32, #tpu.memory_space<vmem>>, %arg6: memref<1x1152xf32, #tpu.memory_space<vmem>>, %arg7: memref<1152x64xf32, #tpu.memory_space<vmem>>, %arg8: memref<4x64xf32, #tpu.memory_space<vmem>>, %arg9: memref<2x64xf32, #tpu.memory_space<vmem>>, %arg10: memref<1x64xf32, #tpu.memory_space<vmem>>, %arg11: memref<64x32xf32, #tpu.memory_space<vmem>>, %arg12: memref<1x32xf32, #tpu.memory_space<vmem>>, %arg13: memref<32x9xf32, #tpu.memory_space<vmem>>, %arg14: memref<1x9xf32, #tpu.memory_space<vmem>>, %arg15: memref<2x9xf32, #tpu.memory_space<vmem>>) attributes {dimension_semantics = [], scalar_prefetch = 0 : i64, scratch_operands = 0 : i64, tpu.core_type = #tpu.core_type<tc>} {
    %c0 = arith.constant 0 : index
    %c0_0 = arith.constant 0 : index
    %0 = vector.load %arg0[%c0, %c0_0] : memref<2x256xf32, #tpu.memory_space<vmem>>, vector<2x256xf32>
    %c0_1 = arith.constant 0 : index
    %c0_2 = arith.constant 0 : index
    %1 = vector.load %arg3[%c0_1, %c0_2] : memref<256x784xf32, #tpu.memory_space<vmem>>, vector<256x784xf32>
    %cst = arith.constant dense<0.000000e+00> : vector<2x784xf32>
    %2 = tpu.matmul %0, %1, %cst {dimension_numbers = #tpu.dot_dimension_numbers<[1], [0], [0], [1], [0, 0, 1, 1], [], []>} : vector<2x256xf32>, vector<256x784xf32>, vector<2x784xf32> -> vector<2x784xf32>
    %c0_3 = arith.constant 0 : index
    %c0_4 = arith.constant 0 : index
    %3 = vector.load %arg4[%c0_3, %c0_4] : memref<1x784xf32, #tpu.memory_space<vmem>>, vector<1x784xf32>
    %4 = vector.broadcast %3 : vector<1x784xf32> to vector<2x784xf32>
    %5 = arith.addf %2, %4 : vector<2x784xf32>
    %cst_5 = arith.constant 0.000000e+00 : f32
    %6 = vector.broadcast %cst_5 : f32 to vector<2x784xf32>
    %7 = arith.cmpf oge, %5, %6 : vector<2x784xf32>
    %cst_6 = arith.constant 0.00999999977 : f32
    %8 = vector.broadcast %cst_6 : f32 to vector<2x784xf32>
    %9 = arith.mulf %8, %5 : vector<2x784xf32>
    %10 = arith.select %7, %5, %9 : vector<2x784xi1>, vector<2x784xf32>
    %c0_7 = arith.constant 0 : index
    %c0_8 = arith.constant 0 : index
    %11 = vector.load %arg5[%c0_7, %c0_8] : memref<784x1152xf32, #tpu.memory_space<vmem>>, vector<784x1152xf32>
    %cst_9 = arith.constant dense<0.000000e+00> : vector<2x1152xf32>
    %12 = tpu.matmul %10, %11, %cst_9 {dimension_numbers = #tpu.dot_dimension_numbers<[1], [0], [0], [1], [0, 0, 1, 1], [], []>} : vector<2x784xf32>, vector<784x1152xf32>, vector<2x1152xf32> -> vector<2x1152xf32>
    %c0_10 = arith.constant 0 : index
    %c0_11 = arith.constant 0 : index
    %13 = vector.load %arg6[%c0_10, %c0_11] : memref<1x1152xf32, #tpu.memory_space<vmem>>, vector<1x1152xf32>
    %14 = vector.broadcast %13 : vector<1x1152xf32> to vector<2x1152xf32>
    %15 = arith.addf %12, %14 : vector<2x1152xf32>
    %cst_12 = arith.constant 0.000000e+00 : f32
    %16 = vector.broadcast %cst_12 : f32 to vector<2x1152xf32>
    %17 = arith.cmpf oge, %15, %16 : vector<2x1152xf32>
    %cst_13 = arith.constant 0.00999999977 : f32
    %18 = vector.broadcast %cst_13 : f32 to vector<2x1152xf32>
    %19 = arith.mulf %18, %15 : vector<2x1152xf32>
    %20 = arith.select %17, %15, %19 : vector<2x1152xi1>, vector<2x1152xf32>
    %c0_14 = arith.constant 0 : index
    %c0_15 = arith.constant 0 : index
    %21 = vector.load %arg7[%c0_14, %c0_15] : memref<1152x64xf32, #tpu.memory_space<vmem>>, vector<1152x64xf32>
    %cst_16 = arith.constant dense<0.000000e+00> : vector<2x64xf32>
    %22 = tpu.matmul %20, %21, %cst_16 {dimension_numbers = #tpu.dot_dimension_numbers<[1], [0], [0], [1], [0, 0, 1, 1], [], []>} : vector<2x1152xf32>, vector<1152x64xf32>, vector<2x64xf32> -> vector<2x64xf32>
    %c0_17 = arith.constant 0 : index
    %c0_18 = arith.constant 0 : index
    %23 = vector.load %arg1[%c0_17, %c0_18] : memref<2x4xf32, #tpu.memory_space<vmem>>, vector<2x4xf32>
    %c0_19 = arith.constant 0 : index
    %c0_20 = arith.constant 0 : index
    %24 = vector.load %arg8[%c0_19, %c0_20] : memref<4x64xf32, #tpu.memory_space<vmem>>, vector<4x64xf32>
    %cst_21 = arith.constant dense<0.000000e+00> : vector<2x64xf32>
    %25 = tpu.matmul %23, %24, %cst_21 {dimension_numbers = #tpu.dot_dimension_numbers<[1], [0], [0], [1], [0, 0, 1, 1], [], []>} : vector<2x4xf32>, vector<4x64xf32>, vector<2x64xf32> -> vector<2x64xf32>
    %26 = arith.addf %22, %25 : vector<2x64xf32>
    %c0_22 = arith.constant 0 : index
    %c0_23 = arith.constant 0 : index
    %27 = vector.load %arg2[%c0_22, %c0_23] : memref<2x2xf32, #tpu.memory_space<vmem>>, vector<2x2xf32>
    %c0_24 = arith.constant 0 : index
    %c0_25 = arith.constant 0 : index
    %28 = vector.load %arg9[%c0_24, %c0_25] : memref<2x64xf32, #tpu.memory_space<vmem>>, vector<2x64xf32>
    %cst_26 = arith.constant dense<0.000000e+00> : vector<2x64xf32>
    %29 = tpu.matmul %27, %28, %cst_26 {dimension_numbers = #tpu.dot_dimension_numbers<[1], [0], [0], [1], [0, 0, 1, 1], [], []>} : vector<2x2xf32>, vector<2x64xf32>, vector<2x64xf32> -> vector<2x64xf32>
    %30 = arith.addf %26, %29 : vector<2x64xf32>
    %c0_27 = arith.constant 0 : index
    %c0_28 = arith.constant 0 : index
    %31 = vector.load %arg10[%c0_27, %c0_28] : memref<1x64xf32, #tpu.memory_space<vmem>>, vector<1x64xf32>
    %32 = vector.broadcast %31 : vector<1x64xf32> to vector<2x64xf32>
    %33 = arith.addf %30, %32 : vector<2x64xf32>
    %cst_29 = arith.constant 0.000000e+00 : f32
    %34 = vector.broadcast %cst_29 : f32 to vector<2x64xf32>
    %35 = arith.cmpf oge, %33, %34 : vector<2x64xf32>
    %cst_30 = arith.constant 0.00999999977 : f32
    %36 = vector.broadcast %cst_30 : f32 to vector<2x64xf32>
    %37 = arith.mulf %36, %33 : vector<2x64xf32>
    %38 = arith.select %35, %33, %37 : vector<2x64xi1>, vector<2x64xf32>
    %c0_31 = arith.constant 0 : index
    %c0_32 = arith.constant 0 : index
    %39 = vector.load %arg11[%c0_31, %c0_32] : memref<64x32xf32, #tpu.memory_space<vmem>>, vector<64x32xf32>
    %cst_33 = arith.constant dense<0.000000e+00> : vector<2x32xf32>
    %40 = tpu.matmul %38, %39, %cst_33 {dimension_numbers = #tpu.dot_dimension_numbers<[1], [0], [0], [1], [0, 0, 1, 1], [], []>} : vector<2x64xf32>, vector<64x32xf32>, vector<2x32xf32> -> vector<2x32xf32>
    %c0_34 = arith.constant 0 : index
    %c0_35 = arith.constant 0 : index
    %41 = vector.load %arg12[%c0_34, %c0_35] : memref<1x32xf32, #tpu.memory_space<vmem>>, vector<1x32xf32>
    %42 = vector.broadcast %41 : vector<1x32xf32> to vector<2x32xf32>
    %43 = arith.addf %40, %42 : vector<2x32xf32>
    %cst_36 = arith.constant 0.000000e+00 : f32
    %44 = vector.broadcast %cst_36 : f32 to vector<2x32xf32>
    %45 = arith.cmpf oge, %43, %44 : vector<2x32xf32>
    %cst_37 = arith.constant 0.00999999977 : f32
    %46 = vector.broadcast %cst_37 : f32 to vector<2x32xf32>
    %47 = arith.mulf %46, %43 : vector<2x32xf32>
    %48 = arith.select %45, %43, %47 : vector<2x32xi1>, vector<2x32xf32>
    %c0_38 = arith.constant 0 : index
    %c0_39 = arith.constant 0 : index
    %49 = vector.load %arg13[%c0_38, %c0_39] : memref<32x9xf32, #tpu.memory_space<vmem>>, vector<32x9xf32>
    %cst_40 = arith.constant dense<0.000000e+00> : vector<2x9xf32>
    %50 = tpu.matmul %48, %49, %cst_40 {dimension_numbers = #tpu.dot_dimension_numbers<[1], [0], [0], [1], [0, 0, 1, 1], [], []>} : vector<2x32xf32>, vector<32x9xf32>, vector<2x9xf32> -> vector<2x9xf32>
    %c0_41 = arith.constant 0 : index
    %c0_42 = arith.constant 0 : index
    %51 = vector.load %arg14[%c0_41, %c0_42] : memref<1x9xf32, #tpu.memory_space<vmem>>, vector<1x9xf32>
    %52 = vector.broadcast %51 : vector<1x9xf32> to vector<2x9xf32>
    %53 = arith.addf %50, %52 : vector<2x9xf32>
    %c0_43 = arith.constant 0 : index
    %c0_44 = arith.constant 0 : index
    %54 = vector.load %arg15[%c0_43, %c0_44] : memref<2x9xf32, #tpu.memory_space<vmem>>, vector<2x9xf32>
    tpu.vector_store %arg15[%c0_43, %c0_44], %53 {strides = array<i32>} : memref<2x9xf32, #tpu.memory_space<vmem>>, vector<2x9xf32>,
    return
  }
}

</mosaic_0001>

<bundles_post_ra>
// kernel: tpu_custom_call.1
= control target key start
LH: loop header
LB: loop body
LE: loop exit
PB: predicated region body
PF: predicated region fallthrough
CT: control target
= control target key end

     0   :  { %20 = vsyncpa [#allocation3], 0  ;;  %s6161_s0 = inlined_call_operand.hbm [shape: f32[2,256], index: 0, kind: input, shape index: {}]   ;;  %s6162_s1 = inlined_call_operand.hbm [shape: f32[2,4], index: 1, kind: input, shape index: {}]   ;;  %s6163_s2 = inlined_call_operand.hbm [shape: f32[2,2], index: 2, kind: input, shape index: {}]   ;;  %s6164_s3 = inlined_call_operand.vmem [shape: f32[256,784], index: 3, kind: input, shape index: {}]   ;;  %s6165_s4 = inlined_call_operand.hbm [shape: f32[1,784], index: 4, kind: input, shape index: {}]   ;;  %s6166_s5 = inlined_call_operand.hbm [shape: f32[784,1152], index: 5, kind: input, shape index: {}]   ;;  %s6167_s6 = inlined_call_operand.hbm [shape: f32[1,1152], index: 6, kind: input, shape index: {}]   ;;  %s6168_s7 = inlined_call_operand.vmem [shape: f32[1152,64], index: 7, kind: input, shape index: {}]   ;;  %s6169_s8 = inlined_call_operand.hbm [shape: f32[4,64], index: 8, kind: input, shape index: {}]   ;;  %s6170_s9 = inlined_call_operand.hbm [shape: f32[2,64], index: 9, kind: input, shape index: {}]   ;;  %s6171_s10 = inlined_call_operand.hbm [shape: f32[1,64], index: 10, kind: input, shape index: {}]   ;;  %s6172_s11 = inlined_call_operand.vmem [shape: f32[64,32], index: 11, kind: input, shape index: {}]   ;;  %s6173_s12 = inlined_call_operand.hbm [shape: f32[1,32], index: 12, kind: input, shape index: {}]   ;;  %s6174_s13 = inlined_call_operand.vmem [shape: f32[32,9], index: 13, kind: input, shape index: {}]   ;;  %s6175_s14 = inlined_call_operand.hbm [shape: f32[1,9], index: 14, kind: input, shape index: {}]   ;;  %s6176_s15 = inlined_call_operand.hbm [shape: f32[2,9], index: 15, kind: output, shape index: {}]  }
   0x1   :  { %21 = vsyncpa [#allocation6], 0 }
   0x2   :  { %22 = vsyncpa [#allocation9], 0 }
   0x3   :  { %23 = vsyncpa [#allocation12], 0 }
   0x4   :  { %24 = vsyncpa [#allocation15], 0 }
   0x5   :  { %25 = vsyncpa [#allocation18], 0 }
   0x6   :  { %26 = vsyncpa [#allocation4], 0  ;;  %s4686_s18 = smov [#allocation5]   ;;  %s4687_s20 = smov [#allocation8]  }
   0x7   :  { %s43_s19 = sshll.u32 %s4686_s18, 4  ;;  %s65_s21 = sshll.u32 %s4687_s20, 4  ;;  %s44_s19 = int_to_ptr.vmem [resolvable:$true] %s43_s19  ;;  %s66_s21 = int_to_ptr.vmem [resolvable:$true] %s65_s21 }
   0x8   :  { %s4440_s22 = scalar_lea.vmem %s44_s19, 32  ;;  %p4445_p1 = scmp.lt.s32.totalorder %s44_s19, %s44_s19 }
   0x9   :  { %p4441_p0 = scmp.ne.s32.totalorder %s44_s19, %s4440_s22  ;;  %p4446_p2 = scmp.lt.s32.totalorder %s4440_s22, %s4440_s22 }
   0xb   :  { %p4447_p3 = por %p4446_p2, %p4445_p1 }
   0xd   :  { %p4448_p4 = pnand %p4447_p3, %p4441_p0 }
   0xf   :  { %4451 = shalt.err (!%p4448_p4)
}
  0x10   :  { %46 = dma.hbm_to_vmem [thread:$0]  %s6162_s1, 32, %s44_s19, [#allocation6]  }
  0x11   :  { %s4460_s25 = scalar_lea.vmem %s66_s21, 112  ;;  %s4464_s26 = scalar_lea.vmem %s66_s21, 128 }
  0x12   :  { %p4461_p5 = scmp.ne.s32.totalorder %s66_s21, %s4460_s25  ;;  %p4465_p6 = scmp.lt.s32.totalorder %s66_s21, %s66_s21 }
  0x13   :  { %p4466_p7 = scmp.lt.s32.totalorder %s4464_s26, %s4460_s25 }
  0x15   :  { %p4467_p8 = por %p4466_p7, %p4465_p6 }
  0x17   :  { %p4468_p9 = pnand %p4467_p8, %p4461_p5 }
  0x19   :  { %4471 = shalt.err (!%p4468_p9)
}
  0x1a   :  { %68 = dma.hbm_to_vmem [thread:$0]  %s6165_s4, 112, %s66_s21, [#allocation9]  }
  0x1b   :  { %s4688_s29 = smov [#allocation11]   ;;  %s4689_s16 = smov [#allocation14]  }
  0x1c   :  { %s87_s30 = sshll.u32 %s4688_s29, 4  ;;  %s109_s17 = sshll.u32 %s4689_s16, 4  ;;  %s88_s30 = int_to_ptr.vmem [resolvable:$true] %s87_s30  ;;  %s110_s17 = int_to_ptr.vmem [resolvable:$true] %s109_s17 }
  0x1d   :  { %s4480_s18 = scalar_lea.vmem %s88_s30, 144  ;;  %s4484_s1 = scalar_lea.vmem %s88_s30, 160 }
  0x1e   :  { %p4481_p10 = scmp.ne.s32.totalorder %s88_s30, %s4480_s18  ;;  %p4485_p11 = scmp.lt.s32.totalorder %s88_s30, %s88_s30 }
  0x1f   :  { %p4486_p12 = scmp.lt.s32.totalorder %s4484_s1, %s4480_s18 }
  0x21   :  { %p4487_p13 = por %p4486_p12, %p4485_p11 }
  0x23   :  { %p4488_p0 = pnand %p4487_p13, %p4481_p10 }
  0x25   :  { %4491 = shalt.err (!%p4488_p0)
}
  0x26   :  { %90 = dma.hbm_to_vmem [thread:$0]  %s6167_s6, 144, %s88_s30, [#allocation12]  }
  0x27   :  { %s4500_s22 = scalar_lea.vmem %s110_s17, 32  ;;  %p4505_p2 = scmp.lt.s32.totalorder %s110_s17, %s110_s17 }
  0x28   :  { %p4501_p1 = scmp.ne.s32.totalorder %s110_s17, %s4500_s22  ;;  %p4506_p3 = scmp.lt.s32.totalorder %s4500_s22, %s4500_s22 }
  0x2a   :  { %p4507_p4 = por %p4506_p3, %p4505_p2 }
  0x2c   :  { %p4508_p5 = pnand %p4507_p4, %p4501_p1 }
  0x2e   :  { %4511 = shalt.err (!%p4508_p5)
}
  0x2f   :  { %112 = dma.hbm_to_vmem [thread:$0]  %s6170_s9, 32, %s110_s17, [#allocation15]  }
  0x30   :  { %s4690_s23 = smov [#allocation17]   ;;  %s4691_s25 = smov [#allocation2]  }
  0x31   :  { %s131_s24 = sshll.u32 %s4690_s23, 4  ;;  %s33_s26 = sshll.u32 %s4691_s25, 4  ;;  %s132_s24 = int_to_ptr.vmem [resolvable:$true] %s131_s24  ;;  %s34_s26 = int_to_ptr.vmem [resolvable:$true] %s33_s26 }
  0x32   :  { %s4520_s27 = scalar_lea.vmem %s132_s24, 16  ;;  %s4524_s6 = scalar_lea.vmem %s132_s24, 32 }
  0x33   :  { %p4521_p6 = scmp.ne.s32.totalorder %s132_s24, %s4520_s27  ;;  %p4525_p7 = scmp.lt.s32.totalorder %s132_s24, %s132_s24 }
  0x34   :  { %p4526_p8 = scmp.lt.s32.totalorder %s4524_s6, %s4520_s27 }
  0x36   :  { %p4527_p9 = por %p4526_p8, %p4525_p7 }
  0x38   :  { %p4528_p10 = pnand %p4527_p9, %p4521_p6 }
  0x3a   :  { %4531 = shalt.err (!%p4528_p10)
}
  0x3b   :  { %134 = dma.hbm_to_vmem [thread:$0]  %s6173_s12, 16, %s132_s24, [#allocation18]  }
  0x3c   :  { %s4540_s30 = scalar_lea.vmem %s34_s26, 64  ;;  %p4545_p12 = scmp.lt.s32.totalorder %s34_s26, %s34_s26 }
  0x3d   :  { %p4541_p11 = scmp.ne.s32.totalorder %s34_s26, %s4540_s30  ;;  %p4546_p13 = scmp.lt.s32.totalorder %s4540_s30, %s4540_s30 }
  0x3f   :  { %p4547_p0 = por %p4546_p13, %p4545_p12 }
  0x41   :  { %p4548_p1 = pnand %p4547_p0, %p4541_p11 }
  0x43   :  { %4551 = shalt.err (!%p4548_p1)
}
  0x44   :  { %36 = dma.hbm_to_vmem [thread:$0]  %s6161_s0, 64, %s34_s26, [#allocation3]  }
  0x45   :  { %s4692_s17 = smov [#allocation7]   ;;  %s4693_s1 = smov [#allocation10]  }
  0x46   :  { %s53_s18 = sshll.u32 %s4692_s17, 4  ;;  %s74_s19 = sshll.u32 %s4693_s1, 4  ;;  %s54_s18 = int_to_ptr.vmem [resolvable:$true] %s53_s18  ;;  %s75_s19 = int_to_ptr.vmem [resolvable:$true] %s74_s19 }
  0x47   :  { %s4560_s20 = scalar_lea.vmem %s54_s18, 32  ;;  %p4565_p3 = scmp.lt.s32.totalorder %s54_s18, %s54_s18 }
  0x48   :  { %p4561_p2 = scmp.ne.s32.totalorder %s54_s18, %s4560_s20  ;;  %p4566_p4 = scmp.lt.s32.totalorder %s4560_s20, %s4560_s20 }
  0x4a   :  { %p4567_p5 = por %p4566_p4, %p4565_p3 }
  0x4c   :  { %p4568_p6 = pnand %p4567_p5, %p4561_p2 }
  0x4e   :  { %4571 = shalt.err (!%p4568_p6)
}
  0x4f   :  { %56 = dma.hbm_to_vmem [thread:$0]  %s6163_s2, 32, %s54_s18, [#allocation6]  }
  0x50   :  { %s4580_s4 = scalar_lea.vmem %s75_s19, 112896  ;;  %p4585_p8 = scmp.lt.s32.totalorder %s75_s19, %s75_s19 }
  0x51   :  { %p4581_p7 = scmp.ne.s32.totalorder %s75_s19, %s4580_s4  ;;  %p4586_p9 = scmp.lt.s32.totalorder %s4580_s4, %s4580_s4 }
  0x53   :  { %p4587_p10 = por %p4586_p9, %p4585_p8 }
  0x55   :  { %p4588_p11 = pnand %p4587_p10, %p4581_p7 }
  0x57   :  { %4591 = shalt.err (!%p4588_p11)
}
  0x58   :  { %s4694_s0 = smov 1152   ;;  %s4695_s21 = smov 72  }
  0x59   :  { %80 = dma.hbm_to_vmem [thread:$0]  %s6166_s5, 112896, %s75_s19, [#allocation9], %s4694_s0, %s4694_s0, %s4695_s21  }
  0x5a   :  { %s4696_s25 = smov [#allocation13]   ;;  %s4697_s27 = smov [#allocation16]  }
  0x5b   :  { %s99_s26 = sshll.u32 %s4696_s25, 4  ;;  %s119_s6 = sshll.u32 %s4697_s27, 4  ;;  %s100_s26 = int_to_ptr.vmem [resolvable:$true] %s99_s26  ;;  %s120_s6 = int_to_ptr.vmem [resolvable:$true] %s119_s6 }
  0x5c   :  { %s4600_s2 = scalar_lea.vmem %s100_s26, 64  ;;  %p4605_p13 = scmp.lt.s32.totalorder %s100_s26, %s100_s26 }
  0x5d   :  { %p4601_p12 = scmp.ne.s32.totalorder %s100_s26, %s4600_s2  ;;  %p4606_p0 = scmp.lt.s32.totalorder %s4600_s2, %s4600_s2 }
  0x5f   :  { %p4607_p1 = por %p4606_p0, %p4605_p13 }
  0x61   :  { %p4608_p2 = pnand %p4607_p1, %p4601_p12 }
  0x63   :  { %4611 = shalt.err (!%p4608_p2)
}
  0x64   :  { %102 = dma.hbm_to_vmem [thread:$0]  %s6169_s8, 64, %s100_s26, [#allocation12]  }
  0x65   :  { %s4620_s30 = scalar_lea.vmem %s120_s6, 16  ;;  %s4624_s5 = scalar_lea.vmem %s120_s6, 32 }
  0x66   :  { %p4621_p3 = scmp.ne.s32.totalorder %s120_s6, %s4620_s30  ;;  %p4625_p4 = scmp.lt.s32.totalorder %s120_s6, %s120_s6 }
  0x67   :  { %p4626_p5 = scmp.lt.s32.totalorder %s4624_s5, %s4620_s30 }
  0x69   :  { %p4627_p6 = por %p4626_p5, %p4625_p4 }
  0x6b   :  { %p4628_p7 = pnand %p4627_p6, %p4621_p3 }
  0x6d   :  { %4631 = shalt.err (!%p4628_p7)
}
  0x6e   :  { %122 = dma.hbm_to_vmem [thread:$0]  %s6171_s10, 16, %s120_s6, [#allocation15]  }
  0x6f   :  { %s4698_s17 = smov [#allocation19]  }
  0x70   :  { %s143_s18 = sshll.u32 %s4698_s17, 4  ;;  %s144_s18 = int_to_ptr.vmem [resolvable:$true] %s143_s18 }
  0x71   :  { %s4640_s1 = scalar_lea.vmem %s144_s18, 16  ;;  %s4644_s19 = scalar_lea.vmem %s144_s18, 32 }
  0x72   :  { %p4641_p8 = scmp.ne.s32.totalorder %s144_s18, %s4640_s1  ;;  %p4645_p9 = scmp.lt.s32.totalorder %s144_s18, %s144_s18 }
  0x73   :  { %p4646_p10 = scmp.lt.s32.totalorder %s4644_s19, %s4640_s1 }
  0x75   :  { %p4647_p11 = por %p4646_p10, %p4645_p9 }
  0x77   :  { %p4648_p12 = pnand %p4647_p11, %p4641_p8 }
  0x79   :  { %4651 = shalt.err (!%p4648_p12)
}
  0x7a   :  { %146 = dma.hbm_to_vmem [thread:$0]  %s6175_s14, 16, %s144_s18, [#allocation18]  }
  0x7b   :  { %4672 = dma.done.wait [#allocation3], 64  }
  0x7c   :  { %4673 = vsyncadd [#allocation3], 4294967232 }
  0x7d   :  { %4674 = dma.done.wait [#allocation6], 64  }
  0x7e   :  { %4675 = vsyncadd [#allocation6], 4294967232 }
  0x7f   :  { %4676 = dma.done.wait [#allocation9], 113008  }
  0x80   :  { %4677 = vsyncadd [#allocation9], 4294854288 }
  0x81   :  { %4678 = dma.done.wait [#allocation12], 208  }
  0x82   :  { %4679 = vsyncadd [#allocation12], 4294967088 }
  0x83   :  { %4680 = dma.done.wait [#allocation15], 48  }
  0x84   :  { %4681 = vsyncadd [#allocation15], 4294967248 }
  0x85   :  { %4682 = dma.done.wait [#allocation18], 32  }
  0x86   :  { %4683 = vsyncadd [#allocation18], 4294967264  ;;  %v287_v0 = vld [vmem:[%s6164_s3 + $0x350] sm:$0xff]  ;;  %v289_v1 = vld [vmem:[%s6164_s3 + $0x360] sm:$0xff]  ;;  %vm1688_vm5 = vcmask 130048   ;;  %vm3285_vm8 = vcmask 1043456  }
  0x87   :  { %v286_v2 = vld [vmem:[%s6164_s3 + $0x348] sm:$0xff]  ;;  %453 = vmatprep.subr.mxu0 %v287_v0  ;;  %524 = vmatprep.subr.mxu1 %v289_v1  ;;  %v288_v3 = vld [vmem:[%s6164_s3 + $0x358] sm:$0xff]  ;;  %v279_v6 = vld [vmem:[%s6164_s3 + $0x310] sm:$0xff]  ;;  %vm4700_vm10 = vmmov 0   ;;  %vm3281_vm11 = vcmask 31744   ;;  %s4701_s9 = smov [#allocation20]  }
  0x88   :  { %v280_v4 = vld [vmem:[%s6164_s3 + $0x318] sm:$0xff]  ;;  %v282_v5 = vld [vmem:[%s6164_s3 + $0x328] sm:$0xff]  ;;  %454 = vmatpush1.msra.mxu0 %v286_v2  ;;  %525 = vmatpush1.msra.mxu1 %v288_v3  ;;  %v281_v7 = vld [vmem:[%s6164_s3 + $0x320] sm:$0xff]  ;;  %s3986_s16 = sshll.u32 %s4701_s9, 4  ;;  %s3987_s16 = int_to_ptr.vmem [resolvable:$true] %s3986_s16 }
  0x89   :  { %v273_v8 = vld [vmem:[%s6164_s3 + $0x2e0] sm:$0xff]  ;;  %455 = vmatprep.subr.mxu0 %v280_v4  ;;  %526 = vmatprep.subr.mxu1 %v282_v5  ;;  %v275_v9 = vld [vmem:[%s6164_s3 + $0x2f0] sm:$0xff]  ;;  %v272_v10 = vld [vmem:[%s6164_s3 + $0x2d8] sm:$0xff]  ;;  %p4657_p0 = scmp.lt.s32.totalorder %s3987_s16, %s3987_s16 }
  0x8a   :  { %v274_v11 = vld [vmem:[%s6164_s3 + $0x2e8] sm:$0xff]  ;;  %456 = vmatpush1.msra.mxu0 %v279_v6  ;;  %527 = vmatpush1.msra.mxu1 %v281_v7  ;;  %v268_v13 = vld [vmem:[%s6164_s3 + $0x2b8] sm:$0xff]  ;;  %v265_v14 = vld [vmem:[%s6164_s3 + $0x2a0] sm:$0xff] }
  0x8b   :  { %v266_v12 = vld [vmem:[%s6164_s3 + $0x2a8] sm:$0xff]  ;;  %457 = vmatprep.subr.mxu0 %v273_v8  ;;  %528 = vmatprep.subr.mxu1 %v275_v9  ;;  %v267_v15 = vld [vmem:[%s6164_s3 + $0x2b0] sm:$0xff]  ;;  %v261_v17 = vld [vmem:[%s6164_s3 + $0x280] sm:$0xff] }
  0x8c   :  { %458 = vmatpush1.msra.mxu0 %v272_v10  ;;  %529 = vmatpush1.msra.mxu1 %v274_v11  ;;  %v259_v16 = vld [vmem:[%s6164_s3 + $0x270] sm:$0xff]  ;;  %v258_v18 = vld [vmem:[%s6164_s3 + $0x268] sm:$0xff]  ;;  %v260_v19 = vld [vmem:[%s6164_s3 + $0x278] sm:$0xff] }
  0x8d   :  { %459 = vmatprep.subr.mxu0 %v266_v12  ;;  %530 = vmatprep.subr.mxu1 %v268_v13  ;;  %v252_v20 = vld [vmem:[%s6164_s3 + $0x238] sm:$0xff]  ;;  %v254_v21 = vld [vmem:[%s6164_s3 + $0x248] sm:$0xff]  ;;  %v251_v22 = vld [vmem:[%s6164_s3 + $0x230] sm:$0xff] }
  0x8e   :  { %460 = vmatpush1.msra.mxu0 %v265_v14  ;;  %531 = vmatpush1.msra.mxu1 %v267_v15  ;;  %v253_v23 = vld [vmem:[%s6164_s3 + $0x240] sm:$0xff]  ;;  %v247_v25 = vld [vmem:[%s6164_s3 + $0x210] sm:$0xff]  ;;  %v244_v26 = vld [vmem:[%s6164_s3 + $0x1f8] sm:$0xff] }
  0x8f   :  { %461 = vmatprep.subr.mxu0 %v259_v16  ;;  %532 = vmatprep.subr.mxu1 %v261_v17  ;;  %v245_v24 = vld [vmem:[%s6164_s3 + $0x200] sm:$0xff]  ;;  %v246_v27 = vld [vmem:[%s6164_s3 + $0x208] sm:$0xff]  ;;  %v240_v29 = vld [vmem:[%s6164_s3 + $0x1d8] sm:$0xff] }
  0x90   :  { %462 = vmatpush1.msra.mxu0 %v258_v18  ;;  %533 = vmatpush1.msra.mxu1 %v260_v19  ;;  %v238_v28 = vld [vmem:[%s6164_s3 + $0x1c8] sm:$0xff]  ;;  %v237_v30 = vld [vmem:[%s6164_s3 + $0x1c0] sm:$0xff]  ;;  %v239_v31 = vld [vmem:[%s6164_s3 + $0x1d0] sm:$0xff] }
  0x91   :  { %463 = vmatprep.subr.mxu0 %v252_v20  ;;  %534 = vmatprep.subr.mxu1 %v254_v21  ;;  %v231_v32 = vld [vmem:[%s6164_s3 + $0x190] sm:$0xff]  ;;  %v233_v33 = vld [vmem:[%s6164_s3 + $0x1a0] sm:$0xff]  ;;  %v230_v34 = vld [vmem:[%s6164_s3 + $0x188] sm:$0xff] }
  0x92   :  { %464 = vmatpush1.msra.mxu0 %v251_v22  ;;  %535 = vmatpush1.msra.mxu1 %v253_v23  ;;  %v232_v35 = vld [vmem:[%s6164_s3 + $0x198] sm:$0xff]  ;;  %v226_v37 = vld [vmem:[%s6164_s3 + $0x168] sm:$0xff]  ;;  %v223_v38 = vld [vmem:[%s6164_s3 + $0x150] sm:$0xff] }
  0x93   :  { %465 = vmatprep.subr.mxu0 %v245_v24  ;;  %536 = vmatprep.subr.mxu1 %v247_v25  ;;  %v224_v36 = vld [vmem:[%s6164_s3 + $0x158] sm:$0xff]  ;;  %v225_v39 = vld [vmem:[%s6164_s3 + $0x160] sm:$0xff]  ;;  %v219_v41 = vld [vmem:[%s6164_s3 + $0x130] sm:$0xff] }
  0x94   :  { %466 = vmatpush1.msra.mxu0 %v244_v26  ;;  %537 = vmatpush1.msra.mxu1 %v246_v27  ;;  %v217_v40 = vld [vmem:[%s6164_s3 + $0x120] sm:$0xff]  ;;  %v216_v42 = vld [vmem:[%s6164_s3 + $0x118] sm:$0xff]  ;;  %v218_v43 = vld [vmem:[%s6164_s3 + $0x128] sm:$0xff] }
  0x95   :  { %467 = vmatprep.subr.mxu0 %v238_v28  ;;  %538 = vmatprep.subr.mxu1 %v240_v29  ;;  %v210_v44 = vld [vmem:[%s6164_s3 + $0xe8] sm:$0xff]  ;;  %v212_v45 = vld [vmem:[%s6164_s3 + $0xf8] sm:$0xff]  ;;  %v209_v46 = vld [vmem:[%s6164_s3 + $0xe0] sm:$0xff] }
  0x96   :  { %468 = vmatpush1.msra.mxu0 %v237_v30  ;;  %539 = vmatpush1.msra.mxu1 %v239_v31  ;;  %v211_v47 = vld [vmem:[%s6164_s3 + $0xf0] sm:$0xff]  ;;  %v205_v49 = vld [vmem:[%s6164_s3 + $0xc0] sm:$0xff]  ;;  %v202_v50 = vld [vmem:[%s6164_s3 + $0xa8] sm:$0xff] }
  0x97   :  { %469 = vmatprep.subr.mxu0 %v231_v32  ;;  %540 = vmatprep.subr.mxu1 %v233_v33  ;;  %v203_v48 = vld [vmem:[%s6164_s3 + $0xb0] sm:$0xff]  ;;  %v204_v51 = vld [vmem:[%s6164_s3 + $0xb8] sm:$0xff]  ;;  %v198_v53 = vld [vmem:[%s6164_s3 + $0x88] sm:$0xff] }
  0x98   :  { %470 = vmatpush1.msra.mxu0 %v230_v34  ;;  %541 = vmatpush1.msra.mxu1 %v232_v35  ;;  %v196_v52 = vld [vmem:[%s6164_s3 + $0x78] sm:$0xff]  ;;  %v195_v54 = vld [vmem:[%s6164_s3 + $0x70] sm:$0xff]  ;;  %v197_v55 = vld [vmem:[%s6164_s3 + $0x80] sm:$0xff] }
  0x99   :  { %471 = vmatprep.subr.mxu0 %v224_v36  ;;  %542 = vmatprep.subr.mxu1 %v226_v37  ;;  %v189_v56 = vld [vmem:[%s6164_s3 + $0x40] sm:$0xff]  ;;  %v191_v57 = vld [vmem:[%s6164_s3 + $0x50] sm:$0xff]  ;;  %v188_v58 = vld [vmem:[%s6164_s3 + $0x38] sm:$0xff] }
  0x9a   :  { %472 = vmatpush1.msra.mxu0 %v223_v38  ;;  %543 = vmatpush1.msra.mxu1 %v225_v39  ;;  %v190_v59 = vld [vmem:[%s6164_s3 + $0x48] sm:$0xff]  ;;  %v184_v61 = vld [vmem:[%s6164_s3 + $0x18] sm:$0xff]  ;;  %v181_v62 = vld [vmem:[%s6164_s3] sm:$0xff] }
  0x9b   :  { %473 = vmatprep.subr.mxu0 %v217_v40  ;;  %544 = vmatprep.subr.mxu1 %v219_v41  ;;  %v182_v60 = vld [vmem:[%s6164_s3 + $0x8] sm:$0xff]  ;;  %v183_v63 = vld [vmem:[%s6164_s3 + $0x10] sm:$0xff]  ;;  %v401_v1 = vld [vmem:[%s6164_s3 + $0x6e0] sm:$0xff] }
  0x9c   :  { %474 = vmatpush1.msra.mxu0 %v216_v42  ;;  %545 = vmatpush1.msra.mxu1 %v218_v43  ;;  %v399_v0 = vld [vmem:[%s6164_s3 + $0x6d0] sm:$0xff]  ;;  %v398_v2 = vld [vmem:[%s6164_s3 + $0x6c8] sm:$0xff]  ;;  %v400_v3 = vld [vmem:[%s6164_s3 + $0x6d8] sm:$0xff] }
  0x9d   :  { %475 = vmatprep.subr.mxu0 %v210_v44  ;;  %546 = vmatprep.subr.mxu1 %v212_v45  ;;  %v392_v4 = vld [vmem:[%s6164_s3 + $0x698] sm:$0xff]  ;;  %v394_v5 = vld [vmem:[%s6164_s3 + $0x6a8] sm:$0xff]  ;;  %v391_v6 = vld [vmem:[%s6164_s3 + $0x690] sm:$0xff] }
  0x9e   :  { %476 = vmatpush1.msra.mxu0 %v209_v46  ;;  %547 = vmatpush1.msra.mxu1 %v211_v47  ;;  %v393_v7 = vld [vmem:[%s6164_s3 + $0x6a0] sm:$0xff]  ;;  %v387_v9 = vld [vmem:[%s6164_s3 + $0x670] sm:$0xff]  ;;  %v384_v10 = vld [vmem:[%s6164_s3 + $0x658] sm:$0xff] }
  0x9f   :  { %477 = vmatprep.subr.mxu0 %v203_v48  ;;  %548 = vmatprep.subr.mxu1 %v205_v49  ;;  %v385_v8 = vld [vmem:[%s6164_s3 + $0x660] sm:$0xff]  ;;  %v386_v11 = vld [vmem:[%s6164_s3 + $0x668] sm:$0xff]  ;;  %v380_v13 = vld [vmem:[%s6164_s3 + $0x638] sm:$0xff] }
  0xa0   :  { %478 = vmatpush1.msra.mxu0 %v202_v50  ;;  %549 = vmatpush1.msra.mxu1 %v204_v51  ;;  %v378_v12 = vld [vmem:[%s6164_s3 + $0x628] sm:$0xff]  ;;  %v377_v14 = vld [vmem:[%s6164_s3 + $0x620] sm:$0xff]  ;;  %v379_v15 = vld [vmem:[%s6164_s3 + $0x630] sm:$0xff] }
  0xa1   :  { %479 = vmatprep.subr.mxu0 %v196_v52  ;;  %550 = vmatprep.subr.mxu1 %v198_v53  ;;  %v371_v16 = vld [vmem:[%s6164_s3 + $0x5f0] sm:$0xff]  ;;  %v373_v17 = vld [vmem:[%s6164_s3 + $0x600] sm:$0xff]  ;;  %v370_v18 = vld [vmem:[%s6164_s3 + $0x5e8] sm:$0xff] }
  0xa2   :  { %480 = vmatpush1.msra.mxu0 %v195_v54  ;;  %551 = vmatpush1.msra.mxu1 %v197_v55  ;;  %v372_v19 = vld [vmem:[%s6164_s3 + $0x5f8] sm:$0xff]  ;;  %v366_v21 = vld [vmem:[%s6164_s3 + $0x5c8] sm:$0xff]  ;;  %v363_v22 = vld [vmem:[%s6164_s3 + $0x5b0] sm:$0xff] }
  0xa3   :  { %481 = vmatprep.subr.mxu0 %v189_v56  ;;  %552 = vmatprep.subr.mxu1 %v191_v57  ;;  %v364_v20 = vld [vmem:[%s6164_s3 + $0x5b8] sm:$0xff]  ;;  %v365_v23 = vld [vmem:[%s6164_s3 + $0x5c0] sm:$0xff]  ;;  %v359_v25 = vld [vmem:[%s6164_s3 + $0x590] sm:$0xff] }
  0xa4   :  { %482 = vmatpush1.msra.mxu0 %v188_v58  ;;  %553 = vmatpush1.msra.mxu1 %v190_v59  ;;  %v357_v24 = vld [vmem:[%s6164_s3 + $0x580] sm:$0xff]  ;;  %v356_v26 = vld [vmem:[%s6164_s3 + $0x578] sm:$0xff]  ;;  %v358_v27 = vld [vmem:[%s6164_s3 + $0x588] sm:$0xff] }
  0xa5   :  { %483 = vmatprep.subr.mxu0 %v182_v60  ;;  %554 = vmatprep.subr.mxu1 %v184_v61  ;;  %v350_v28 = vld [vmem:[%s6164_s3 + $0x548] sm:$0xff]  ;;  %v352_v29 = vld [vmem:[%s6164_s3 + $0x558] sm:$0xff]  ;;  %v349_v30 = vld [vmem:[%s6164_s3 + $0x540] sm:$0xff] }
  0xa6   :  { %484 = vmatpush1.msra.mxu0 %v181_v62  ;;  %555 = vmatpush1.msra.mxu1 %v183_v63  ;;  %v351_v31 = vld [vmem:[%s6164_s3 + $0x550] sm:$0xff]  ;;  %v345_v33 = vld [vmem:[%s6164_s3 + $0x520] sm:$0xff]  ;;  %v342_v34 = vld [vmem:[%s6164_s3 + $0x508] sm:$0xff] }
  0xa7   :  { %485 = vmatprep.subr.mxu0 %v399_v0  ;;  %556 = vmatprep.subr.mxu1 %v401_v1  ;;  %v343_v32 = vld [vmem:[%s6164_s3 + $0x510] sm:$0xff]  ;;  %v344_v35 = vld [vmem:[%s6164_s3 + $0x518] sm:$0xff]  ;;  %v338_v37 = vld [vmem:[%s6164_s3 + $0x4e8] sm:$0xff] }
  0xa8   :  { %486 = vmatpush2.msra.mxu0 %v398_v2  ;;  %557 = vmatpush2.msra.mxu1 %v400_v3  ;;  %v336_v36 = vld [vmem:[%s6164_s3 + $0x4d8] sm:$0xff]  ;;  %v335_v38 = vld [vmem:[%s6164_s3 + $0x4d0] sm:$0xff]  ;;  %v337_v39 = vld [vmem:[%s6164_s3 + $0x4e0] sm:$0xff] }
  0xa9   :  { %487 = vmatprep.subr.mxu0 %v392_v4  ;;  %558 = vmatprep.subr.mxu1 %v394_v5  ;;  %v329_v40 = vld [vmem:[%s6164_s3 + $0x4a0] sm:$0xff]  ;;  %v331_v41 = vld [vmem:[%s6164_s3 + $0x4b0] sm:$0xff]  ;;  %v328_v42 = vld [vmem:[%s6164_s3 + $0x498] sm:$0xff] }
  0xaa   :  { %488 = vmatpush2.msra.mxu0 %v391_v6  ;;  %559 = vmatpush2.msra.mxu1 %v393_v7  ;;  %v330_v43 = vld [vmem:[%s6164_s3 + $0x4a8] sm:$0xff]  ;;  %v324_v45 = vld [vmem:[%s6164_s3 + $0x478] sm:$0xff]  ;;  %v321_v46 = vld [vmem:[%s6164_s3 + $0x460] sm:$0xff] }
  0xab   :  { %489 = vmatprep.subr.mxu0 %v385_v8  ;;  %560 = vmatprep.subr.mxu1 %v387_v9  ;;  %v322_v44 = vld [vmem:[%s6164_s3 + $0x468] sm:$0xff]  ;;  %v323_v47 = vld [vmem:[%s6164_s3 + $0x470] sm:$0xff]  ;;  %v317_v49 = vld [vmem:[%s6164_s3 + $0x440] sm:$0xff] }
  0xac   :  { %490 = vmatpush2.msra.mxu0 %v384_v10  ;;  %561 = vmatpush2.msra.mxu1 %v386_v11  ;;  %v315_v48 = vld [vmem:[%s6164_s3 + $0x430] sm:$0xff]  ;;  %v314_v50 = vld [vmem:[%s6164_s3 + $0x428] sm:$0xff]  ;;  %v316_v51 = vld [vmem:[%s6164_s3 + $0x438] sm:$0xff] }
  0xad   :  { %491 = vmatprep.subr.mxu0 %v378_v12  ;;  %562 = vmatprep.subr.mxu1 %v380_v13  ;;  %v308_v52 = vld [vmem:[%s6164_s3 + $0x3f8] sm:$0xff]  ;;  %v310_v53 = vld [vmem:[%s6164_s3 + $0x408] sm:$0xff]  ;;  %v307_v54 = vld [vmem:[%s6164_s3 + $0x3f0] sm:$0xff] }
  0xae   :  { %492 = vmatpush2.msra.mxu0 %v377_v14  ;;  %563 = vmatpush2.msra.mxu1 %v379_v15  ;;  %v309_v55 = vld [vmem:[%s6164_s3 + $0x400] sm:$0xff]  ;;  %v303_v58 = vld [vmem:[%s6164_s3 + $0x3d0] sm:$0xff]  ;;  %v300_v59 = vld [vmem:[%s6164_s3 + $0x3b8] sm:$0xff] }
  0xaf   :  { %493 = vmatprep.subr.mxu0 %v371_v16  ;;  %564 = vmatprep.subr.mxu1 %v373_v17  ;;  %v5175_v56 = vld.sshfl [vmem:[#allocation2] sm:$0x33 pattern:$0x76325410]  ;;  %v302_v60 = vld [vmem:[%s6164_s3 + $0x3c8] sm:$0xff]  ;;  %v296_v62 = vld [vmem:[%s6164_s3 + $0x398] sm:$0xff] }
  0xb0   :  { %494 = vmatpush2.msra.mxu0 %v370_v18  ;;  %565 = vmatpush2.msra.mxu1 %v372_v19  ;;  %v301_v57 = vld [vmem:[%s6164_s3 + $0x3c0] sm:$0xff]  ;;  %v294_v61 = vld [vmem:[%s6164_s3 + $0x388] sm:$0xff]  ;;  %v5197_v63 = vcombine.high %v5175_v56, %v5175_v56  ;;  %v295_v1 = vld [vmem:[%s6164_s3 + $0x390] sm:$0xff] }
  0xb1   :  { %495 = vmatprep.subr.mxu0 %v364_v20  ;;  %566 = vmatprep.subr.mxu1 %v366_v21  ;;  %v293_v0 = vld [vmem:[%s6164_s3 + $0x380] sm:$0xff]  ;;  %v291_v2 = vld [vmem:[%s6164_s3 + $0x370] sm:$0xff]  ;;  %v404_v3 = vld [vmem:[%s6164_s3 + $0x6f8] sm:$0xff] }
  0xb2   :  { %496 = vmatpush2.msra.mxu0 %v363_v22  ;;  %567 = vmatpush2.msra.mxu1 %v365_v23  ;;  %v290_v4 = vld [vmem:[%s6164_s3 + $0x368] sm:$0xff]  ;;  %v292_v5 = vld [vmem:[%s6164_s3 + $0x378] sm:$0xff]  ;;  %v397_v7 = vld [vmem:[%s6164_s3 + $0x6c0] sm:$0xff] }
  0xb3   :  { %497 = vmatprep.subr.mxu0 %v357_v24  ;;  %568 = vmatprep.subr.mxu1 %v359_v25  ;;  %v284_v6 = vld [vmem:[%s6164_s3 + $0x338] sm:$0xff]  ;;  %v283_v8 = vld [vmem:[%s6164_s3 + $0x330] sm:$0xff]  ;;  %v285_v9 = vld [vmem:[%s6164_s3 + $0x340] sm:$0xff] }
  0xb4   :  { %498 = vmatpush2.msra.mxu0 %v356_v26  ;;  %569 = vmatpush2.msra.mxu1 %v358_v27  ;;  %v277_v10 = vld [vmem:[%s6164_s3 + $0x300] sm:$0xff]  ;;  %v390_v11 = vld [vmem:[%s6164_s3 + $0x688] sm:$0xff]  ;;  %v276_v12 = vld [vmem:[%s6164_s3 + $0x2f8] sm:$0xff] }
  0xb5   :  { %499 = vmatprep.subr.mxu0 %v350_v28  ;;  %570 = vmatprep.subr.mxu1 %v352_v29  ;;  %v278_v13 = vld [vmem:[%s6164_s3 + $0x308] sm:$0xff]  ;;  %v383_v15 = vld [vmem:[%s6164_s3 + $0x650] sm:$0xff]  ;;  %v269_v16 = vld [vmem:[%s6164_s3 + $0x2c0] sm:$0xff] }
  0xb6   :  { %500 = vmatpush2.msra.mxu0 %v349_v30  ;;  %571 = vmatpush2.msra.mxu1 %v351_v31  ;;  %v270_v14 = vld [vmem:[%s6164_s3 + $0x2c8] sm:$0xff]  ;;  %v271_v17 = vld [vmem:[%s6164_s3 + $0x2d0] sm:$0xff]  ;;  %v376_v19 = vld [vmem:[%s6164_s3 + $0x618] sm:$0xff] }
  0xb7   :  { %501 = vmatprep.subr.mxu0 %v343_v32  ;;  %572 = vmatprep.subr.mxu1 %v345_v33  ;;  %v263_v18 = vld [vmem:[%s6164_s3 + $0x290] sm:$0xff]  ;;  %v262_v20 = vld [vmem:[%s6164_s3 + $0x288] sm:$0xff]  ;;  %v264_v21 = vld [vmem:[%s6164_s3 + $0x298] sm:$0xff] }
  0xb8   :  { %502 = vmatpush2.msra.mxu0 %v342_v34  ;;  %573 = vmatpush2.msra.mxu1 %v344_v35  ;;  %v256_v22 = vld [vmem:[%s6164_s3 + $0x258] sm:$0xff]  ;;  %v369_v23 = vld [vmem:[%s6164_s3 + $0x5e0] sm:$0xff]  ;;  %v255_v24 = vld [vmem:[%s6164_s3 + $0x250] sm:$0xff] }
  0xb9   :  { %503 = vmatprep.subr.mxu0 %v336_v36  ;;  %574 = vmatprep.subr.mxu1 %v338_v37  ;;  %v257_v25 = vld [vmem:[%s6164_s3 + $0x260] sm:$0xff]  ;;  %v362_v27 = vld [vmem:[%s6164_s3 + $0x5a8] sm:$0xff]  ;;  %v248_v28 = vld [vmem:[%s6164_s3 + $0x218] sm:$0xff] }
  0xba   :  { %504 = vmatpush2.msra.mxu0 %v335_v38  ;;  %575 = vmatpush2.msra.mxu1 %v337_v39  ;;  %v249_v26 = vld [vmem:[%s6164_s3 + $0x220] sm:$0xff]  ;;  %v250_v29 = vld [vmem:[%s6164_s3 + $0x228] sm:$0xff]  ;;  %v355_v31 = vld [vmem:[%s6164_s3 + $0x570] sm:$0xff] }
  0xbb   :  { %505 = vmatprep.subr.mxu0 %v329_v40  ;;  %576 = vmatprep.subr.mxu1 %v331_v41  ;;  %v242_v30 = vld [vmem:[%s6164_s3 + $0x1e8] sm:$0xff]  ;;  %v241_v32 = vld [vmem:[%s6164_s3 + $0x1e0] sm:$0xff]  ;;  %v243_v33 = vld [vmem:[%s6164_s3 + $0x1f0] sm:$0xff] }
  0xbc   :  { %506 = vmatpush2.msra.mxu0 %v328_v42  ;;  %577 = vmatpush2.msra.mxu1 %v330_v43  ;;  %v235_v34 = vld [vmem:[%s6164_s3 + $0x1b0] sm:$0xff]  ;;  %v348_v35 = vld [vmem:[%s6164_s3 + $0x538] sm:$0xff]  ;;  %v234_v36 = vld [vmem:[%s6164_s3 + $0x1a8] sm:$0xff] }
  0xbd   :  { %507 = vmatprep.subr.mxu0 %v322_v44  ;;  %578 = vmatprep.subr.mxu1 %v324_v45  ;;  %v236_v37 = vld [vmem:[%s6164_s3 + $0x1b8] sm:$0xff]  ;;  %v341_v39 = vld [vmem:[%s6164_s3 + $0x500] sm:$0xff]  ;;  %v227_v40 = vld [vmem:[%s6164_s3 + $0x170] sm:$0xff] }
  0xbe   :  { %508 = vmatpush2.msra.mxu0 %v321_v46  ;;  %579 = vmatpush2.msra.mxu1 %v323_v47  ;;  %v228_v38 = vld [vmem:[%s6164_s3 + $0x178] sm:$0xff]  ;;  %v229_v41 = vld [vmem:[%s6164_s3 + $0x180] sm:$0xff]  ;;  %v334_v43 = vld [vmem:[%s6164_s3 + $0x4c8] sm:$0xff] }
  0xbf   :  { %509 = vmatprep.subr.mxu0 %v315_v48  ;;  %580 = vmatprep.subr.mxu1 %v317_v49  ;;  %v221_v42 = vld [vmem:[%s6164_s3 + $0x140] sm:$0xff]  ;;  %v220_v44 = vld [vmem:[%s6164_s3 + $0x138] sm:$0xff]  ;;  %v222_v45 = vld [vmem:[%s6164_s3 + $0x148] sm:$0xff] }
  0xc0   :  { %510 = vmatpush2.msra.mxu0 %v314_v50  ;;  %581 = vmatpush2.msra.mxu1 %v316_v51  ;;  %v214_v46 = vld [vmem:[%s6164_s3 + $0x108] sm:$0xff]  ;;  %v327_v47 = vld [vmem:[%s6164_s3 + $0x490] sm:$0xff]  ;;  %v213_v48 = vld [vmem:[%s6164_s3 + $0x100] sm:$0xff] }
  0xc1   :  { %511 = vmatprep.subr.mxu0 %v308_v52  ;;  %582 = vmatprep.subr.mxu1 %v310_v53  ;;  %v215_v49 = vld [vmem:[%s6164_s3 + $0x110] sm:$0xff]  ;;  %v320_v51 = vld [vmem:[%s6164_s3 + $0x458] sm:$0xff]  ;;  %v206_v52 = vld [vmem:[%s6164_s3 + $0xc8] sm:$0xff] }
  0xc2   :  { %512 = vmatpush2.msra.mxu0 %v307_v54  ;;  %583 = vmatpush2.msra.mxu1 %v309_v55  ;;  %v207_v50 = vld [vmem:[%s6164_s3 + $0xd0] sm:$0xff]  ;;  %v208_v53 = vld [vmem:[%s6164_s3 + $0xd8] sm:$0xff]  ;;  %v313_v55 = vld [vmem:[%s6164_s3 + $0x420] sm:$0xff] }
  0xc3   :  { %513 = vmatprep.subr.mxu0 %v301_v57  ;;  %584 = vmatprep.subr.mxu1 %v303_v58  ;;  %v200_v54 = vld [vmem:[%s6164_s3 + $0x98] sm:$0xff]  ;;  %v199_v57 = vld [vmem:[%s6164_s3 + $0x90] sm:$0xff]  ;;  %v201_v58 = vld [vmem:[%s6164_s3 + $0xa0] sm:$0xff] }
  0xc4   :  { %514 = vmatpush2.msra.mxu0 %v300_v59  ;;  %585 = vmatpush2.msra.mxu1 %v302_v60  ;;  %v193_v59 = vld [vmem:[%s6164_s3 + $0x60] sm:$0xff]  ;;  %v306_v60 = vld [vmem:[%s6164_s3 + $0x3e8] sm:$0xff] }
  0xc5   :  { %515 = vmatprep.subr.mxu0 %v294_v61  ;;  %586 = vmatprep.subr.mxu1 %v296_v62  ;;  %v192_v61 = vld [vmem:[%s6164_s3 + $0x58] sm:$0xff]  ;;  %v194_v62 = vld [vmem:[%s6164_s3 + $0x68] sm:$0xff] }
  0xc6   :  { %516 = vmatpush2.msra.mxu0 %v293_v0  ;;  %517 = vmatprep.mubr.f32.mxu0 %v5197_v63  ;;  %v186_v0 = vld [vmem:[%s6164_s3 + $0x28] sm:$0xff] }
  0xc7   :  { %587 = vmatpush2.msra.mxu1 %v295_v1  ;;  %588 = vmatprep.mubr.f32.mxu1 %v5197_v63  ;;  %v299_v1 = vld [vmem:[%s6164_s3 + $0x3b0] sm:$0xff] }
  0xc8   :  { %518 = vmatmul.mubr.f32.vlgmr.msra.gmra.mxu0 %v5175_v56  ;;  %589 = vmatmul.mubr.f32.vlgmr.msra.gmra.mxu1 %v5175_v56 }
  0xc9   :  { %595 = vmatprep.subr.mxu0 %v291_v2  ;;  %4016 = vmatprep.subr.mxu1 %v404_v3  ;;  %v185_v2 = vld [vmem:[%s6164_s3 + $0x20] sm:$0xff]  ;;  %v187_v3 = vld [vmem:[%s6164_s3 + $0x30] sm:$0xff] }
  0xca   :  { %596 = vmatpush1.msra.mxu0 %v290_v4  ;;  %4017 = vmatpush3.msra.mxu1 %v292_v5  ;;  %v403_v4 = vld [vmem:[%s6164_s3 + $0x6f0] sm:$0xff]  ;;  %v402_v5 = vld [vmem:[%s6164_s3 + $0x6e8] sm:$0xff] }
  0xcb   :  { %597 = vmatprep.subr.mxu0 %v284_v6  ;;  %4018 = vmatprep.subr.mxu1 %v397_v7  ;;  %v396_v6 = vld [vmem:[%s6164_s3 + $0x6b8] sm:$0xff]  ;;  %v395_v7 = vld [vmem:[%s6164_s3 + $0x6b0] sm:$0xff] }
  0xcc   :  { %598 = vmatpush1.msra.mxu0 %v283_v8  ;;  %4019 = vmatpush3.msra.mxu1 %v285_v9  ;;  %v893_v8 = vld [vmem:[#allocation10 + $0x440] sm:$0xff]  ;;  %v389_v9 = vld [vmem:[%s6164_s3 + $0x680] sm:$0xff] }
  0xcd   :  { %599 = vmatprep.subr.mxu0 %v277_v10  ;;  %4020 = vmatprep.subr.mxu1 %v390_v11  ;;  %v892_v10 = vld [vmem:[#allocation10 + $0x438] sm:$0xff]  ;;  %v388_v11 = vld [vmem:[%s6164_s3 + $0x678] sm:$0xff] }
  0xce   :  { %600 = vmatpush1.msra.mxu0 %v276_v12  ;;  %4021 = vmatpush3.msra.mxu1 %v278_v13  ;;  %v884_v12 = vld [vmem:[#allocation10 + $0x3f8] sm:$0xff] }
  0xcf   :  { %601 = vmatprep.subr.mxu0 %v270_v14  ;;  %4022 = vmatprep.subr.mxu1 %v383_v15  ;;  %v382_v13 = vld [vmem:[%s6164_s3 + $0x648] sm:$0xff]  ;;  %v883_v14 = vld [vmem:[#allocation10 + $0x3f0] sm:$0xff] }
  0xd0   :  { %602 = vmatpush1.msra.mxu0 %v269_v16  ;;  %4023 = vmatpush3.msra.mxu1 %v271_v17  ;;  %v381_v15 = vld [vmem:[%s6164_s3 + $0x640] sm:$0xff]  ;;  %v874_v17 = vld [vmem:[#allocation10 + $0x3a8] sm:$0xff] }
  0xd1   :  { %603 = vmatprep.subr.mxu0 %v263_v18  ;;  %4024 = vmatprep.subr.mxu1 %v376_v19  ;;  %v875_v16 = vld [vmem:[#allocation10 + $0x3b0] sm:$0xff]  ;;  %v374_v18 = vld [vmem:[%s6164_s3 + $0x608] sm:$0xff]  ;;  %v866_v19 = vld [vmem:[#allocation10 + $0x368] sm:$0xff] }
  0xd2   :  { %604 = vmatpush1.msra.mxu0 %v262_v20  ;;  %4025 = vmatpush3.msra.mxu1 %v264_v21  ;;  %v368_v20 = vld [vmem:[%s6164_s3 + $0x5d8] sm:$0xff]  ;;  %v865_v21 = vld [vmem:[#allocation10 + $0x360] sm:$0xff] }
  0xd3   :  { %605 = vmatprep.subr.mxu0 %v256_v22  ;;  %4026 = vmatprep.subr.mxu1 %v369_v23  ;;  %v367_v22 = vld [vmem:[%s6164_s3 + $0x5d0] sm:$0xff] }
  0xd4   :  { %606 = vmatpush1.msra.mxu0 %v255_v24  ;;  %4027 = vmatpush3.msra.mxu1 %v257_v25  ;;  %v857_v23 = vld [vmem:[#allocation10 + $0x320] sm:$0xff]  ;;  %v361_v24 = vld [vmem:[%s6164_s3 + $0x5a0] sm:$0xff]  ;;  %v856_v25 = vld [vmem:[#allocation10 + $0x318] sm:$0xff] }
  0xd5   :  { %607 = vmatprep.subr.mxu0 %v249_v26  ;;  %4028 = vmatprep.subr.mxu1 %v362_v27  ;;  %v360_v26 = vld [vmem:[%s6164_s3 + $0x598] sm:$0xff]  ;;  %v848_v27 = vld [vmem:[#allocation10 + $0x2d8] sm:$0xff] }
  0xd6   :  { %608 = vmatpush1.msra.mxu0 %v248_v28  ;;  %4029 = vmatpush3.msra.mxu1 %v250_v29  ;;  %v354_v28 = vld [vmem:[%s6164_s3 + $0x568] sm:$0xff]  ;;  %v847_v29 = vld [vmem:[#allocation10 + $0x2d0] sm:$0xff] }
  0xd7   :  { %609 = vmatprep.subr.mxu0 %v242_v30  ;;  %4030 = vmatprep.subr.mxu1 %v355_v31  ;;  %v353_v30 = vld [vmem:[%s6164_s3 + $0x560] sm:$0xff] }
  0xd8   :  { %610 = vmatpush1.msra.mxu0 %v241_v32  ;;  %4031 = vmatpush3.msra.mxu1 %v243_v33  ;;  %v839_v31 = vld [vmem:[#allocation10 + $0x290] sm:$0xff]  ;;  %v347_v32 = vld [vmem:[%s6164_s3 + $0x530] sm:$0xff]  ;;  %v838_v33 = vld [vmem:[#allocation10 + $0x288] sm:$0xff] }
  0xd9   :  { %611 = vmatprep.subr.mxu0 %v235_v34  ;;  %4032 = vmatprep.subr.mxu1 %v348_v35  ;;  %v346_v34 = vld [vmem:[%s6164_s3 + $0x528] sm:$0xff]  ;;  %v830_v35 = vld [vmem:[#allocation10 + $0x248] sm:$0xff] }
  0xda   :  { %612 = vmatpush1.msra.mxu0 %v234_v36  ;;  %4033 = vmatpush3.msra.mxu1 %v236_v37  ;;  %v340_v36 = vld [vmem:[%s6164_s3 + $0x4f8] sm:$0xff]  ;;  %v829_v37 = vld [vmem:[#allocation10 + $0x240] sm:$0xff] }
  0xdb   :  { %613 = vmatprep.subr.mxu0 %v228_v38  ;;  %4034 = vmatprep.subr.mxu1 %v341_v39  ;;  %v339_v38 = vld [vmem:[%s6164_s3 + $0x4f0] sm:$0xff] }
  0xdc   :  { %614 = vmatpush1.msra.mxu0 %v227_v40  ;;  %4035 = vmatpush3.msra.mxu1 %v229_v41  ;;  %v821_v39 = vld [vmem:[#allocation10 + $0x200] sm:$0xff]  ;;  %v333_v40 = vld [vmem:[%s6164_s3 + $0x4c0] sm:$0xff]  ;;  %v820_v41 = vld [vmem:[#allocation10 + $0x1f8] sm:$0xff] }
  0xdd   :  { %615 = vmatprep.subr.mxu0 %v221_v42  ;;  %4036 = vmatprep.subr.mxu1 %v334_v43  ;;  %v332_v42 = vld [vmem:[%s6164_s3 + $0x4b8] sm:$0xff]  ;;  %v812_v43 = vld [vmem:[#allocation10 + $0x1b8] sm:$0xff] }
  0xde   :  { %616 = vmatpush1.msra.mxu0 %v220_v44  ;;  %4037 = vmatpush3.msra.mxu1 %v222_v45  ;;  %v326_v44 = vld [vmem:[%s6164_s3 + $0x488] sm:$0xff]  ;;  %v811_v45 = vld [vmem:[#allocation10 + $0x1b0] sm:$0xff] }
  0xdf   :  { %617 = vmatprep.subr.mxu0 %v214_v46  ;;  %4038 = vmatprep.subr.mxu1 %v327_v47  ;;  %v325_v46 = vld [vmem:[%s6164_s3 + $0x480] sm:$0xff] }
  0xe0   :  { %618 = vmatpush1.msra.mxu0 %v213_v48  ;;  %4039 = vmatpush3.msra.mxu1 %v215_v49  ;;  %v803_v47 = vld [vmem:[#allocation10 + $0x170] sm:$0xff]  ;;  %v319_v48 = vld [vmem:[%s6164_s3 + $0x450] sm:$0xff]  ;;  %v802_v49 = vld [vmem:[#allocation10 + $0x168] sm:$0xff] }
  0xe1   :  { %619 = vmatprep.subr.mxu0 %v207_v50  ;;  %4040 = vmatprep.subr.mxu1 %v320_v51  ;;  %v318_v50 = vld [vmem:[%s6164_s3 + $0x448] sm:$0xff]  ;;  %v794_v51 = vld [vmem:[#allocation10 + $0x128] sm:$0xff] }
  0xe2   :  { %620 = vmatpush1.msra.mxu0 %v206_v52  ;;  %4041 = vmatpush3.msra.mxu1 %v208_v53  ;;  %v312_v52 = vld [vmem:[%s6164_s3 + $0x418] sm:$0xff]  ;;  %v793_v53 = vld [vmem:[#allocation10 + $0x120] sm:$0xff] }
  0xe3   :  { %621 = vmatprep.subr.mxu0 %v200_v54  ;;  %4042 = vmatprep.subr.mxu1 %v313_v55  ;;  %v311_v54 = vld [vmem:[%s6164_s3 + $0x410] sm:$0xff] }
  0xe4   :  { %622 = vmatpush1.msra.mxu0 %v199_v57  ;;  %4043 = vmatpush3.msra.mxu1 %v201_v58  ;;  %v785_v55 = vld [vmem:[#allocation10 + $0xe0] sm:$0xff]  ;;  %v305_v57 = vld [vmem:[%s6164_s3 + $0x3e0] sm:$0xff]  ;;  %v784_v58 = vld [vmem:[#allocation10 + $0xd8] sm:$0xff] }
  0xe5   :  { %623 = vmatprep.subr.mxu0 %v193_v59  ;;  %4044 = vmatprep.subr.mxu1 %v306_v60  ;;  %v304_v59 = vld [vmem:[%s6164_s3 + $0x3d8] sm:$0xff]  ;;  %v776_v60 = vld [vmem:[#allocation10 + $0x98] sm:$0xff] }
  0xe6   :  { %624 = vmatpush1.msra.mxu0 %v192_v61  ;;  %4045 = vmatpush3.msra.mxu1 %v194_v62  ;;  %v298_v61 = vld [vmem:[%s6164_s3 + $0x3a8] sm:$0xff]  ;;  %v775_v62 = vld [vmem:[#allocation10 + $0x90] sm:$0xff] }
  0xe7   :  { %625 = vmatprep.subr.mxu0 %v186_v0  ;;  %4046 = vmatprep.subr.mxu1 %v299_v1  ;;  %v297_v0 = vld [vmem:[%s6164_s3 + $0x3a0] sm:$0xff] }
  0xe8   :  { %626 = vmatpush1.msra.mxu0 %v185_v2  ;;  %4047 = vmatpush3.msra.mxu1 %v187_v3  ;;  %v767_v1 = vld [vmem:[#allocation10 + $0x50] sm:$0xff]  ;;  %v1181_v2 = vld [vmem:[#allocation10 + $0xd40] sm:$0xff]  ;;  %v1180_v3 = vld [vmem:[#allocation10 + $0xd38] sm:$0xff] }
  0xe9   :  { %730 = vmatprep.mubr.f32.mxu1 %v5197_v63  ;;  %627 = vmatprep.subr.mxu0 %v403_v4  ;;  %v766_v4 = vld [vmem:[#allocation10 + $0x48] sm:$0xff] }
  0xea   :  { %731 = vmatmul.mubr.f32.vlgmr.msra.gmra.mxu1 %v5175_v56  ;;  %628 = vmatpush2.msra.mxu0 %v402_v5  ;;  %v1172_v5 = vld [vmem:[#allocation10 + $0xcf8] sm:$0xff] }
  0xeb   :  { %629 = vmatprep.subr.mxu0 %v396_v6  ;;  %659 = vmatprep.mubr.f32.mxu0 %v5197_v63  ;;  %v375_v63 = vld [vmem:[%s6164_s3 + $0x610] sm:$0xff]  ;;  %v758_v6 = vld [vmem:[#allocation10 + $0x8] sm:$0xff] }
  0xec   :  { %630 = vmatpush2.msra.mxu0 %v395_v7  ;;  %1692 = vmatprep.subr.mxu1 %v893_v8  ;;  %v1171_v7 = vld [vmem:[#allocation10 + $0xcf0] sm:$0xff]  ;;  %v757_v8 = vld [vmem:[#allocation10] sm:$0xff] }
  0xed   :  { %631 = vmatprep.subr.mxu0 %v389_v9  ;;  %1693 = vmatpush1.msra.mxu1 %v892_v10  ;;  %v1163_v9 = vld [vmem:[#allocation10 + $0xcb0] sm:$0xff]  ;;  %v1037_v10 = vld [vmem:[#allocation10 + $0x8c0] sm:$0xff] }
  0xee   :  { %632 = vmatpush2.msra.mxu0 %v388_v11  ;;  %1694 = vmatprep.subr.mxu1 %v884_v12  ;;  %v1162_v11 = vld [vmem:[#allocation10 + $0xca8] sm:$0xff]  ;;  %v1036_v12 = vld [vmem:[#allocation10 + $0x8b8] sm:$0xff] }
  0xef   :  { %633 = vmatprep.subr.mxu0 %v382_v13  ;;  %1695 = vmatpush1.msra.mxu1 %v883_v14  ;;  %v1154_v13 = vld [vmem:[#allocation10 + $0xc68] sm:$0xff]  ;;  %v1028_v14 = vld [vmem:[#allocation10 + $0x878] sm:$0xff] }
  0xf0   :  { %634 = vmatpush2.msra.mxu0 %v381_v15  ;;  %1696 = vmatprep.subr.mxu1 %v875_v16  ;;  %v1153_v15 = vld [vmem:[#allocation10 + $0xc60] sm:$0xff]  ;;  %v1027_v16 = vld [vmem:[#allocation10 + $0x870] sm:$0xff] }
  0xf1   :  { %635 = vmatprep.subr.mxu0 %v375_v63  ;;  %1697 = vmatpush1.msra.mxu1 %v874_v17  ;;  %v1019_v63 = vld [vmem:[#allocation10 + $0x830] sm:$0xff]  ;;  %v1144_v17 = vld [vmem:[#allocation10 + $0xc18] sm:$0xff] }
  0xf2   :  { %636 = vmatpush2.msra.mxu0 %v374_v18  ;;  %1698 = vmatprep.subr.mxu1 %v866_v19  ;;  %v1018_v18 = vld [vmem:[#allocation10 + $0x828] sm:$0xff]  ;;  %v1136_v19 = vld [vmem:[#allocation10 + $0xbd8] sm:$0xff] }
  0xf3   :  { %637 = vmatprep.subr.mxu0 %v368_v20  ;;  %1699 = vmatpush1.msra.mxu1 %v865_v21  ;;  %v1010_v20 = vld [vmem:[#allocation10 + $0x7e8] sm:$0xff]  ;;  %v1135_v21 = vld [vmem:[#allocation10 + $0xbd0] sm:$0xff] }
  0xf4   :  { %638 = vmatpush2.msra.mxu0 %v367_v22  ;;  %1700 = vmatprep.subr.mxu1 %v857_v23  ;;  %v1009_v22 = vld [vmem:[#allocation10 + $0x7e0] sm:$0xff]  ;;  %v1127_v23 = vld [vmem:[#allocation10 + $0xb90] sm:$0xff] }
  0xf5   :  { %639 = vmatprep.subr.mxu0 %v361_v24  ;;  %1701 = vmatpush1.msra.mxu1 %v856_v25  ;;  %v1001_v24 = vld [vmem:[#allocation10 + $0x7a0] sm:$0xff]  ;;  %v1126_v25 = vld [vmem:[#allocation10 + $0xb88] sm:$0xff] }
  0xf6   :  { %640 = vmatpush2.msra.mxu0 %v360_v26  ;;  %1702 = vmatprep.subr.mxu1 %v848_v27  ;;  %v1000_v26 = vld [vmem:[#allocation10 + $0x798] sm:$0xff]  ;;  %v1118_v27 = vld [vmem:[#allocation10 + $0xb48] sm:$0xff] }
  0xf7   :  { %641 = vmatprep.subr.mxu0 %v354_v28  ;;  %1703 = vmatpush1.msra.mxu1 %v847_v29  ;;  %v992_v28 = vld [vmem:[#allocation10 + $0x758] sm:$0xff]  ;;  %v1117_v29 = vld [vmem:[#allocation10 + $0xb40] sm:$0xff] }
  0xf8   :  { %642 = vmatpush2.msra.mxu0 %v353_v30  ;;  %1704 = vmatprep.subr.mxu1 %v839_v31  ;;  %v991_v30 = vld [vmem:[#allocation10 + $0x750] sm:$0xff]  ;;  %v1109_v31 = vld [vmem:[#allocation10 + $0xb00] sm:$0xff] }
  0xf9   :  { %643 = vmatprep.subr.mxu0 %v347_v32  ;;  %1705 = vmatpush1.msra.mxu1 %v838_v33  ;;  %v983_v32 = vld [vmem:[#allocation10 + $0x710] sm:$0xff]  ;;  %v1108_v33 = vld [vmem:[#allocation10 + $0xaf8] sm:$0xff] }
  0xfa   :  { %644 = vmatpush2.msra.mxu0 %v346_v34  ;;  %1706 = vmatprep.subr.mxu1 %v830_v35  ;;  %v982_v34 = vld [vmem:[#allocation10 + $0x708] sm:$0xff]  ;;  %v1100_v35 = vld [vmem:[#allocation10 + $0xab8] sm:$0xff] }
  0xfb   :  { %645 = vmatprep.subr.mxu0 %v340_v36  ;;  %1707 = vmatpush1.msra.mxu1 %v829_v37  ;;  %v974_v36 = vld [vmem:[#allocation10 + $0x6c8] sm:$0xff]  ;;  %v1099_v37 = vld [vmem:[#allocation10 + $0xab0] sm:$0xff] }
  0xfc   :  { %646 = vmatpush2.msra.mxu0 %v339_v38  ;;  %1708 = vmatprep.subr.mxu1 %v821_v39  ;;  %v973_v38 = vld [vmem:[#allocation10 + $0x6c0] sm:$0xff]  ;;  %v1091_v39 = vld [vmem:[#allocation10 + $0xa70] sm:$0xff] }
  0xfd   :  { %647 = vmatprep.subr.mxu0 %v333_v40  ;;  %1709 = vmatpush1.msra.mxu1 %v820_v41  ;;  %v965_v40 = vld [vmem:[#allocation10 + $0x680] sm:$0xff]  ;;  %v1090_v41 = vld [vmem:[#allocation10 + $0xa68] sm:$0xff] }
  0xfe   :  { %648 = vmatpush2.msra.mxu0 %v332_v42  ;;  %1710 = vmatprep.subr.mxu1 %v812_v43  ;;  %v964_v42 = vld [vmem:[#allocation10 + $0x678] sm:$0xff]  ;;  %v1082_v43 = vld [vmem:[#allocation10 + $0xa28] sm:$0xff] }
  0xff   :  { %649 = vmatprep.subr.mxu0 %v326_v44  ;;  %1711 = vmatpush1.msra.mxu1 %v811_v45  ;;  %v956_v44 = vld [vmem:[#allocation10 + $0x638] sm:$0xff]  ;;  %v1081_v45 = vld [vmem:[#allocation10 + $0xa20] sm:$0xff] }
 0x100   :  { %650 = vmatpush2.msra.mxu0 %v325_v46  ;;  %1712 = vmatprep.subr.mxu1 %v803_v47  ;;  %v955_v46 = vld [vmem:[#allocation10 + $0x630] sm:$0xff]  ;;  %v1073_v47 = vld [vmem:[#allocation10 + $0x9e0] sm:$0xff] }
 0x101   :  { %651 = vmatprep.subr.mxu0 %v319_v48  ;;  %1713 = vmatpush1.msra.mxu1 %v802_v49  ;;  %v947_v48 = vld [vmem:[#allocation10 + $0x5f0] sm:$0xff]  ;;  %v1072_v49 = vld [vmem:[#allocation10 + $0x9d8] sm:$0xff] }
 0x102   :  { %652 = vmatpush2.msra.mxu0 %v318_v50  ;;  %1714 = vmatprep.subr.mxu1 %v794_v51  ;;  %v946_v50 = vld [vmem:[#allocation10 + $0x5e8] sm:$0xff]  ;;  %v1064_v51 = vld [vmem:[#allocation10 + $0x998] sm:$0xff] }
 0x103   :  { %653 = vmatprep.subr.mxu0 %v312_v52  ;;  %1715 = vmatpush1.msra.mxu1 %v793_v53  ;;  %v938_v52 = vld [vmem:[#allocation10 + $0x5a8] sm:$0xff]  ;;  %v1063_v53 = vld [vmem:[#allocation10 + $0x990] sm:$0xff] }
 0x104   :  { %654 = vmatpush2.msra.mxu0 %v311_v54  ;;  %1716 = vmatprep.subr.mxu1 %v785_v55  ;;  %v937_v54 = vld [vmem:[#allocation10 + $0x5a0] sm:$0xff]  ;;  %v1055_v55 = vld [vmem:[#allocation10 + $0x950] sm:$0xff] }
 0x105   :  { %655 = vmatprep.subr.mxu0 %v305_v57  ;;  %1717 = vmatpush1.msra.mxu1 %v784_v58  ;;  %v929_v57 = vld [vmem:[#allocation10 + $0x560] sm:$0xff]  ;;  %v1054_v58 = vld [vmem:[#allocation10 + $0x948] sm:$0xff] }
 0x106   :  { %656 = vmatpush2.msra.mxu0 %v304_v59  ;;  %1718 = vmatprep.subr.mxu1 %v776_v60  ;;  %v928_v59 = vld [vmem:[#allocation10 + $0x558] sm:$0xff]  ;;  %v1046_v60 = vld [vmem:[#allocation10 + $0x908] sm:$0xff] }
 0x107   :  { %657 = vmatprep.subr.mxu0 %v298_v61  ;;  %1719 = vmatpush1.msra.mxu1 %v775_v62  ;;  %v920_v61 = vld [vmem:[#allocation10 + $0x518] sm:$0xff]  ;;  %v1045_v62 = vld [vmem:[#allocation10 + $0x900] sm:$0xff] }
 0x108   :  { %658 = vmatpush2.msra.mxu0 %v297_v0  ;;  %1720 = vmatprep.subr.mxu1 %v767_v1  ;;  %v919_v0 = vld [vmem:[#allocation10 + $0x510] sm:$0xff]  ;;  %v1325_v1 = vld [vmem:[#allocation10 + $0x11c0] sm:$0xff] }
 0x109   :  { %660 = vmatmul.mubr.f32.vlgmr.msra.gmra.mxu0 %v5175_v56  ;;  %1763 = vmatprep.subr.mxu0 %v1181_v2  ;;  %v1145_v56 = vld [vmem:[#allocation10 + $0xc20] sm:$0xff]  ;;  %v911_v2 = vld [vmem:[#allocation10 + $0x4d0] sm:$0xff] }
 0x10a   :  { %1764 = vmatpush1.msra.mxu0 %v1180_v3  ;;  %1721 = vmatpush1.msra.mxu1 %v766_v4  ;;  %v1324_v3 = vld [vmem:[#allocation10 + $0x11b8] sm:$0xff]  ;;  %v910_v4 = vld [vmem:[#allocation10 + $0x4c8] sm:$0xff] }
 0x10b   :  { %1765 = vmatprep.subr.mxu0 %v1172_v5  ;;  %1722 = vmatprep.subr.mxu1 %v758_v6  ;;  %v1316_v5 = vld [vmem:[#allocation10 + $0x1178] sm:$0xff]  ;;  %v902_v6 = vld [vmem:[#allocation10 + $0x488] sm:$0xff] }
 0x10c   :  { %1766 = vmatpush1.msra.mxu0 %v1171_v7  ;;  %1723 = vmatpush1.msra.mxu1 %v757_v8  ;;  %v1315_v7 = vld [vmem:[#allocation10 + $0x1170] sm:$0xff]  ;;  %v901_v8 = vld [vmem:[#allocation10 + $0x480] sm:$0xff] }
 0x10d   :  { %1767 = vmatprep.subr.mxu0 %v1163_v9  ;;  %1724 = vmatprep.subr.mxu1 %v1037_v10  ;;  %v1307_v9 = vld [vmem:[#allocation10 + $0x1130] sm:$0xff]  ;;  %v1469_v10 = vld [vmem:[#allocation10 + $0x1640] sm:$0xff] }
 0x10e   :  { %1768 = vmatpush1.msra.mxu0 %v1162_v11  ;;  %1725 = vmatpush2.msra.mxu1 %v1036_v12  ;;  %v1306_v11 = vld [vmem:[#allocation10 + $0x1128] sm:$0xff] }
 0x10f   :  { %1769 = vmatprep.subr.mxu0 %v1154_v13  ;;  %1726 = vmatprep.subr.mxu1 %v1028_v14  ;;  %v1298_v12 = vld [vmem:[#allocation10 + $0x10e8] sm:$0xff]  ;;  %v1297_v13 = vld [vmem:[#allocation10 + $0x10e0] sm:$0xff] }
 0x110   :  { %1770 = vmatpush1.msra.mxu0 %v1153_v15  ;;  %1727 = vmatpush2.msra.mxu1 %v1027_v16  ;;  %v1289_v14 = vld [vmem:[#allocation10 + $0x10a0] sm:$0xff]  ;;  %v1288_v15 = vld [vmem:[#allocation10 + $0x1098] sm:$0xff] }
 0x111   :  { %1771 = vmatprep.subr.mxu0 %v1145_v56  ;;  %1728 = vmatprep.subr.mxu1 %v1019_v63  ;;  %v1280_v16 = vld [vmem:[#allocation10 + $0x1058] sm:$0xff]  ;;  %v1279_v56 = vld [vmem:[#allocation10 + $0x1050] sm:$0xff] }
 0x112   :  { %1772 = vmatpush1.msra.mxu0 %v1144_v17  ;;  %1729 = vmatpush2.msra.mxu1 %v1018_v18  ;;  %v1271_v63 = vld [vmem:[#allocation10 + $0x1010] sm:$0xff]  ;;  %v1270_v17 = vld [vmem:[#allocation10 + $0x1008] sm:$0xff] }
 0x113   :  { %1773 = vmatprep.subr.mxu0 %v1136_v19  ;;  %1730 = vmatprep.subr.mxu1 %v1010_v20  ;;  %v1262_v18 = vld [vmem:[#allocation10 + $0xfc8] sm:$0xff]  ;;  %v1261_v19 = vld [vmem:[#allocation10 + $0xfc0] sm:$0xff] }
 0x114   :  { %1774 = vmatpush1.msra.mxu0 %v1135_v21  ;;  %1731 = vmatpush2.msra.mxu1 %v1009_v22  ;;  %v1253_v20 = vld [vmem:[#allocation10 + $0xf80] sm:$0xff]  ;;  %v1252_v21 = vld [vmem:[#allocation10 + $0xf78] sm:$0xff] }
 0x115   :  { %1775 = vmatprep.subr.mxu0 %v1127_v23  ;;  %1732 = vmatprep.subr.mxu1 %v1001_v24  ;;  %v1244_v22 = vld [vmem:[#allocation10 + $0xf38] sm:$0xff]  ;;  %v1243_v23 = vld [vmem:[#allocation10 + $0xf30] sm:$0xff] }
 0x116   :  { %1776 = vmatpush1.msra.mxu0 %v1126_v25  ;;  %1733 = vmatpush2.msra.mxu1 %v1000_v26  ;;  %v1235_v24 = vld [vmem:[#allocation10 + $0xef0] sm:$0xff]  ;;  %v1234_v25 = vld [vmem:[#allocation10 + $0xee8] sm:$0xff] }
 0x117   :  { %1777 = vmatprep.subr.mxu0 %v1118_v27  ;;  %1734 = vmatprep.subr.mxu1 %v992_v28  ;;  %v1226_v26 = vld [vmem:[#allocation10 + $0xea8] sm:$0xff]  ;;  %v1225_v27 = vld [vmem:[#allocation10 + $0xea0] sm:$0xff] }
 0x118   :  { %1778 = vmatpush1.msra.mxu0 %v1117_v29  ;;  %1735 = vmatpush2.msra.mxu1 %v991_v30  ;;  %v1217_v28 = vld [vmem:[#allocation10 + $0xe60] sm:$0xff]  ;;  %v1216_v29 = vld [vmem:[#allocation10 + $0xe58] sm:$0xff] }
 0x119   :  { %1779 = vmatprep.subr.mxu0 %v1109_v31  ;;  %1736 = vmatprep.subr.mxu1 %v983_v32  ;;  %v1208_v30 = vld [vmem:[#allocation10 + $0xe18] sm:$0xff]  ;;  %v1207_v31 = vld [vmem:[#allocation10 + $0xe10] sm:$0xff] }
 0x11a   :  { %1780 = vmatpush1.msra.mxu0 %v1108_v33  ;;  %1737 = vmatpush2.msra.mxu1 %v982_v34  ;;  %v1199_v32 = vld [vmem:[#allocation10 + $0xdd0] sm:$0xff]  ;;  %v1198_v33 = vld [vmem:[#allocation10 + $0xdc8] sm:$0xff] }
 0x11b   :  { %1781 = vmatprep.subr.mxu0 %v1100_v35  ;;  %1738 = vmatprep.subr.mxu1 %v974_v36  ;;  %v1190_v34 = vld [vmem:[#allocation10 + $0xd88] sm:$0xff]  ;;  %v1189_v35 = vld [vmem:[#allocation10 + $0xd80] sm:$0xff]  ;;  %v1631_v36 = vld [vmem:[#allocation10 + $0x1b50] sm:$0xff] }
 0x11c   :  { %1782 = vmatpush1.msra.mxu0 %v1099_v37  ;;  %1739 = vmatpush2.msra.mxu1 %v973_v38  ;;  %v407_v37 = vlaneseq }
 0x11d   :  { %1783 = vmatprep.subr.mxu0 %v1091_v39  ;;  %1740 = vmatprep.subr.mxu1 %v965_v40 }
 0x11e   :  { %1784 = vmatpush1.msra.mxu0 %v1090_v41  ;;  %1741 = vmatpush2.msra.mxu1 %v964_v42  ;;  %v5501_v38 = vshrl.u32 %v407_v37, 7  ;;  %v5505_v41 = vld [vmem:[#allocation8] sm:$0x7f]  ;;  %v1342_v37 = vld [vmem:[#allocation10 + $0x1248] sm:$0xff] }
 0x11f   :  { %1785 = vmatprep.subr.mxu0 %v1082_v43  ;;  %1742 = vmatprep.subr.mxu1 %v956_v44 }
 0x120   :  { %1786 = vmatpush1.msra.mxu0 %v1081_v45  ;;  %1743 = vmatpush2.msra.mxu1 %v955_v46  ;;  %v409_v39 = vsub.s32 0, %v5501_v38  ;;  %v417_v40 = vsub.s32 2, %v5501_v38  ;;  %v413_v42 = vsub.s32 1, %v5501_v38  ;;  %v421_v43 = vsub.s32 3, %v5501_v38 }
 0x121   :  { %1787 = vmatprep.subr.mxu0 %v1073_v47  ;;  %1744 = vmatprep.subr.mxu1 %v947_v48 }
 0x122   :  { %1788 = vmatpush1.msra.mxu0 %v1072_v49  ;;  %1745 = vmatpush2.msra.mxu1 %v946_v50  ;;  %v410_v44 = vrot.slane %v5505_v41, %v409_v39  ;;  %v418_v45 = vrot.slane %v5505_v41, %v417_v40  ;;  %v414_v48 = vrot.slane %v5505_v41, %v413_v42 }
 0x123   :  { %1789 = vmatprep.subr.mxu0 %v1064_v51  ;;  %1746 = vmatprep.subr.mxu1 %v938_v52  ;;  %v422_v49 = vrot.slane %v5505_v41, %v421_v43 }
 0x124   :  { %1790 = vmatpush1.msra.mxu0 %v1063_v53  ;;  %1747 = vmatpush2.msra.mxu1 %v937_v54 }
 0x125   :  { %1791 = vmatprep.subr.mxu0 %v1055_v55  ;;  %1748 = vmatprep.subr.mxu1 %v929_v57 }
 0x126   :  { %1792 = vmatpush1.msra.mxu0 %v1054_v58  ;;  %1749 = vmatpush2.msra.mxu1 %v928_v59 }
 0x127   :  { %1793 = vmatprep.subr.mxu0 %v1046_v60  ;;  %1750 = vmatprep.subr.mxu1 %v920_v61 }
 0x128   :  { %1794 = vmatpush1.msra.mxu0 %v1045_v62  ;;  %1751 = vmatpush2.msra.mxu1 %v919_v0  ;;  %v1468_v0 = vld [vmem:[#allocation10 + $0x1638] sm:$0xff] }
 0x129   :  { %1795 = vmatprep.subr.mxu0 %v1325_v1  ;;  %1752 = vmatprep.subr.mxu1 %v911_v2  ;;  %v1630_v1 = vld [vmem:[#allocation10 + $0x1b48] sm:$0xff] }
 0x12a   :  { %1796 = vmatpush2.msra.mxu0 %v1324_v3  ;;  %1753 = vmatpush2.msra.mxu1 %v910_v4  ;;  %v1460_v4 = vld [vmem:[#allocation10 + $0x15f8] sm:$0xff] }
 0x12b   :  { %1797 = vmatprep.subr.mxu0 %v1316_v5  ;;  %1754 = vmatprep.subr.mxu1 %v902_v6  ;;  %v1622_v5 = vld [vmem:[#allocation10 + $0x1b08] sm:$0xff]  ;;  %v1459_v6 = vld [vmem:[#allocation10 + $0x15f0] sm:$0xff] }
 0x12c   :  { %1798 = vmatpush2.msra.mxu0 %v1315_v7  ;;  %1755 = vmatpush2.msra.mxu1 %v901_v8  ;;  %v1621_v7 = vld [vmem:[#allocation10 + $0x1b00] sm:$0xff]  ;;  %v1451_v8 = vld [vmem:[#allocation10 + $0x15b0] sm:$0xff] }
 0x12d   :  { %1799 = vmatprep.subr.mxu0 %v1307_v9  ;;  %1834 = vmatprep.subr.mxu1 %v1469_v10  ;;  %v1450_v9 = vld [vmem:[#allocation10 + $0x15a8] sm:$0xff]  ;;  %v895_v10 = vld [vmem:[#allocation10 + $0x450] sm:$0xff] }
 0x12e   :  { %1800 = vmatpush2.msra.mxu0 %v1306_v11  ;;  %v1442_v11 = vld [vmem:[#allocation10 + $0x1568] sm:$0xff] }
 0x12f   :  { %1801 = vmatprep.subr.mxu0 %v1298_v12  ;;  %v1441_v12 = vld [vmem:[#allocation10 + $0x1560] sm:$0xff] }
 0x130   :  { %1802 = vmatpush2.msra.mxu0 %v1297_v13  ;;  %v4699_v13 = vmov 0.0  }
 0x131   :  { %1803 = vmatprep.subr.mxu0 %v1289_v14  ;;  %v1433_v14 = vld [vmem:[#allocation10 + $0x1520] sm:$0xff] }
 0x132   :  { %1804 = vmatpush2.msra.mxu0 %v1288_v15  ;;  %v1432_v15 = vld [vmem:[#allocation10 + $0x1518] sm:$0xff] }
 0x133   :  { %1805 = vmatprep.subr.mxu0 %v1280_v16  ;;  %v1424_v16 = vld [vmem:[#allocation10 + $0x14d8] sm:$0xff] }
 0x134   :  { %1806 = vmatpush2.msra.mxu0 %v1279_v56  ;;  %v1423_v56 = vld [vmem:[#allocation10 + $0x14d0] sm:$0xff] }
 0x135   :  { %1807 = vmatprep.subr.mxu0 %v1271_v63  ;;  %v1415_v63 = vld [vmem:[#allocation10 + $0x1490] sm:$0xff] }
 0x136   :  { %1808 = vmatpush2.msra.mxu0 %v1270_v17  ;;  %v1414_v17 = vld [vmem:[#allocation10 + $0x1488] sm:$0xff] }
 0x137   :  { %1809 = vmatprep.subr.mxu0 %v1262_v18  ;;  %v1406_v18 = vld [vmem:[#allocation10 + $0x1448] sm:$0xff] }
 0x138   :  { %1810 = vmatpush2.msra.mxu0 %v1261_v19  ;;  %v1405_v19 = vld [vmem:[#allocation10 + $0x1440] sm:$0xff] }
 0x139   :  { %1811 = vmatprep.subr.mxu0 %v1253_v20  ;;  %v1397_v20 = vld [vmem:[#allocation10 + $0x1400] sm:$0xff] }
 0x13a   :  { %1812 = vmatpush2.msra.mxu0 %v1252_v21  ;;  %v1396_v21 = vld [vmem:[#allocation10 + $0x13f8] sm:$0xff] }
 0x13b   :  { %1813 = vmatprep.subr.mxu0 %v1244_v22  ;;  %v1388_v22 = vld [vmem:[#allocation10 + $0x13b8] sm:$0xff] }
 0x13c   :  { %1814 = vmatpush2.msra.mxu0 %v1243_v23  ;;  %v1387_v23 = vld [vmem:[#allocation10 + $0x13b0] sm:$0xff] }
 0x13d   :  { %1815 = vmatprep.subr.mxu0 %v1235_v24  ;;  %v1379_v24 = vld [vmem:[#allocation10 + $0x1370] sm:$0xff] }
 0x13e   :  { %1816 = vmatpush2.msra.mxu0 %v1234_v25  ;;  %v1378_v25 = vld [vmem:[#allocation10 + $0x1368] sm:$0xff] }
 0x13f   :  { %1817 = vmatprep.subr.mxu0 %v1226_v26  ;;  %v1370_v26 = vld [vmem:[#allocation10 + $0x1328] sm:$0xff] }
 0x140   :  { %1818 = vmatpush2.msra.mxu0 %v1225_v27  ;;  %v1369_v27 = vld [vmem:[#allocation10 + $0x1320] sm:$0xff] }
 0x141   :  { %1819 = vmatprep.subr.mxu0 %v1217_v28  ;;  %v1361_v28 = vld [vmem:[#allocation10 + $0x12e0] sm:$0xff] }
 0x142   :  { %1820 = vmatpush2.msra.mxu0 %v1216_v29  ;;  %v433_v29 = vsub.s32 6, %v5501_v38 }
 0x143   :  { %1821 = vmatprep.subr.mxu0 %v1208_v30  ;;  %v1360_v30 = vld [vmem:[#allocation10 + $0x12d8] sm:$0xff] }
 0x144   :  { %1822 = vmatpush2.msra.mxu0 %v1207_v31  ;;  %v1352_v31 = vld [vmem:[#allocation10 + $0x1298] sm:$0xff] }
 0x145   :  { %1823 = vmatprep.subr.mxu0 %v1199_v32 }
 0x146   :  { %1824 = vmatpush2.msra.mxu0 %v1198_v33  ;;  %v1351_v33 = vld [vmem:[#allocation10 + $0x1290] sm:$0xff] }
 0x147   :  { %1825 = vmatprep.subr.mxu0 %v1190_v34  ;;  %v434_v34 = vrot.slane %v5505_v41, %v433_v29 }
 0x148   :  { %1826 = vmatpush2.msra.mxu0 %v1189_v35  ;;  %v1343_v35 = vld [vmem:[#allocation10 + $0x1250] sm:$0xff] }
 0x149   :  { %1933 = vmatprep.subr.mxu0 %v1631_v36 }
 0x188   :  { %v519_v46 = vpop.f32.mrf.mxu0  ;;  %v590_v47 = vpop.f32.mrf.mxu1 }
 0x189   :  { %v520_v50 = vadd.f32 %v519_v46, %v410_v44  ;;  %v591_v51 = vadd.f32 %v590_v47, %v418_v45  ;;  %v1334_v45 = vld [vmem:[#allocation10 + $0x1208] sm:$0xff]  ;;  %v1333_v46 = vld [vmem:[#allocation10 + $0x1200] sm:$0xff] }
 0x18a   :  { %v521_v52 = vpop.f32.mrf.mxu0  ;;  %v592_v53 = vpop.f32.mrf.mxu1 }
 0x18b   :  { %v522_v54 = vadd.f32 %v521_v52, %v414_v48  ;;  %v593_v55 = vadd.f32 %v592_v53, %v422_v49  ;;  %vm736_vm0 = vcmp.ge.f32.partialorder %v520_v50, 0.0  ;;  %v743_v57 = vmul.f32 0.01, %v520_v50  ;;  %v1613_v48 = vld [vmem:[#allocation10 + $0x1ac0] sm:$0xff]  ;;  %v1612_v49 = vld [vmem:[#allocation10 + $0x1ab8] sm:$0xff]  ;;  %v894_v52 = vld [vmem:[#allocation10 + $0x448] sm:$0xff] }
 0x18c   :  { %vm738_vm1 = vcmp.ge.f32.partialorder %v591_v51, 0.0  ;;  %v745_v58 = vmul.f32 0.01, %v591_v51  ;;  %v1603_v53 = vld [vmem:[#allocation10 + $0x1a70] sm:$0xff] }
 0x18d   :  { %vm737_vm2 = vcmp.ge.f32.partialorder %v522_v54, 0.0  ;;  %v744_v59 = vmul.f32 0.01, %v522_v54  ;;  %vm739_vm3 = vcmp.ge.f32.partialorder %v593_v55, 0.0  ;;  %v746_v60 = vmul.f32 0.01, %v593_v55 }
 0x18e   :  { %v5525_v2 = vsel %vm736_vm0, %v520_v50, %v743_v57  ;;  %v5527_v3 = vsel %vm738_vm1, %v591_v51, %v745_v58  ;;  %v1604_v51 = vld [vmem:[#allocation10 + $0x1a78] sm:$0xff]  ;;  %v1595_v57 = vld [vmem:[#allocation10 + $0x1a30] sm:$0xff]  ;;  %v885_v58 = vld [vmem:[#allocation10 + $0x400] sm:$0xff] }
 0x18f   :  { %v5521_v61 = vsel %vm737_vm2, %v522_v54, %v744_v59  ;;  %v5523_v62 = vsel %vm739_vm3, %v593_v55, %v746_v60  ;;  %v886_v55 = vld [vmem:[#allocation10 + $0x408] sm:$0xff]  ;;  %v877_v60 = vld [vmem:[#allocation10 + $0x3c0] sm:$0xff]  ;;  %vm3715_vm3 = vcmask 1041408  }
 0x190   :  { %1756 = vmatprep.mubr.f32.mxu1 %v5521_v61  ;;  %1827 = vmatprep.mubr.f32.mxu0 %v5523_v62  ;;  %v1594_v59 = vld [vmem:[#allocation10 + $0x1a28] sm:$0xff] }
 0x191   :  { %1757 = vmatmul.mubr.f32.vlgmr.msra.gmra.mxu1 %v5525_v2  ;;  %1828 = vmatmul.mubr.f32.vlgmr.msra.gmra.mxu0 %v5527_v3 }
 0x192   :  { %1835 = vmatpush1.msra.mxu1 %v1468_v0  ;;  %1934 = vmatpush1.msra.mxu0 %v1630_v1  ;;  %v1586_v0 = vld [vmem:[#allocation10 + $0x19e8] sm:$0xff]  ;;  %v876_v1 = vld [vmem:[#allocation10 + $0x3b8] sm:$0xff] }
 0x193   :  { %1836 = vmatprep.subr.mxu1 %v1460_v4  ;;  %1935 = vmatprep.subr.mxu0 %v1622_v5  ;;  %v1585_v4 = vld [vmem:[#allocation10 + $0x19e0] sm:$0xff]  ;;  %v868_v5 = vld [vmem:[#allocation10 + $0x378] sm:$0xff] }
 0x194   :  { %1837 = vmatpush1.msra.mxu1 %v1459_v6  ;;  %1936 = vmatpush1.msra.mxu0 %v1621_v7  ;;  %v1577_v6 = vld [vmem:[#allocation10 + $0x19a0] sm:$0xff]  ;;  %v867_v7 = vld [vmem:[#allocation10 + $0x370] sm:$0xff] }
 0x195   :  { %1838 = vmatprep.subr.mxu1 %v1451_v8  ;;  %1969 = vmatprep.mubr.f32.mxu0 %v4699_v13  ;;  %v1576_v8 = vld [vmem:[#allocation10 + $0x1998] sm:$0xff] }
 0x196   :  { %1839 = vmatpush1.msra.mxu1 %v1450_v9  ;;  %1976 = vmatprep.subr.mxu0 %v895_v10  ;;  %v859_v9 = vld [vmem:[#allocation10 + $0x330] sm:$0xff]  ;;  %v1568_v10 = vld [vmem:[#allocation10 + $0x1958] sm:$0xff] }
 0x197   :  { %1840 = vmatprep.subr.mxu1 %v1442_v11  ;;  %v858_v11 = vld [vmem:[#allocation10 + $0x328] sm:$0xff] }
 0x198   :  { %1841 = vmatpush1.msra.mxu1 %v1441_v12  ;;  %v1567_v12 = vld [vmem:[#allocation10 + $0x1950] sm:$0xff] }
 0x199   :  { %1842 = vmatprep.subr.mxu1 %v1433_v14  ;;  %v850_v14 = vld [vmem:[#allocation10 + $0x2e8] sm:$0xff] }
 0x19a   :  { %1843 = vmatpush1.msra.mxu1 %v1432_v15  ;;  %v1559_v15 = vld [vmem:[#allocation10 + $0x1910] sm:$0xff] }
 0x19b   :  { %1844 = vmatprep.subr.mxu1 %v1424_v16  ;;  %v849_v16 = vld [vmem:[#allocation10 + $0x2e0] sm:$0xff] }
 0x19c   :  { %1845 = vmatpush1.msra.mxu1 %v1423_v56  ;;  %v1558_v56 = vld [vmem:[#allocation10 + $0x1908] sm:$0xff] }
 0x19d   :  { %1846 = vmatprep.subr.mxu1 %v1415_v63  ;;  %v841_v63 = vld [vmem:[#allocation10 + $0x2a0] sm:$0xff] }
 0x19e   :  { %1847 = vmatpush1.msra.mxu1 %v1414_v17  ;;  %v1550_v17 = vld [vmem:[#allocation10 + $0x18c8] sm:$0xff] }
 0x19f   :  { %1848 = vmatprep.subr.mxu1 %v1406_v18  ;;  %v840_v18 = vld [vmem:[#allocation10 + $0x298] sm:$0xff] }
 0x1a0   :  { %1849 = vmatpush1.msra.mxu1 %v1405_v19  ;;  %v1549_v19 = vld [vmem:[#allocation10 + $0x18c0] sm:$0xff] }
 0x1a1   :  { %1850 = vmatprep.subr.mxu1 %v1397_v20  ;;  %v832_v20 = vld [vmem:[#allocation10 + $0x258] sm:$0xff] }
 0x1a2   :  { %1851 = vmatpush1.msra.mxu1 %v1396_v21  ;;  %v1541_v21 = vld [vmem:[#allocation10 + $0x1880] sm:$0xff] }
 0x1a3   :  { %1852 = vmatprep.subr.mxu1 %v1388_v22  ;;  %v831_v22 = vld [vmem:[#allocation10 + $0x250] sm:$0xff] }
 0x1a4   :  { %1853 = vmatpush1.msra.mxu1 %v1387_v23  ;;  %v1540_v23 = vld [vmem:[#allocation10 + $0x1878] sm:$0xff] }
 0x1a5   :  { %1854 = vmatprep.subr.mxu1 %v1379_v24  ;;  %v823_v24 = vld [vmem:[#allocation10 + $0x210] sm:$0xff] }
 0x1a6   :  { %1855 = vmatpush1.msra.mxu1 %v1378_v25  ;;  %v1532_v25 = vld [vmem:[#allocation10 + $0x1838] sm:$0xff] }
 0x1a7   :  { %1856 = vmatprep.subr.mxu1 %v1370_v26  ;;  %v822_v26 = vld [vmem:[#allocation10 + $0x208] sm:$0xff] }
 0x1a8   :  { %1857 = vmatpush1.msra.mxu1 %v1369_v27  ;;  %v1531_v27 = vld [vmem:[#allocation10 + $0x1830] sm:$0xff] }
 0x1a9   :  { %1858 = vmatprep.subr.mxu1 %v1361_v28  ;;  %v814_v28 = vld [vmem:[#allocation10 + $0x1c8] sm:$0xff] }
 0x1aa   :  { %v4048_v32 = vpop.f32.mrf.mxu1  ;;  %1859 = vmatpush1.msra.mxu1 %v1360_v30  ;;  %v425_v30 = vsub.s32 4, %v5501_v38 }
 0x1ab   :  { %1860 = vmatprep.subr.mxu1 %v1352_v31  ;;  %v1523_v31 = vld [vmem:[#allocation10 + $0x17f0] sm:$0xff] }
 0x1ac   :  { %v4049_v36 = vpop.f32.mrf.mxu1  ;;  %1861 = vmatpush1.msra.mxu1 %v1351_v33  ;;  %v429_v33 = vsub.s32 5, %v5501_v38 }
 0x1ad   :  { %v4050_v44 = vadd.f32 %v4049_v36, %v4048_v32  ;;  %1862 = vmatprep.subr.mxu1 %v1343_v35  ;;  %v813_v32 = vld [vmem:[#allocation10 + $0x1c0] sm:$0xff]  ;;  %v1514_v36 = vld [vmem:[#allocation10 + $0x17a8] sm:$0xff] }
 0x1ae   :  { %1863 = vmatpush1.msra.mxu1 %v1342_v37  ;;  %v805_v35 = vld [vmem:[#allocation10 + $0x180] sm:$0xff]  ;;  %v804_v37 = vld [vmem:[#allocation10 + $0x178] sm:$0xff] }
 0x1af   :  { %v733_v47 = vadd.f32 %v4050_v44, %v434_v34  ;;  %1864 = vmatprep.subr.mxu1 %v1334_v45  ;;  %v1522_v34 = vld [vmem:[#allocation10 + $0x17e8] sm:$0xff]  ;;  %v1513_v44 = vld [vmem:[#allocation10 + $0x17a0] sm:$0xff]  ;;  %v796_v45 = vld [vmem:[#allocation10 + $0x138] sm:$0xff] }
 0x1b0   :  { %1865 = vmatpush1.msra.mxu1 %v1333_v46  ;;  %v426_v46 = vrot.slane %v5505_v41, %v425_v30 }
 0x1b1   :  { %vm742_vm4 = vcmp.ge.f32.partialorder %v733_v47, 0.0  ;;  %v749_v50 = vmul.f32 0.01, %v733_v47  ;;  %1866 = vmatprep.subr.mxu1 %v1613_v48  ;;  %v795_v48 = vld [vmem:[#allocation10 + $0x130] sm:$0xff] }
 0x1b2   :  { %1867 = vmatpush2.msra.mxu1 %v1612_v49  ;;  %v430_v49 = vrot.slane %v5505_v41, %v429_v33  ;;  %v777_v41 = vld [vmem:[#allocation10 + $0xa0] sm:$0xff] }
 0x1b3   :  { %v5538_v54 = vsel %vm742_vm4, %v733_v47, %v749_v50  ;;  %1868 = vmatprep.subr.mxu1 %v1604_v51  ;;  %v1505_v47 = vld [vmem:[#allocation10 + $0x1760] sm:$0xff]  ;;  %v1504_v51 = vld [vmem:[#allocation10 + $0x1758] sm:$0xff]  ;;  %vm3711_vm4 = vcmask 15360  }
 0x1b4   :  { %4002 = vmatmul.mubr.msk.f32.vlgmr.msra.gmra.mxu0 %vm1688_vm5, %v5538_v54  ;;  %1869 = vmatpush2.msra.mxu1 %v1603_v53  ;;  %v1496_v53 = vld [vmem:[#allocation10 + $0x1718] sm:$0xff] }
 0x1b5   :  { %1977 = vmatpush1.msra.mxu0 %v894_v52  ;;  %2040 = vmatprep.mubr.f32.mxu0 %v5521_v61  ;;  %v787_v52 = vld [vmem:[#allocation10 + $0xf0] sm:$0xff] }
 0x1b6   :  { %1978 = vmatprep.subr.mxu0 %v886_v55  ;;  %1870 = vmatprep.subr.mxu1 %v1595_v57  ;;  %v786_v55 = vld [vmem:[#allocation10 + $0xe8] sm:$0xff] }
 0x1b7   :  { %1979 = vmatpush1.msra.mxu0 %v885_v58  ;;  %1871 = vmatpush2.msra.mxu1 %v1594_v59  ;;  %v1495_v59 = vld [vmem:[#allocation10 + $0x1710] sm:$0xff] }
 0x1b8   :  { %1980 = vmatprep.subr.mxu0 %v877_v60  ;;  %1872 = vmatprep.subr.mxu1 %v1586_v0  ;;  %v778_v60 = vld [vmem:[#allocation10 + $0xa8] sm:$0xff] }
 0x1b9   :  { %1981 = vmatpush1.msra.mxu0 %v876_v1  ;;  %1873 = vmatpush2.msra.mxu1 %v1585_v4  ;;  %v1487_v1 = vld [vmem:[#allocation10 + $0x16d0] sm:$0xff]  ;;  %v1486_v4 = vld [vmem:[#allocation10 + $0x16c8] sm:$0xff] }
 0x1ba   :  { %1982 = vmatprep.subr.mxu0 %v868_v5  ;;  %1874 = vmatprep.subr.mxu1 %v1577_v6  ;;  %v769_v5 = vld [vmem:[#allocation10 + $0x60] sm:$0xff] }
 0x1bb   :  { %1983 = vmatpush1.msra.mxu0 %v867_v7  ;;  %1875 = vmatpush2.msra.mxu1 %v1576_v8  ;;  %v1478_v7 = vld [vmem:[#allocation10 + $0x1688] sm:$0xff]  ;;  %v768_v8 = vld [vmem:[#allocation10 + $0x58] sm:$0xff] }
 0x1bc   :  { %1984 = vmatprep.subr.mxu0 %v859_v9  ;;  %1876 = vmatprep.subr.mxu1 %v1568_v10  ;;  %v1477_v10 = vld [vmem:[#allocation10 + $0x1680] sm:$0xff] }
 0x1bd   :  { %1985 = vmatpush1.msra.mxu0 %v858_v11  ;;  %1877 = vmatpush2.msra.mxu1 %v1567_v12  ;;  %v760_v11 = vld [vmem:[#allocation10 + $0x18] sm:$0xff] }
 0x1be   :  { %1986 = vmatprep.subr.mxu0 %v850_v14  ;;  %1878 = vmatprep.subr.mxu1 %v1559_v15  ;;  %v759_v14 = vld [vmem:[#allocation10 + $0x10] sm:$0xff] }
 0x1bf   :  { %1987 = vmatpush1.msra.mxu0 %v849_v16  ;;  %1879 = vmatpush2.msra.mxu1 %v1558_v56  ;;  %v1183_v15 = vld [vmem:[#allocation10 + $0xd50] sm:$0xff]  ;;  %v1182_v56 = vld [vmem:[#allocation10 + $0xd48] sm:$0xff] }
 0x1c0   :  { %1988 = vmatprep.subr.mxu0 %v841_v63  ;;  %1880 = vmatprep.subr.mxu1 %v1550_v17  ;;  %v1039_v16 = vld [vmem:[#allocation10 + $0x8d0] sm:$0xff]  ;;  %v1038_v17 = vld [vmem:[#allocation10 + $0x8c8] sm:$0xff] }
 0x1c1   :  { %1989 = vmatpush1.msra.mxu0 %v840_v18  ;;  %1881 = vmatpush2.msra.mxu1 %v1549_v19  ;;  %v1174_v18 = vld [vmem:[#allocation10 + $0xd08] sm:$0xff] }
 0x1c2   :  { %1990 = vmatprep.subr.mxu0 %v832_v20  ;;  %1882 = vmatprep.subr.mxu1 %v1541_v21  ;;  %v1030_v19 = vld [vmem:[#allocation10 + $0x888] sm:$0xff]  ;;  %v1173_v20 = vld [vmem:[#allocation10 + $0xd00] sm:$0xff] }
 0x1c3   :  { %1991 = vmatpush1.msra.mxu0 %v831_v22  ;;  %1883 = vmatpush2.msra.mxu1 %v1540_v23  ;;  %v1029_v21 = vld [vmem:[#allocation10 + $0x880] sm:$0xff] }
 0x1c4   :  { %1992 = vmatprep.subr.mxu0 %v823_v24  ;;  %1884 = vmatprep.subr.mxu1 %v1532_v25  ;;  %v1165_v22 = vld [vmem:[#allocation10 + $0xcc0] sm:$0xff]  ;;  %v1164_v24 = vld [vmem:[#allocation10 + $0xcb8] sm:$0xff] }
 0x1c5   :  { %1993 = vmatpush1.msra.mxu0 %v822_v26  ;;  %1885 = vmatpush2.msra.mxu1 %v1531_v27  ;;  %v1021_v23 = vld [vmem:[#allocation10 + $0x840] sm:$0xff]  ;;  %v1020_v25 = vld [vmem:[#allocation10 + $0x838] sm:$0xff] }
 0x1c6   :  { %1994 = vmatprep.subr.mxu0 %v814_v28  ;;  %1886 = vmatprep.subr.mxu1 %v1523_v31  ;;  %v1156_v26 = vld [vmem:[#allocation10 + $0xc78] sm:$0xff]  ;;  %v1155_v28 = vld [vmem:[#allocation10 + $0xc70] sm:$0xff] }
 0x1c7   :  { %1995 = vmatpush1.msra.mxu0 %v813_v32  ;;  %1887 = vmatpush2.msra.mxu1 %v1522_v34  ;;  %v1012_v27 = vld [vmem:[#allocation10 + $0x7f8] sm:$0xff]  ;;  %v1011_v31 = vld [vmem:[#allocation10 + $0x7f0] sm:$0xff] }
 0x1c8   :  { %1996 = vmatprep.subr.mxu0 %v805_v35  ;;  %1888 = vmatprep.subr.mxu1 %v1514_v36  ;;  %v1147_v32 = vld [vmem:[#allocation10 + $0xc30] sm:$0xff]  ;;  %v1146_v35 = vld [vmem:[#allocation10 + $0xc28] sm:$0xff] }
 0x1c9   :  { %1997 = vmatpush1.msra.mxu0 %v804_v37  ;;  %v661_v50 = vpop.f32.mrf.mxu0  ;;  %1889 = vmatpush2.msra.mxu1 %v1513_v44  ;;  %v1003_v34 = vld [vmem:[#allocation10 + $0x7b0] sm:$0xff]  ;;  %v1002_v36 = vld [vmem:[#allocation10 + $0x7a8] sm:$0xff] }
 0x1ca   :  { %1998 = vmatprep.subr.mxu0 %v796_v45  ;;  %v662_v57 = vadd.f32 %v661_v50, %v426_v46  ;;  %1890 = vmatprep.subr.mxu1 %v1505_v47  ;;  %v1138_v37 = vld [vmem:[#allocation10 + $0xbe8] sm:$0xff]  ;;  %v1137_v45 = vld [vmem:[#allocation10 + $0xbe0] sm:$0xff]  ;;  %v984_v50 = vld [vmem:[#allocation10 + $0x718] sm:$0xff] }
 0x1cb   :  { %1999 = vmatpush1.msra.mxu0 %v795_v48  ;;  %v663_v58 = vpop.f32.mrf.mxu0  ;;  %1891 = vmatpush2.msra.mxu1 %v1504_v51  ;;  %v994_v44 = vld [vmem:[#allocation10 + $0x768] sm:$0xff]  ;;  %v993_v46 = vld [vmem:[#allocation10 + $0x760] sm:$0xff]  ;;  %v1120_v51 = vld [vmem:[#allocation10 + $0xb58] sm:$0xff] }
 0x1cc   :  { %2000 = vmatprep.subr.mxu0 %v787_v52  ;;  %v664_v0 = vadd.f32 %v663_v58, %v430_v49  ;;  %1892 = vmatprep.subr.mxu1 %v1496_v53  ;;  %v747_v9 = vmul.f32 0.01, %v662_v57  ;;  %vm740_vm7 = vcmp.ge.f32.partialorder %v662_v57, 0.0  ;;  %v1129_v47 = vld [vmem:[#allocation10 + $0xba0] sm:$0xff]  ;;  %v1128_v49 = vld [vmem:[#allocation10 + $0xb98] sm:$0xff]  ;;  %v1119_v53 = vld [vmem:[#allocation10 + $0xb50] sm:$0xff] }
 0x1cd   :  { %2001 = vmatpush1.msra.mxu0 %v786_v55  ;;  %1893 = vmatpush2.msra.mxu1 %v1495_v59  ;;  %v985_v48 = vld [vmem:[#allocation10 + $0x720] sm:$0xff]  ;;  %v976_v52 = vld [vmem:[#allocation10 + $0x6d8] sm:$0xff]  ;;  %v975_v55 = vld [vmem:[#allocation10 + $0x6d0] sm:$0xff] }
 0x1ce   :  { %vm741_vm6 = vcmp.ge.f32.partialorder %v664_v0, 0.0  ;;  %v748_v6 = vmul.f32 0.01, %v664_v0  ;;  %2002 = vmatprep.subr.mxu0 %v778_v60  ;;  %1894 = vmatprep.subr.mxu1 %v1487_v1  ;;  %v5553_v63 = vsel %vm740_vm7, %v662_v57, %v747_v9  ;;  %v1111_v57 = vld [vmem:[#allocation10 + $0xb10] sm:$0xff]  ;;  %v1110_v59 = vld [vmem:[#allocation10 + $0xb08] sm:$0xff]  ;;  %v1084_v9 = vld [vmem:[#allocation10 + $0xa38] sm:$0xff] }
 0x1cf   :  { %2003 = vmatpush1.msra.mxu0 %v777_v41  ;;  %1895 = vmatpush2.msra.mxu1 %v1486_v4  ;;  %v967_v58 = vld [vmem:[#allocation10 + $0x690] sm:$0xff]  ;;  %v966_v60 = vld [vmem:[#allocation10 + $0x688] sm:$0xff]  ;;  %v1101_v41 = vld [vmem:[#allocation10 + $0xac0] sm:$0xff]  ;;  %vm3816_vm7 = vcmask 523264  }
 0x1d0   :  { %v5551_v12 = vsel %vm741_vm6, %v664_v0, %v748_v6  ;;  %2004 = vmatprep.subr.mxu0 %v769_v5  ;;  %1896 = vmatprep.subr.mxu1 %v1478_v7  ;;  %v1102_v0 = vld [vmem:[#allocation10 + $0xac8] sm:$0xff]  ;;  %v957_v4 = vld [vmem:[#allocation10 + $0x640] sm:$0xff]  ;;  %v1092_v7 = vld [vmem:[#allocation10 + $0xa78] sm:$0xff] }
 0x1d1   :  { %2005 = vmatpush1.msra.mxu0 %v768_v8  ;;  %1897 = vmatpush2.msra.mxu1 %v1477_v10  ;;  %v958_v1 = vld [vmem:[#allocation10 + $0x648] sm:$0xff]  ;;  %v1093_v5 = vld [vmem:[#allocation10 + $0xa80] sm:$0xff]  ;;  %v948_v8 = vld [vmem:[#allocation10 + $0x5f8] sm:$0xff] }
 0x1d2   :  { %2006 = vmatprep.subr.mxu0 %v760_v11  ;;  %1898 = vmatprep.mubr.f32.mxu1 %v5551_v12  ;;  %v949_v6 = vld [vmem:[#allocation10 + $0x600] sm:$0xff]  ;;  %v940_v10 = vld [vmem:[#allocation10 + $0x5b8] sm:$0xff]  ;;  %v1083_v11 = vld [vmem:[#allocation10 + $0xa30] sm:$0xff] }
 0x1d3   :  { %2007 = vmatpush1.msra.mxu0 %v759_v14  ;;  %2047 = vmatprep.subr.mxu1 %v1183_v15  ;;  %v939_v14 = vld [vmem:[#allocation10 + $0x5b0] sm:$0xff] }
 0x1d4   :  { %1899 = vmatmul.mubr.f32.vlgmr.msra.gmra.mxu1 %v5553_v63  ;;  %2008 = vmatprep.subr.mxu0 %v1039_v16  ;;  %v1075_v15 = vld [vmem:[#allocation10 + $0x9f0] sm:$0xff] }
 0x1d5   :  { %2048 = vmatpush1.msra.mxu1 %v1182_v56  ;;  %2009 = vmatpush2.msra.mxu0 %v1038_v17  ;;  %v931_v16 = vld [vmem:[#allocation10 + $0x570] sm:$0xff]  ;;  %v1074_v56 = vld [vmem:[#allocation10 + $0x9e8] sm:$0xff] }
 0x1d6   :  { %2049 = vmatprep.subr.mxu1 %v1174_v18  ;;  %2111 = vmatprep.mubr.f32.mxu1 %v5523_v62  ;;  %v930_v17 = vld [vmem:[#allocation10 + $0x568] sm:$0xff] }
 0x1d7   :  { %2010 = vmatprep.subr.mxu0 %v1030_v19  ;;  %2050 = vmatpush1.msra.mxu1 %v1173_v20  ;;  %v1066_v18 = vld [vmem:[#allocation10 + $0x9a8] sm:$0xff]  ;;  %v1065_v20 = vld [vmem:[#allocation10 + $0x9a0] sm:$0xff] }
 0x1d8   :  { %2011 = vmatpush2.msra.mxu0 %v1029_v21  ;;  %2051 = vmatprep.subr.mxu1 %v1165_v22  ;;  %v922_v19 = vld [vmem:[#allocation10 + $0x528] sm:$0xff]  ;;  %v921_v21 = vld [vmem:[#allocation10 + $0x520] sm:$0xff] }
 0x1d9   :  { %2012 = vmatprep.subr.mxu0 %v1021_v23  ;;  %2052 = vmatpush1.msra.mxu1 %v1164_v24  ;;  %v1057_v22 = vld [vmem:[#allocation10 + $0x960] sm:$0xff]  ;;  %v1056_v24 = vld [vmem:[#allocation10 + $0x958] sm:$0xff] }
 0x1da   :  { %2013 = vmatpush2.msra.mxu0 %v1020_v25  ;;  %2053 = vmatprep.subr.mxu1 %v1156_v26  ;;  %v913_v23 = vld [vmem:[#allocation10 + $0x4e0] sm:$0xff]  ;;  %v912_v25 = vld [vmem:[#allocation10 + $0x4d8] sm:$0xff] }
 0x1db   :  { %2014 = vmatprep.subr.mxu0 %v1012_v27  ;;  %2054 = vmatpush1.msra.mxu1 %v1155_v28  ;;  %v1048_v26 = vld [vmem:[#allocation10 + $0x918] sm:$0xff]  ;;  %v1047_v28 = vld [vmem:[#allocation10 + $0x910] sm:$0xff] }
 0x1dc   :  { %2015 = vmatpush2.msra.mxu0 %v1011_v31  ;;  %2055 = vmatprep.subr.mxu1 %v1147_v32  ;;  %v904_v27 = vld [vmem:[#allocation10 + $0x498] sm:$0xff]  ;;  %v903_v31 = vld [vmem:[#allocation10 + $0x490] sm:$0xff] }
 0x1dd   :  { %2016 = vmatprep.subr.mxu0 %v1003_v34  ;;  %2056 = vmatpush1.msra.mxu1 %v1146_v35  ;;  %v1327_v32 = vld [vmem:[#allocation10 + $0x11d0] sm:$0xff]  ;;  %v1326_v34 = vld [vmem:[#allocation10 + $0x11c8] sm:$0xff] }
 0x1de   :  { %2017 = vmatpush2.msra.mxu0 %v1002_v36  ;;  %2057 = vmatprep.subr.mxu1 %v1138_v37  ;;  %v1471_v35 = vld [vmem:[#allocation10 + $0x1650] sm:$0xff]  ;;  %v1318_v36 = vld [vmem:[#allocation10 + $0x1188] sm:$0xff] }
 0x1df   :  { %2018 = vmatprep.subr.mxu0 %v994_v44  ;;  %2058 = vmatpush1.msra.mxu1 %v1137_v45  ;;  %v1470_v37 = vld [vmem:[#allocation10 + $0x1648] sm:$0xff]  ;;  %v1317_v44 = vld [vmem:[#allocation10 + $0x1180] sm:$0xff] }
 0x1e0   :  { %2019 = vmatpush2.msra.mxu0 %v993_v46  ;;  %2059 = vmatprep.subr.mxu1 %v1129_v47  ;;  %v1462_v45 = vld [vmem:[#allocation10 + $0x1608] sm:$0xff]  ;;  %v1309_v46 = vld [vmem:[#allocation10 + $0x1140] sm:$0xff] }
 0x1e1   :  { %2020 = vmatprep.subr.mxu0 %v985_v48  ;;  %2060 = vmatpush1.msra.mxu1 %v1128_v49  ;;  %v1461_v47 = vld [vmem:[#allocation10 + $0x1600] sm:$0xff]  ;;  %v1308_v48 = vld [vmem:[#allocation10 + $0x1138] sm:$0xff] }
 0x1e2   :  { %2021 = vmatpush2.msra.mxu0 %v984_v50  ;;  %2061 = vmatprep.subr.mxu1 %v1120_v51  ;;  %v1453_v49 = vld [vmem:[#allocation10 + $0x15c0] sm:$0xff]  ;;  %v1300_v50 = vld [vmem:[#allocation10 + $0x10f8] sm:$0xff] }
 0x1e3   :  { %2022 = vmatprep.subr.mxu0 %v976_v52  ;;  %2062 = vmatpush1.msra.mxu1 %v1119_v53  ;;  %v1452_v51 = vld [vmem:[#allocation10 + $0x15b8] sm:$0xff]  ;;  %v1299_v52 = vld [vmem:[#allocation10 + $0x10f0] sm:$0xff] }
 0x1e4   :  { %2023 = vmatpush2.msra.mxu0 %v975_v55  ;;  %2063 = vmatprep.subr.mxu1 %v1111_v57  ;;  %v1444_v53 = vld [vmem:[#allocation10 + $0x1578] sm:$0xff]  ;;  %v1291_v55 = vld [vmem:[#allocation10 + $0x10b0] sm:$0xff] }
 0x1e5   :  { %2024 = vmatprep.subr.mxu0 %v967_v58  ;;  %2064 = vmatpush1.msra.mxu1 %v1110_v59  ;;  %v1443_v57 = vld [vmem:[#allocation10 + $0x1570] sm:$0xff]  ;;  %v1290_v58 = vld [vmem:[#allocation10 + $0x10a8] sm:$0xff] }
 0x1e6   :  { %2025 = vmatpush2.msra.mxu0 %v966_v60  ;;  %2065 = vmatprep.subr.mxu1 %v1102_v0  ;;  %v1435_v59 = vld [vmem:[#allocation10 + $0x1530] sm:$0xff]  ;;  %v1282_v60 = vld [vmem:[#allocation10 + $0x1068] sm:$0xff] }
 0x1e7   :  { %2026 = vmatprep.subr.mxu0 %v958_v1  ;;  %2066 = vmatpush1.msra.mxu1 %v1101_v41  ;;  %v1434_v0 = vld [vmem:[#allocation10 + $0x1528] sm:$0xff]  ;;  %v1281_v1 = vld [vmem:[#allocation10 + $0x1060] sm:$0xff] }
 0x1e8   :  { %2027 = vmatpush2.msra.mxu0 %v957_v4  ;;  %2067 = vmatprep.subr.mxu1 %v1093_v5  ;;  %v1426_v41 = vld [vmem:[#allocation10 + $0x14e8] sm:$0xff]  ;;  %v1273_v4 = vld [vmem:[#allocation10 + $0x1020] sm:$0xff] }
 0x1e9   :  { %2028 = vmatprep.subr.mxu0 %v949_v6  ;;  %2068 = vmatpush1.msra.mxu1 %v1092_v7  ;;  %v1425_v5 = vld [vmem:[#allocation10 + $0x14e0] sm:$0xff]  ;;  %v1272_v6 = vld [vmem:[#allocation10 + $0x1018] sm:$0xff] }
 0x1ea   :  { %2029 = vmatpush2.msra.mxu0 %v948_v8  ;;  %2069 = vmatprep.subr.mxu1 %v1084_v9  ;;  %v1417_v7 = vld [vmem:[#allocation10 + $0x14a0] sm:$0xff]  ;;  %v1264_v8 = vld [vmem:[#allocation10 + $0xfd8] sm:$0xff] }
 0x1eb   :  { %2030 = vmatprep.subr.mxu0 %v940_v10  ;;  %2070 = vmatpush1.msra.mxu1 %v1083_v11  ;;  %v1416_v9 = vld [vmem:[#allocation10 + $0x1498] sm:$0xff]  ;;  %v1263_v10 = vld [vmem:[#allocation10 + $0xfd0] sm:$0xff] }
 0x1ec   :  { %2031 = vmatpush2.msra.mxu0 %v939_v14  ;;  %2071 = vmatprep.subr.mxu1 %v1075_v15  ;;  %v1408_v11 = vld [vmem:[#allocation10 + $0x1458] sm:$0xff]  ;;  %v1255_v14 = vld [vmem:[#allocation10 + $0xf90] sm:$0xff] }
 0x1ed   :  { %2032 = vmatprep.subr.mxu0 %v931_v16  ;;  %2072 = vmatpush1.msra.mxu1 %v1074_v56  ;;  %v1407_v15 = vld [vmem:[#allocation10 + $0x1450] sm:$0xff]  ;;  %v1254_v16 = vld [vmem:[#allocation10 + $0xf88] sm:$0xff] }
 0x1ee   :  { %2033 = vmatpush2.msra.mxu0 %v930_v17  ;;  %2073 = vmatprep.subr.mxu1 %v1066_v18  ;;  %v1399_v56 = vld [vmem:[#allocation10 + $0x1410] sm:$0xff]  ;;  %v1246_v17 = vld [vmem:[#allocation10 + $0xf48] sm:$0xff] }
 0x1ef   :  { %2034 = vmatprep.subr.mxu0 %v922_v19  ;;  %2074 = vmatpush1.msra.mxu1 %v1065_v20  ;;  %v1398_v18 = vld [vmem:[#allocation10 + $0x1408] sm:$0xff]  ;;  %v1245_v19 = vld [vmem:[#allocation10 + $0xf40] sm:$0xff] }
 0x1f0   :  { %2035 = vmatpush2.msra.mxu0 %v921_v21  ;;  %2075 = vmatprep.subr.mxu1 %v1057_v22  ;;  %v1390_v20 = vld [vmem:[#allocation10 + $0x13c8] sm:$0xff]  ;;  %v1237_v21 = vld [vmem:[#allocation10 + $0xf00] sm:$0xff] }
 0x1f1   :  { %2036 = vmatprep.subr.mxu0 %v913_v23  ;;  %2076 = vmatpush1.msra.mxu1 %v1056_v24  ;;  %v1389_v22 = vld [vmem:[#allocation10 + $0x13c0] sm:$0xff]  ;;  %v1236_v23 = vld [vmem:[#allocation10 + $0xef8] sm:$0xff] }
 0x1f2   :  { %2037 = vmatpush2.msra.mxu0 %v912_v25  ;;  %2077 = vmatprep.subr.mxu1 %v1048_v26  ;;  %v1381_v24 = vld [vmem:[#allocation10 + $0x1380] sm:$0xff]  ;;  %v1228_v25 = vld [vmem:[#allocation10 + $0xeb8] sm:$0xff] }
 0x1f3   :  { %2038 = vmatprep.subr.mxu0 %v904_v27  ;;  %2078 = vmatpush1.msra.mxu1 %v1047_v28  ;;  %v1380_v26 = vld [vmem:[#allocation10 + $0x1378] sm:$0xff]  ;;  %v1227_v27 = vld [vmem:[#allocation10 + $0xeb0] sm:$0xff] }
 0x1f4   :  { %2039 = vmatpush2.msra.mxu0 %v903_v31  ;;  %2079 = vmatprep.subr.mxu1 %v1327_v32  ;;  %v1372_v28 = vld [vmem:[#allocation10 + $0x1338] sm:$0xff]  ;;  %v1219_v31 = vld [vmem:[#allocation10 + $0xe70] sm:$0xff] }
 0x1f5   :  { %2041 = vmatmul.mubr.f32.vlgmr.msra.gmra.mxu0 %v5525_v2  ;;  %2080 = vmatpush2.msra.mxu1 %v1326_v34  ;;  %v1371_v32 = vld [vmem:[#allocation10 + $0x1330] sm:$0xff]  ;;  %v1218_v34 = vld [vmem:[#allocation10 + $0xe68] sm:$0xff] }
 0x1f6   :  { %2118 = vmatprep.subr.mxu0 %v1471_v35  ;;  %2081 = vmatprep.subr.mxu1 %v1318_v36  ;;  %v1363_v35 = vld [vmem:[#allocation10 + $0x12f0] sm:$0xff]  ;;  %v1210_v36 = vld [vmem:[#allocation10 + $0xe28] sm:$0xff] }
 0x1f7   :  { %2119 = vmatpush1.msra.mxu0 %v1470_v37  ;;  %2182 = vmatprep.mubr.f32.mxu0 %v5551_v12  ;;  %v1362_v37 = vld [vmem:[#allocation10 + $0x12e8] sm:$0xff] }
 0x1f8   :  { %2082 = vmatpush2.msra.mxu1 %v1317_v44  ;;  %2120 = vmatprep.subr.mxu0 %v1462_v45  ;;  %v1209_v44 = vld [vmem:[#allocation10 + $0xe20] sm:$0xff]  ;;  %v1354_v45 = vld [vmem:[#allocation10 + $0x12a8] sm:$0xff] }
 0x1f9   :  { %2083 = vmatprep.subr.mxu1 %v1309_v46  ;;  %2121 = vmatpush1.msra.mxu0 %v1461_v47  ;;  %v1201_v46 = vld [vmem:[#allocation10 + $0xde0] sm:$0xff] }
 0x1fa   :  { %2084 = vmatpush2.msra.mxu1 %v1308_v48  ;;  %2122 = vmatprep.subr.mxu0 %v1453_v49  ;;  %v1353_v47 = vld [vmem:[#allocation10 + $0x12a0] sm:$0xff]  ;;  %v1200_v48 = vld [vmem:[#allocation10 + $0xdd8] sm:$0xff] }
 0x1fb   :  { %2085 = vmatprep.subr.mxu1 %v1300_v50  ;;  %2123 = vmatpush1.msra.mxu0 %v1452_v51  ;;  %v1345_v49 = vld [vmem:[#allocation10 + $0x1260] sm:$0xff]  ;;  %v1192_v50 = vld [vmem:[#allocation10 + $0xd98] sm:$0xff] }
 0x1fc   :  { %2086 = vmatpush2.msra.mxu1 %v1299_v52  ;;  %2124 = vmatprep.subr.mxu0 %v1444_v53  ;;  %v1344_v51 = vld [vmem:[#allocation10 + $0x1258] sm:$0xff]  ;;  %v1191_v52 = vld [vmem:[#allocation10 + $0xd90] sm:$0xff] }
 0x1fd   :  { %2087 = vmatprep.subr.mxu1 %v1291_v55  ;;  %2125 = vmatpush1.msra.mxu0 %v1443_v57  ;;  %v1336_v53 = vld [vmem:[#allocation10 + $0x1218] sm:$0xff]  ;;  %v1335_v55 = vld [vmem:[#allocation10 + $0x1210] sm:$0xff]  ;;  %v1633_v57 = vld [vmem:[#allocation10 + $0x1b60] sm:$0xff] }
 0x1fe   :  { %2088 = vmatpush2.msra.mxu1 %v1290_v58  ;;  %2126 = vmatprep.subr.mxu0 %v1435_v59  ;;  %v1615_v58 = vld [vmem:[#allocation10 + $0x1ad0] sm:$0xff]  ;;  %v1632_v59 = vld [vmem:[#allocation10 + $0x1b58] sm:$0xff] }
 0x1ff   :  { %2089 = vmatprep.subr.mxu1 %v1282_v60  ;;  %2127 = vmatpush1.msra.mxu0 %v1434_v0  ;;  %v1614_v60 = vld [vmem:[#allocation10 + $0x1ac8] sm:$0xff]  ;;  %v1624_v0 = vld [vmem:[#allocation10 + $0x1b18] sm:$0xff] }
 0x200   :  { %2090 = vmatpush2.msra.mxu1 %v1281_v1  ;;  %2128 = vmatprep.subr.mxu0 %v1426_v41  ;;  %v1606_v1 = vld [vmem:[#allocation10 + $0x1a88] sm:$0xff]  ;;  %v1623_v41 = vld [vmem:[#allocation10 + $0x1b10] sm:$0xff] }
 0x201   :  { %2091 = vmatprep.subr.mxu1 %v1273_v4  ;;  %2129 = vmatpush1.msra.mxu0 %v1425_v5  ;;  %v1605_v4 = vld [vmem:[#allocation10 + $0x1a80] sm:$0xff] }
 0x202   :  { %2092 = vmatpush2.msra.mxu1 %v1272_v6  ;;  %2130 = vmatprep.subr.mxu0 %v1417_v7  ;;  %v897_v5 = vld [vmem:[#allocation10 + $0x460] sm:$0xff]  ;;  %v896_v7 = vld [vmem:[#allocation10 + $0x458] sm:$0xff] }
 0x203   :  { %2093 = vmatprep.subr.mxu1 %v1264_v8  ;;  %2131 = vmatpush1.msra.mxu0 %v1416_v9  ;;  %v1597_v6 = vld [vmem:[#allocation10 + $0x1a40] sm:$0xff]  ;;  %v1596_v8 = vld [vmem:[#allocation10 + $0x1a38] sm:$0xff] }
 0x204   :  { %2094 = vmatpush2.msra.mxu1 %v1263_v10  ;;  %2132 = vmatprep.subr.mxu0 %v1408_v11  ;;  %v888_v9 = vld [vmem:[#allocation10 + $0x418] sm:$0xff]  ;;  %v887_v11 = vld [vmem:[#allocation10 + $0x410] sm:$0xff] }
 0x205   :  { %2095 = vmatprep.subr.mxu1 %v1255_v14  ;;  %2133 = vmatpush1.msra.mxu0 %v1407_v15  ;;  %v1588_v10 = vld [vmem:[#allocation10 + $0x19f8] sm:$0xff]  ;;  %v1587_v14 = vld [vmem:[#allocation10 + $0x19f0] sm:$0xff] }
 0x206   :  { %2096 = vmatpush2.msra.mxu1 %v1254_v16  ;;  %2134 = vmatprep.subr.mxu0 %v1399_v56  ;;  %v879_v15 = vld [vmem:[#allocation10 + $0x3d0] sm:$0xff]  ;;  %v878_v56 = vld [vmem:[#allocation10 + $0x3c8] sm:$0xff] }
 0x207   :  { %2097 = vmatprep.subr.mxu1 %v1246_v17  ;;  %2135 = vmatpush1.msra.mxu0 %v1398_v18  ;;  %v1579_v16 = vld [vmem:[#allocation10 + $0x19b0] sm:$0xff]  ;;  %v1578_v17 = vld [vmem:[#allocation10 + $0x19a8] sm:$0xff] }
 0x208   :  { %2098 = vmatpush2.msra.mxu1 %v1245_v19  ;;  %2136 = vmatprep.subr.mxu0 %v1390_v20  ;;  %v870_v18 = vld [vmem:[#allocation10 + $0x388] sm:$0xff]  ;;  %v869_v20 = vld [vmem:[#allocation10 + $0x380] sm:$0xff] }
 0x209   :  { %2099 = vmatprep.subr.mxu1 %v1237_v21  ;;  %2137 = vmatpush1.msra.mxu0 %v1389_v22  ;;  %v1570_v19 = vld [vmem:[#allocation10 + $0x1968] sm:$0xff]  ;;  %v1569_v21 = vld [vmem:[#allocation10 + $0x1960] sm:$0xff] }
 0x20a   :  { %2100 = vmatpush2.msra.mxu1 %v1236_v23  ;;  %2138 = vmatprep.subr.mxu0 %v1381_v24  ;;  %v861_v22 = vld [vmem:[#allocation10 + $0x340] sm:$0xff]  ;;  %v860_v24 = vld [vmem:[#allocation10 + $0x338] sm:$0xff] }
 0x20b   :  { %2101 = vmatprep.subr.mxu1 %v1228_v25  ;;  %2139 = vmatpush1.msra.mxu0 %v1380_v26  ;;  %v1561_v23 = vld [vmem:[#allocation10 + $0x1920] sm:$0xff]  ;;  %v1560_v25 = vld [vmem:[#allocation10 + $0x1918] sm:$0xff] }
 0x20c   :  { %2102 = vmatpush2.msra.mxu1 %v1227_v27  ;;  %2140 = vmatprep.subr.mxu0 %v1372_v28  ;;  %v852_v26 = vld [vmem:[#allocation10 + $0x2f8] sm:$0xff]  ;;  %v851_v28 = vld [vmem:[#allocation10 + $0x2f0] sm:$0xff] }
 0x20d   :  { %2103 = vmatprep.subr.mxu1 %v1219_v31  ;;  %2141 = vmatpush1.msra.mxu0 %v1371_v32  ;;  %v1552_v27 = vld [vmem:[#allocation10 + $0x18d8] sm:$0xff]  ;;  %v1551_v31 = vld [vmem:[#allocation10 + $0x18d0] sm:$0xff] }
 0x20e   :  { %2104 = vmatpush2.msra.mxu1 %v1218_v34  ;;  %2142 = vmatprep.subr.mxu0 %v1363_v35  ;;  %v843_v32 = vld [vmem:[#allocation10 + $0x2b0] sm:$0xff]  ;;  %v842_v35 = vld [vmem:[#allocation10 + $0x2a8] sm:$0xff] }
 0x20f   :  { %2105 = vmatprep.subr.mxu1 %v1210_v36  ;;  %2143 = vmatpush1.msra.mxu0 %v1362_v37  ;;  %v1543_v34 = vld [vmem:[#allocation10 + $0x1890] sm:$0xff]  ;;  %v1542_v36 = vld [vmem:[#allocation10 + $0x1888] sm:$0xff] }
 0x210   :  { %2106 = vmatpush2.msra.mxu1 %v1209_v44  ;;  %2144 = vmatprep.subr.mxu0 %v1354_v45  ;;  %v834_v37 = vld [vmem:[#allocation10 + $0x268] sm:$0xff]  ;;  %v833_v45 = vld [vmem:[#allocation10 + $0x260] sm:$0xff] }
 0x211   :  { %2107 = vmatprep.subr.mxu1 %v1201_v46  ;;  %2145 = vmatpush1.msra.mxu0 %v1353_v47  ;;  %v1534_v44 = vld [vmem:[#allocation10 + $0x1848] sm:$0xff]  ;;  %v1533_v46 = vld [vmem:[#allocation10 + $0x1840] sm:$0xff] }
 0x212   :  { %2108 = vmatpush2.msra.mxu1 %v1200_v48  ;;  %2146 = vmatprep.subr.mxu0 %v1345_v49  ;;  %v825_v47 = vld [vmem:[#allocation10 + $0x220] sm:$0xff]  ;;  %v824_v49 = vld [vmem:[#allocation10 + $0x218] sm:$0xff] }
 0x213   :  { %2109 = vmatprep.subr.mxu1 %v1192_v50  ;;  %2147 = vmatpush1.msra.mxu0 %v1344_v51  ;;  %v1525_v48 = vld [vmem:[#allocation10 + $0x1800] sm:$0xff]  ;;  %v1524_v50 = vld [vmem:[#allocation10 + $0x17f8] sm:$0xff] }
 0x214   :  { %2110 = vmatpush2.msra.mxu1 %v1191_v52  ;;  %2148 = vmatprep.subr.mxu0 %v1336_v53  ;;  %v816_v51 = vld [vmem:[#allocation10 + $0x1d8] sm:$0xff]  ;;  %v815_v53 = vld [vmem:[#allocation10 + $0x1d0] sm:$0xff] }
 0x215   :  { %2112 = vmatmul.mubr.f32.vlgmr.msra.gmra.mxu1 %v5527_v3  ;;  %2149 = vmatpush1.msra.mxu0 %v1335_v55  ;;  %v1516_v52 = vld [vmem:[#allocation10 + $0x17b8] sm:$0xff]  ;;  %v1515_v55 = vld [vmem:[#allocation10 + $0x17b0] sm:$0xff] }
 0x216   :  { %2217 = vmatprep.subr.mxu1 %v1633_v57  ;;  %2150 = vmatprep.subr.mxu0 %v1615_v58  ;;  %v807_v57 = vld [vmem:[#allocation10 + $0x190] sm:$0xff] }
 0x217   :  { %2218 = vmatpush1.msra.mxu1 %v1632_v59  ;;  %2151 = vmatpush2.msra.mxu0 %v1614_v60  ;;  %v1507_v58 = vld [vmem:[#allocation10 + $0x1770] sm:$0xff]  ;;  %v806_v59 = vld [vmem:[#allocation10 + $0x188] sm:$0xff] }
 0x218   :  { %2219 = vmatprep.subr.mxu1 %v1624_v0  ;;  %2152 = vmatprep.subr.mxu0 %v1606_v1  ;;  %v1506_v60 = vld [vmem:[#allocation10 + $0x1768] sm:$0xff] }
 0x219   :  { %2220 = vmatpush1.msra.mxu1 %v1623_v41  ;;  %2253 = vmatprep.mubr.f32.mxu1 %v4699_v13  ;;  %v798_v0 = vld [vmem:[#allocation10 + $0x148] sm:$0xff]  ;;  %v797_v41 = vld [vmem:[#allocation10 + $0x140] sm:$0xff] }
 0x21a   :  { %2153 = vmatpush2.msra.mxu0 %v1605_v4  ;;  %4003 = vmatmul.mubr.msk.f32.vlgmr.msra.gmra.mxu1 %vm1688_vm5, %v5538_v54  ;;  %v1498_v1 = vld [vmem:[#allocation10 + $0x1728] sm:$0xff]  ;;  %v1497_v4 = vld [vmem:[#allocation10 + $0x1720] sm:$0xff] }
 0x21b   :  { %2260 = vmatprep.subr.mxu1 %v897_v5  ;;  %2154 = vmatprep.subr.mxu0 %v1597_v6  ;;  %v789_v5 = vld [vmem:[#allocation10 + $0x100] sm:$0xff] }
 0x21c   :  { %2261 = vmatpush1.msra.mxu1 %v896_v7  ;;  %2324 = vmatprep.mubr.f32.mxu1 %v5521_v61  ;;  %v1489_v6 = vld [vmem:[#allocation10 + $0x16e0] sm:$0xff]  ;;  %v788_v7 = vld [vmem:[#allocation10 + $0xf8] sm:$0xff] }
 0x21d   :  { %2155 = vmatpush2.msra.mxu0 %v1596_v8  ;;  %2262 = vmatprep.subr.mxu1 %v888_v9  ;;  %v1488_v8 = vld [vmem:[#allocation10 + $0x16d8] sm:$0xff] }
 0x21e   :  { %2156 = vmatprep.subr.mxu0 %v1588_v10  ;;  %2263 = vmatpush1.msra.mxu1 %v887_v11  ;;  %v780_v9 = vld [vmem:[#allocation10 + $0xb8] sm:$0xff]  ;;  %v779_v11 = vld [vmem:[#allocation10 + $0xb0] sm:$0xff] }
 0x21f   :  { %2157 = vmatpush2.msra.mxu0 %v1587_v14  ;;  %2264 = vmatprep.subr.mxu1 %v879_v15  ;;  %v1480_v10 = vld [vmem:[#allocation10 + $0x1698] sm:$0xff]  ;;  %v1479_v14 = vld [vmem:[#allocation10 + $0x1690] sm:$0xff] }
 0x220   :  { %2158 = vmatprep.subr.mxu0 %v1579_v16  ;;  %2265 = vmatpush1.msra.mxu1 %v878_v56  ;;  %v771_v15 = vld [vmem:[#allocation10 + $0x70] sm:$0xff]  ;;  %v770_v16 = vld [vmem:[#allocation10 + $0x68] sm:$0xff]  ;;  %v1185_v56 = vld [vmem:[#allocation10 + $0xd60] sm:$0xff] }
 0x221   :  { %2159 = vmatpush2.msra.mxu0 %v1578_v17  ;;  %2266 = vmatprep.subr.mxu1 %v870_v18  ;;  %v762_v17 = vld [vmem:[#allocation10 + $0x28] sm:$0xff]  ;;  %v1184_v18 = vld [vmem:[#allocation10 + $0xd58] sm:$0xff] }
 0x222   :  { %2160 = vmatprep.subr.mxu0 %v1570_v19  ;;  %2267 = vmatpush1.msra.mxu1 %v869_v20  ;;  %v761_v19 = vld [vmem:[#allocation10 + $0x20] sm:$0xff]  ;;  %v1176_v20 = vld [vmem:[#allocation10 + $0xd18] sm:$0xff] }
 0x223   :  { %2161 = vmatpush2.msra.mxu0 %v1569_v21  ;;  %2268 = vmatprep.subr.mxu1 %v861_v22  ;;  %v1041_v21 = vld [vmem:[#allocation10 + $0x8e0] sm:$0xff]  ;;  %v1175_v22 = vld [vmem:[#allocation10 + $0xd10] sm:$0xff] }
 0x224   :  { %2162 = vmatprep.subr.mxu0 %v1561_v23  ;;  %2269 = vmatpush1.msra.mxu1 %v860_v24  ;;  %v1040_v23 = vld [vmem:[#allocation10 + $0x8d8] sm:$0xff]  ;;  %v1167_v24 = vld [vmem:[#allocation10 + $0xcd0] sm:$0xff] }
 0x225   :  { %2163 = vmatpush2.msra.mxu0 %v1560_v25  ;;  %2270 = vmatprep.subr.mxu1 %v852_v26  ;;  %v1032_v25 = vld [vmem:[#allocation10 + $0x898] sm:$0xff]  ;;  %v1166_v26 = vld [vmem:[#allocation10 + $0xcc8] sm:$0xff] }
 0x226   :  { %2164 = vmatprep.subr.mxu0 %v1552_v27  ;;  %2271 = vmatpush1.msra.mxu1 %v851_v28  ;;  %v1031_v27 = vld [vmem:[#allocation10 + $0x890] sm:$0xff]  ;;  %v1158_v28 = vld [vmem:[#allocation10 + $0xc88] sm:$0xff] }
 0x227   :  { %2165 = vmatpush2.msra.mxu0 %v1551_v31  ;;  %2272 = vmatprep.subr.mxu1 %v843_v32  ;;  %v1023_v31 = vld [vmem:[#allocation10 + $0x850] sm:$0xff]  ;;  %v1157_v32 = vld [vmem:[#allocation10 + $0xc80] sm:$0xff] }
 0x228   :  { %2166 = vmatprep.subr.mxu0 %v1543_v34  ;;  %2273 = vmatpush1.msra.mxu1 %v842_v35  ;;  %v1022_v34 = vld [vmem:[#allocation10 + $0x848] sm:$0xff]  ;;  %v1149_v35 = vld [vmem:[#allocation10 + $0xc40] sm:$0xff] }
 0x229   :  { %2167 = vmatpush2.msra.mxu0 %v1542_v36  ;;  %2274 = vmatprep.subr.mxu1 %v834_v37  ;;  %v1014_v36 = vld [vmem:[#allocation10 + $0x808] sm:$0xff]  ;;  %v1148_v37 = vld [vmem:[#allocation10 + $0xc38] sm:$0xff] }
 0x22a   :  { %2168 = vmatprep.subr.mxu0 %v1534_v44  ;;  %2275 = vmatpush1.msra.mxu1 %v833_v45  ;;  %v1013_v44 = vld [vmem:[#allocation10 + $0x800] sm:$0xff]  ;;  %v1140_v45 = vld [vmem:[#allocation10 + $0xbf8] sm:$0xff] }
 0x22b   :  { %2169 = vmatpush2.msra.mxu0 %v1533_v46  ;;  %2276 = vmatprep.subr.mxu1 %v825_v47  ;;  %v1005_v46 = vld [vmem:[#allocation10 + $0x7c0] sm:$0xff]  ;;  %v1139_v47 = vld [vmem:[#allocation10 + $0xbf0] sm:$0xff] }
 0x22c   :  { %2170 = vmatprep.subr.mxu0 %v1525_v48  ;;  %2277 = vmatpush1.msra.mxu1 %v824_v49  ;;  %v1004_v48 = vld [vmem:[#allocation10 + $0x7b8] sm:$0xff]  ;;  %v1131_v49 = vld [vmem:[#allocation10 + $0xbb0] sm:$0xff] }
 0x22d   :  { %2171 = vmatpush2.msra.mxu0 %v1524_v50  ;;  %2278 = vmatprep.subr.mxu1 %v816_v51  ;;  %v996_v50 = vld [vmem:[#allocation10 + $0x778] sm:$0xff]  ;;  %v1130_v51 = vld [vmem:[#allocation10 + $0xba8] sm:$0xff] }
 0x22e   :  { %2172 = vmatprep.subr.mxu0 %v1516_v52  ;;  %2279 = vmatpush1.msra.mxu1 %v815_v53  ;;  %v995_v52 = vld [vmem:[#allocation10 + $0x770] sm:$0xff]  ;;  %v1122_v53 = vld [vmem:[#allocation10 + $0xb68] sm:$0xff] }
 0x22f   :  { %2173 = vmatpush2.msra.mxu0 %v1515_v55  ;;  %2280 = vmatprep.subr.mxu1 %v807_v57  ;;  %v987_v55 = vld [vmem:[#allocation10 + $0x730] sm:$0xff]  ;;  %v1121_v57 = vld [vmem:[#allocation10 + $0xb60] sm:$0xff] }
 0x230   :  { %2174 = vmatprep.subr.mxu0 %v1507_v58  ;;  %2281 = vmatpush1.msra.mxu1 %v806_v59  ;;  %v986_v58 = vld [vmem:[#allocation10 + $0x728] sm:$0xff]  ;;  %v1113_v59 = vld [vmem:[#allocation10 + $0xb20] sm:$0xff] }
 0x231   :  { %2175 = vmatpush2.msra.mxu0 %v1506_v60  ;;  %2282 = vmatprep.subr.mxu1 %v798_v0  ;;  %v978_v60 = vld [vmem:[#allocation10 + $0x6e8] sm:$0xff]  ;;  %v1112_v0 = vld [vmem:[#allocation10 + $0xb18] sm:$0xff] }
 0x232   :  { %2176 = vmatprep.subr.mxu0 %v1498_v1  ;;  %2283 = vmatpush1.msra.mxu1 %v797_v41  ;;  %v977_v1 = vld [vmem:[#allocation10 + $0x6e0] sm:$0xff]  ;;  %v1104_v41 = vld [vmem:[#allocation10 + $0xad8] sm:$0xff] }
 0x233   :  { %2177 = vmatpush2.msra.mxu0 %v1497_v4  ;;  %2284 = vmatprep.subr.mxu1 %v789_v5  ;;  %v969_v4 = vld [vmem:[#allocation10 + $0x6a0] sm:$0xff]  ;;  %v1103_v5 = vld [vmem:[#allocation10 + $0xad0] sm:$0xff] }
 0x234   :  { %2178 = vmatprep.subr.mxu0 %v1489_v6  ;;  %2285 = vmatpush1.msra.mxu1 %v788_v7  ;;  %v968_v6 = vld [vmem:[#allocation10 + $0x698] sm:$0xff]  ;;  %v1095_v7 = vld [vmem:[#allocation10 + $0xa90] sm:$0xff] }
 0x235   :  { %2179 = vmatpush2.msra.mxu0 %v1488_v8  ;;  %2286 = vmatprep.subr.mxu1 %v780_v9  ;;  %v960_v8 = vld [vmem:[#allocation10 + $0x658] sm:$0xff]  ;;  %v1094_v9 = vld [vmem:[#allocation10 + $0xa88] sm:$0xff] }
 0x236   :  { %2180 = vmatprep.subr.mxu0 %v1480_v10  ;;  %2287 = vmatpush1.msra.mxu1 %v779_v11  ;;  %v959_v10 = vld [vmem:[#allocation10 + $0x650] sm:$0xff]  ;;  %v1086_v11 = vld [vmem:[#allocation10 + $0xa48] sm:$0xff] }
 0x237   :  { %2181 = vmatpush2.msra.mxu0 %v1479_v14  ;;  %2288 = vmatprep.subr.mxu1 %v771_v15  ;;  %v951_v14 = vld [vmem:[#allocation10 + $0x610] sm:$0xff]  ;;  %v1085_v15 = vld [vmem:[#allocation10 + $0xa40] sm:$0xff] }
 0x238   :  { %2183 = vmatmul.mubr.f32.vlgmr.msra.gmra.mxu0 %v5553_v63  ;;  %2289 = vmatpush1.msra.mxu1 %v770_v16  ;;  %v950_v16 = vld [vmem:[#allocation10 + $0x608] sm:$0xff] }
 0x239   :  { %2331 = vmatprep.subr.mxu0 %v1185_v56  ;;  %2290 = vmatprep.subr.mxu1 %v762_v17  ;;  %v1077_v56 = vld [vmem:[#allocation10 + $0xa00] sm:$0xff]  ;;  %v942_v17 = vld [vmem:[#allocation10 + $0x5c8] sm:$0xff] }
 0x23a   :  { %2332 = vmatpush1.msra.mxu0 %v1184_v18  ;;  %2395 = vmatprep.mubr.f32.mxu0 %v5523_v62  ;;  %v1076_v18 = vld [vmem:[#allocation10 + $0x9f8] sm:$0xff] }
 0x23b   :  { %2291 = vmatpush1.msra.mxu1 %v761_v19  ;;  %2333 = vmatprep.subr.mxu0 %v1176_v20  ;;  %v941_v19 = vld [vmem:[#allocation10 + $0x5c0] sm:$0xff]  ;;  %v1068_v20 = vld [vmem:[#allocation10 + $0x9b8] sm:$0xff] }
 0x23c   :  { %2292 = vmatprep.subr.mxu1 %v1041_v21  ;;  %2334 = vmatpush1.msra.mxu0 %v1175_v22  ;;  %v933_v21 = vld [vmem:[#allocation10 + $0x580] sm:$0xff]  ;;  %v1067_v22 = vld [vmem:[#allocation10 + $0x9b0] sm:$0xff] }
 0x23d   :  { %2293 = vmatpush2.msra.mxu1 %v1040_v23  ;;  %2335 = vmatprep.subr.mxu0 %v1167_v24  ;;  %v932_v23 = vld [vmem:[#allocation10 + $0x578] sm:$0xff]  ;;  %v1059_v24 = vld [vmem:[#allocation10 + $0x970] sm:$0xff] }
 0x23e   :  { %2294 = vmatprep.subr.mxu1 %v1032_v25  ;;  %2336 = vmatpush1.msra.mxu0 %v1166_v26  ;;  %v924_v25 = vld [vmem:[#allocation10 + $0x538] sm:$0xff]  ;;  %v1058_v26 = vld [vmem:[#allocation10 + $0x968] sm:$0xff] }
 0x23f   :  { %2295 = vmatpush2.msra.mxu1 %v1031_v27  ;;  %2337 = vmatprep.subr.mxu0 %v1158_v28  ;;  %v923_v27 = vld [vmem:[#allocation10 + $0x530] sm:$0xff]  ;;  %v1050_v28 = vld [vmem:[#allocation10 + $0x928] sm:$0xff] }
 0x240   :  { %2296 = vmatprep.subr.mxu1 %v1023_v31  ;;  %2338 = vmatpush1.msra.mxu0 %v1157_v32  ;;  %v915_v31 = vld [vmem:[#allocation10 + $0x4f0] sm:$0xff]  ;;  %v1049_v32 = vld [vmem:[#allocation10 + $0x920] sm:$0xff] }
 0x241   :  { %2297 = vmatpush2.msra.mxu1 %v1022_v34  ;;  %2339 = vmatprep.subr.mxu0 %v1149_v35  ;;  %v914_v34 = vld [vmem:[#allocation10 + $0x4e8] sm:$0xff]  ;;  %v1329_v35 = vld [vmem:[#allocation10 + $0x11e0] sm:$0xff] }
 0x242   :  { %2298 = vmatprep.subr.mxu1 %v1014_v36  ;;  %2340 = vmatpush1.msra.mxu0 %v1148_v37  ;;  %v906_v36 = vld [vmem:[#allocation10 + $0x4a8] sm:$0xff]  ;;  %v1328_v37 = vld [vmem:[#allocation10 + $0x11d8] sm:$0xff] }
 0x243   :  { %2299 = vmatpush2.msra.mxu1 %v1013_v44  ;;  %2341 = vmatprep.subr.mxu0 %v1140_v45  ;;  %v905_v44 = vld [vmem:[#allocation10 + $0x4a0] sm:$0xff]  ;;  %v1320_v45 = vld [vmem:[#allocation10 + $0x1198] sm:$0xff] }
 0x244   :  { %2300 = vmatprep.subr.mxu1 %v1005_v46  ;;  %2342 = vmatpush1.msra.mxu0 %v1139_v47  ;;  %v1319_v46 = vld [vmem:[#allocation10 + $0x1190] sm:$0xff]  ;;  %v1473_v47 = vld [vmem:[#allocation10 + $0x1660] sm:$0xff] }
 0x245   :  { %2301 = vmatpush2.msra.mxu1 %v1004_v48  ;;  %2343 = vmatprep.subr.mxu0 %v1131_v49  ;;  %v1311_v48 = vld [vmem:[#allocation10 + $0x1150] sm:$0xff]  ;;  %v1472_v49 = vld [vmem:[#allocation10 + $0x1658] sm:$0xff] }
 0x246   :  { %2302 = vmatprep.subr.mxu1 %v996_v50  ;;  %2344 = vmatpush1.msra.mxu0 %v1130_v51  ;;  %v1310_v50 = vld [vmem:[#allocation10 + $0x1148] sm:$0xff]  ;;  %v1464_v51 = vld [vmem:[#allocation10 + $0x1618] sm:$0xff] }
 0x247   :  { %2303 = vmatpush2.msra.mxu1 %v995_v52  ;;  %2345 = vmatprep.subr.mxu0 %v1122_v53  ;;  %v1302_v52 = vld [vmem:[#allocation10 + $0x1108] sm:$0xff]  ;;  %v1463_v53 = vld [vmem:[#allocation10 + $0x1610] sm:$0xff] }
 0x248   :  { %2304 = vmatprep.subr.mxu1 %v987_v55  ;;  %2346 = vmatpush1.msra.mxu0 %v1121_v57  ;;  %v1301_v55 = vld [vmem:[#allocation10 + $0x1100] sm:$0xff]  ;;  %v1455_v57 = vld [vmem:[#allocation10 + $0x15d0] sm:$0xff] }
 0x249   :  { %2305 = vmatpush2.msra.mxu1 %v986_v58  ;;  %2347 = vmatprep.subr.mxu0 %v1113_v59  ;;  %v1293_v58 = vld [vmem:[#allocation10 + $0x10c0] sm:$0xff]  ;;  %v1454_v59 = vld [vmem:[#allocation10 + $0x15c8] sm:$0xff] }
 0x24a   :  { %2306 = vmatprep.subr.mxu1 %v978_v60  ;;  %2348 = vmatpush1.msra.mxu0 %v1112_v0  ;;  %v1292_v60 = vld [vmem:[#allocation10 + $0x10b8] sm:$0xff]  ;;  %v1446_v0 = vld [vmem:[#allocation10 + $0x1588] sm:$0xff] }
 0x24b   :  { %2307 = vmatpush2.msra.mxu1 %v977_v1  ;;  %2349 = vmatprep.subr.mxu0 %v1104_v41  ;;  %v1284_v1 = vld [vmem:[#allocation10 + $0x1078] sm:$0xff]  ;;  %v1445_v41 = vld [vmem:[#allocation10 + $0x1580] sm:$0xff] }
 0x24c   :  { %2308 = vmatprep.subr.mxu1 %v969_v4  ;;  %2350 = vmatpush1.msra.mxu0 %v1103_v5  ;;  %v1283_v4 = vld [vmem:[#allocation10 + $0x1070] sm:$0xff]  ;;  %v1437_v5 = vld [vmem:[#allocation10 + $0x1540] sm:$0xff] }
 0x24d   :  { %2309 = vmatpush2.msra.mxu1 %v968_v6  ;;  %2351 = vmatprep.subr.mxu0 %v1095_v7  ;;  %v1275_v6 = vld [vmem:[#allocation10 + $0x1030] sm:$0xff]  ;;  %v1436_v7 = vld [vmem:[#allocation10 + $0x1538] sm:$0xff] }
 0x24e   :  { %2310 = vmatprep.subr.mxu1 %v960_v8  ;;  %2352 = vmatpush1.msra.mxu0 %v1094_v9  ;;  %v1274_v8 = vld [vmem:[#allocation10 + $0x1028] sm:$0xff]  ;;  %v1428_v9 = vld [vmem:[#allocation10 + $0x14f8] sm:$0xff] }
 0x24f   :  { %2311 = vmatpush2.msra.mxu1 %v959_v10  ;;  %2353 = vmatprep.subr.mxu0 %v1086_v11  ;;  %v1266_v10 = vld [vmem:[#allocation10 + $0xfe8] sm:$0xff]  ;;  %v1427_v11 = vld [vmem:[#allocation10 + $0x14f0] sm:$0xff] }
 0x250   :  { %2312 = vmatprep.subr.mxu1 %v951_v14  ;;  %2354 = vmatpush1.msra.mxu0 %v1085_v15  ;;  %v1265_v14 = vld [vmem:[#allocation10 + $0xfe0] sm:$0xff]  ;;  %v1419_v15 = vld [vmem:[#allocation10 + $0x14b0] sm:$0xff] }
 0x251   :  { %2313 = vmatpush2.msra.mxu1 %v950_v16  ;;  %2355 = vmatprep.subr.mxu0 %v1077_v56  ;;  %v1257_v16 = vld [vmem:[#allocation10 + $0xfa0] sm:$0xff]  ;;  %v1418_v56 = vld [vmem:[#allocation10 + $0x14a8] sm:$0xff] }
 0x252   :  { %2314 = vmatprep.subr.mxu1 %v942_v17  ;;  %2356 = vmatpush1.msra.mxu0 %v1076_v18  ;;  %v1256_v17 = vld [vmem:[#allocation10 + $0xf98] sm:$0xff]  ;;  %v1410_v18 = vld [vmem:[#allocation10 + $0x1468] sm:$0xff] }
 0x253   :  { %2315 = vmatpush2.msra.mxu1 %v941_v19  ;;  %2357 = vmatprep.subr.mxu0 %v1068_v20  ;;  %v1248_v19 = vld [vmem:[#allocation10 + $0xf58] sm:$0xff]  ;;  %v1409_v20 = vld [vmem:[#allocation10 + $0x1460] sm:$0xff] }
 0x254   :  { %2316 = vmatprep.subr.mxu1 %v933_v21  ;;  %2358 = vmatpush1.msra.mxu0 %v1067_v22  ;;  %v1247_v21 = vld [vmem:[#allocation10 + $0xf50] sm:$0xff]  ;;  %v1401_v22 = vld [vmem:[#allocation10 + $0x1420] sm:$0xff] }
 0x255   :  { %2317 = vmatpush2.msra.mxu1 %v932_v23  ;;  %2359 = vmatprep.subr.mxu0 %v1059_v24  ;;  %v1239_v23 = vld [vmem:[#allocation10 + $0xf10] sm:$0xff]  ;;  %v1400_v24 = vld [vmem:[#allocation10 + $0x1418] sm:$0xff] }
 0x256   :  { %2318 = vmatprep.subr.mxu1 %v924_v25  ;;  %2360 = vmatpush1.msra.mxu0 %v1058_v26  ;;  %v1238_v25 = vld [vmem:[#allocation10 + $0xf08] sm:$0xff]  ;;  %v1392_v26 = vld [vmem:[#allocation10 + $0x13d8] sm:$0xff] }
 0x257   :  { %2319 = vmatpush2.msra.mxu1 %v923_v27  ;;  %2361 = vmatprep.subr.mxu0 %v1050_v28  ;;  %v1230_v27 = vld [vmem:[#allocation10 + $0xec8] sm:$0xff]  ;;  %v1391_v28 = vld [vmem:[#allocation10 + $0x13d0] sm:$0xff] }
 0x258   :  { %2320 = vmatprep.subr.mxu1 %v915_v31  ;;  %2362 = vmatpush1.msra.mxu0 %v1049_v32  ;;  %v1229_v31 = vld [vmem:[#allocation10 + $0xec0] sm:$0xff]  ;;  %v1383_v32 = vld [vmem:[#allocation10 + $0x1390] sm:$0xff] }
 0x259   :  { %2321 = vmatpush2.msra.mxu1 %v914_v34  ;;  %2363 = vmatprep.subr.mxu0 %v1329_v35  ;;  %v1221_v34 = vld [vmem:[#allocation10 + $0xe80] sm:$0xff]  ;;  %v1382_v35 = vld [vmem:[#allocation10 + $0x1388] sm:$0xff] }
 0x25a   :  { %2322 = vmatprep.subr.mxu1 %v906_v36  ;;  %2364 = vmatpush2.msra.mxu0 %v1328_v37  ;;  %v1220_v36 = vld [vmem:[#allocation10 + $0xe78] sm:$0xff]  ;;  %v1374_v37 = vld [vmem:[#allocation10 + $0x1348] sm:$0xff] }
 0x25b   :  { %2323 = vmatpush2.msra.mxu1 %v905_v44  ;;  %2365 = vmatprep.subr.mxu0 %v1320_v45  ;;  %v1212_v44 = vld [vmem:[#allocation10 + $0xe38] sm:$0xff]  ;;  %v1373_v45 = vld [vmem:[#allocation10 + $0x1340] sm:$0xff] }
 0x25c   :  { %2325 = vmatmul.mubr.f32.vlgmr.msra.gmra.mxu1 %v5525_v2  ;;  %2366 = vmatpush2.msra.mxu0 %v1319_v46  ;;  %v1211_v46 = vld [vmem:[#allocation10 + $0xe30] sm:$0xff] }
 0x25d   :  { %2402 = vmatprep.subr.mxu1 %v1473_v47  ;;  %2367 = vmatprep.subr.mxu0 %v1311_v48  ;;  %v1365_v47 = vld [vmem:[#allocation10 + $0x1300] sm:$0xff]  ;;  %v1203_v48 = vld [vmem:[#allocation10 + $0xdf0] sm:$0xff] }
 0x25e   :  { %2403 = vmatpush1.msra.mxu1 %v1472_v49  ;;  %2466 = vmatprep.mubr.f32.mxu1 %v5551_v12  ;;  %v1364_v49 = vld [vmem:[#allocation10 + $0x12f8] sm:$0xff] }
 0x25f   :  { %2368 = vmatpush2.msra.mxu0 %v1310_v50  ;;  %2404 = vmatprep.subr.mxu1 %v1464_v51  ;;  %v1202_v50 = vld [vmem:[#allocation10 + $0xde8] sm:$0xff]  ;;  %v1356_v51 = vld [vmem:[#allocation10 + $0x12b8] sm:$0xff] }
 0x260   :  { %2369 = vmatprep.subr.mxu0 %v1302_v52  ;;  %2405 = vmatpush1.msra.mxu1 %v1463_v53  ;;  %v1194_v52 = vld [vmem:[#allocation10 + $0xda8] sm:$0xff]  ;;  %v1355_v53 = vld [vmem:[#allocation10 + $0x12b0] sm:$0xff] }
 0x261   :  { %2370 = vmatpush2.msra.mxu0 %v1301_v55  ;;  %2406 = vmatprep.subr.mxu1 %v1455_v57  ;;  %v1193_v55 = vld [vmem:[#allocation10 + $0xda0] sm:$0xff]  ;;  %v1347_v57 = vld [vmem:[#allocation10 + $0x1270] sm:$0xff] }
 0x262   :  { %2371 = vmatprep.subr.mxu0 %v1293_v58  ;;  %2407 = vmatpush1.msra.mxu1 %v1454_v59  ;;  %v1346_v58 = vld [vmem:[#allocation10 + $0x1268] sm:$0xff]  ;;  %v1635_v59 = vld [vmem:[#allocation10 + $0x1b70] sm:$0xff] }
 0x263   :  { %2372 = vmatpush2.msra.mxu0 %v1292_v60  ;;  %2408 = vmatprep.subr.mxu1 %v1446_v0  ;;  %v1338_v60 = vld [vmem:[#allocation10 + $0x1228] sm:$0xff] }
 0x264   :  { %2373 = vmatprep.subr.mxu0 %v1284_v1  ;;  %2409 = vmatpush1.msra.mxu1 %v1445_v41  ;;  %v1634_v0 = vld [vmem:[#allocation10 + $0x1b68] sm:$0xff]  ;;  %v1337_v1 = vld [vmem:[#allocation10 + $0x1220] sm:$0xff] }
 0x265   :  { %2374 = vmatpush2.msra.mxu0 %v1283_v4  ;;  %2410 = vmatprep.subr.mxu1 %v1437_v5  ;;  %v1626_v41 = vld [vmem:[#allocation10 + $0x1b28] sm:$0xff]  ;;  %v1617_v4 = vld [vmem:[#allocation10 + $0x1ae0] sm:$0xff] }
 0x266   :  { %2375 = vmatprep.subr.mxu0 %v1275_v6  ;;  %2411 = vmatpush1.msra.mxu1 %v1436_v7  ;;  %v1625_v5 = vld [vmem:[#allocation10 + $0x1b20] sm:$0xff]  ;;  %v1616_v6 = vld [vmem:[#allocation10 + $0x1ad8] sm:$0xff]  ;;  %v899_v7 = vld [vmem:[#allocation10 + $0x470] sm:$0xff] }
 0x267   :  { %2376 = vmatpush2.msra.mxu0 %v1274_v8  ;;  %2412 = vmatprep.subr.mxu1 %v1428_v9  ;;  %v1608_v8 = vld [vmem:[#allocation10 + $0x1a98] sm:$0xff]  ;;  %v898_v9 = vld [vmem:[#allocation10 + $0x468] sm:$0xff] }
 0x268   :  { %2377 = vmatprep.subr.mxu0 %v1266_v10  ;;  %2413 = vmatpush1.msra.mxu1 %v1427_v11  ;;  %v1607_v10 = vld [vmem:[#allocation10 + $0x1a90] sm:$0xff]  ;;  %v890_v11 = vld [vmem:[#allocation10 + $0x428] sm:$0xff] }
 0x269   :  { %2378 = vmatpush2.msra.mxu0 %v1265_v14  ;;  %2414 = vmatprep.subr.mxu1 %v1419_v15  ;;  %v1599_v14 = vld [vmem:[#allocation10 + $0x1a50] sm:$0xff]  ;;  %v889_v15 = vld [vmem:[#allocation10 + $0x420] sm:$0xff] }
 0x26a   :  { %2379 = vmatprep.subr.mxu0 %v1257_v16  ;;  %2415 = vmatpush1.msra.mxu1 %v1418_v56  ;;  %v1598_v16 = vld [vmem:[#allocation10 + $0x1a48] sm:$0xff]  ;;  %v881_v56 = vld [vmem:[#allocation10 + $0x3e0] sm:$0xff] }
 0x26b   :  { %2380 = vmatpush2.msra.mxu0 %v1256_v17  ;;  %2416 = vmatprep.subr.mxu1 %v1410_v18  ;;  %v1590_v17 = vld [vmem:[#allocation10 + $0x1a08] sm:$0xff]  ;;  %v880_v18 = vld [vmem:[#allocation10 + $0x3d8] sm:$0xff] }
 0x26c   :  { %2381 = vmatprep.subr.mxu0 %v1248_v19  ;;  %2417 = vmatpush1.msra.mxu1 %v1409_v20  ;;  %v1589_v19 = vld [vmem:[#allocation10 + $0x1a00] sm:$0xff]  ;;  %v872_v20 = vld [vmem:[#allocation10 + $0x398] sm:$0xff] }
 0x26d   :  { %2382 = vmatpush2.msra.mxu0 %v1247_v21  ;;  %2418 = vmatprep.subr.mxu1 %v1401_v22  ;;  %v1581_v21 = vld [vmem:[#allocation10 + $0x19c0] sm:$0xff]  ;;  %v871_v22 = vld [vmem:[#allocation10 + $0x390] sm:$0xff] }
 0x26e   :  { %2383 = vmatprep.subr.mxu0 %v1239_v23  ;;  %2419 = vmatpush1.msra.mxu1 %v1400_v24  ;;  %v1580_v23 = vld [vmem:[#allocation10 + $0x19b8] sm:$0xff]  ;;  %v863_v24 = vld [vmem:[#allocation10 + $0x350] sm:$0xff] }
 0x26f   :  { %2384 = vmatpush2.msra.mxu0 %v1238_v25  ;;  %2420 = vmatprep.subr.mxu1 %v1392_v26  ;;  %v1572_v25 = vld [vmem:[#allocation10 + $0x1978] sm:$0xff]  ;;  %v862_v26 = vld [vmem:[#allocation10 + $0x348] sm:$0xff] }
 0x270   :  { %2385 = vmatprep.subr.mxu0 %v1230_v27  ;;  %2421 = vmatpush1.msra.mxu1 %v1391_v28  ;;  %v1571_v27 = vld [vmem:[#allocation10 + $0x1970] sm:$0xff]  ;;  %v854_v28 = vld [vmem:[#allocation10 + $0x308] sm:$0xff] }
 0x271   :  { %2386 = vmatpush2.msra.mxu0 %v1229_v31  ;;  %2422 = vmatprep.subr.mxu1 %v1383_v32  ;;  %v1563_v31 = vld [vmem:[#allocation10 + $0x1930] sm:$0xff]  ;;  %v853_v32 = vld [vmem:[#allocation10 + $0x300] sm:$0xff] }
 0x272   :  { %2387 = vmatprep.subr.mxu0 %v1221_v34  ;;  %2423 = vmatpush1.msra.mxu1 %v1382_v35  ;;  %v1562_v34 = vld [vmem:[#allocation10 + $0x1928] sm:$0xff]  ;;  %v845_v35 = vld [vmem:[#allocation10 + $0x2c0] sm:$0xff] }
 0x273   :  { %2388 = vmatpush2.msra.mxu0 %v1220_v36  ;;  %2424 = vmatprep.subr.mxu1 %v1374_v37  ;;  %v1554_v36 = vld [vmem:[#allocation10 + $0x18e8] sm:$0xff]  ;;  %v844_v37 = vld [vmem:[#allocation10 + $0x2b8] sm:$0xff] }
 0x274   :  { %2389 = vmatprep.subr.mxu0 %v1212_v44  ;;  %2425 = vmatpush1.msra.mxu1 %v1373_v45  ;;  %v1553_v44 = vld [vmem:[#allocation10 + $0x18e0] sm:$0xff]  ;;  %v836_v45 = vld [vmem:[#allocation10 + $0x278] sm:$0xff] }
 0x275   :  { %2390 = vmatpush2.msra.mxu0 %v1211_v46  ;;  %2426 = vmatprep.subr.mxu1 %v1365_v47  ;;  %v1545_v46 = vld [vmem:[#allocation10 + $0x18a0] sm:$0xff]  ;;  %v835_v47 = vld [vmem:[#allocation10 + $0x270] sm:$0xff] }
 0x276   :  { %2391 = vmatprep.subr.mxu0 %v1203_v48  ;;  %2427 = vmatpush1.msra.mxu1 %v1364_v49  ;;  %v1544_v48 = vld [vmem:[#allocation10 + $0x1898] sm:$0xff]  ;;  %v827_v49 = vld [vmem:[#allocation10 + $0x230] sm:$0xff] }
 0x277   :  { %2392 = vmatpush2.msra.mxu0 %v1202_v50  ;;  %2428 = vmatprep.subr.mxu1 %v1356_v51  ;;  %v1536_v50 = vld [vmem:[#allocation10 + $0x1858] sm:$0xff]  ;;  %v826_v51 = vld [vmem:[#allocation10 + $0x228] sm:$0xff] }
 0x278   :  { %2393 = vmatprep.subr.mxu0 %v1194_v52  ;;  %2429 = vmatpush1.msra.mxu1 %v1355_v53  ;;  %v1535_v52 = vld [vmem:[#allocation10 + $0x1850] sm:$0xff]  ;;  %v818_v53 = vld [vmem:[#allocation10 + $0x1e8] sm:$0xff] }
 0x279   :  { %2394 = vmatpush2.msra.mxu0 %v1193_v55  ;;  %2430 = vmatprep.subr.mxu1 %v1347_v57  ;;  %v1527_v55 = vld [vmem:[#allocation10 + $0x1810] sm:$0xff]  ;;  %v817_v57 = vld [vmem:[#allocation10 + $0x1e0] sm:$0xff] }
 0x27a   :  { %2396 = vmatmul.mubr.f32.vlgmr.msra.gmra.mxu0 %v5527_v3  ;;  %2431 = vmatpush1.msra.mxu1 %v1346_v58  ;;  %v1526_v58 = vld [vmem:[#allocation10 + $0x1808] sm:$0xff] }
 0x27b   :  { %2501 = vmatprep.subr.mxu0 %v1635_v59  ;;  %2432 = vmatprep.subr.mxu1 %v1338_v60  ;;  %v809_v59 = vld [vmem:[#allocation10 + $0x1a0] sm:$0xff]  ;;  %v1518_v60 = vld [vmem:[#allocation10 + $0x17c8] sm:$0xff] }
 0x27c   :  { %2502 = vmatpush1.msra.mxu0 %v1634_v0  ;;  %2433 = vmatpush1.msra.mxu1 %v1337_v1  ;;  %v808_v0 = vld [vmem:[#allocation10 + $0x198] sm:$0xff]  ;;  %v1517_v1 = vld [vmem:[#allocation10 + $0x17c0] sm:$0xff] }
 0x27d   :  { %2503 = vmatprep.subr.mxu0 %v1626_v41  ;;  %2434 = vmatprep.subr.mxu1 %v1617_v4  ;;  %v800_v41 = vld [vmem:[#allocation10 + $0x158] sm:$0xff]  ;;  %v1509_v4 = vld [vmem:[#allocation10 + $0x1780] sm:$0xff] }
 0x27e   :  { %2504 = vmatpush1.msra.mxu0 %v1625_v5  ;;  %2537 = vmatprep.mubr.f32.mxu0 %v4699_v13  ;;  %v799_v5 = vld [vmem:[#allocation10 + $0x150] sm:$0xff] }
 0x27f   :  { %2435 = vmatpush2.msra.mxu1 %v1616_v6  ;;  %4004 = vmatmul.mubr.msk.f32.vlgmr.msra.gmra.mxu0 %vm1688_vm5, %v5538_v54  ;;  %v1508_v6 = vld [vmem:[#allocation10 + $0x1778] sm:$0xff] }
 0x280   :  { %2544 = vmatprep.subr.mxu0 %v899_v7  ;;  %2436 = vmatprep.subr.mxu1 %v1608_v8  ;;  %v791_v7 = vld [vmem:[#allocation10 + $0x110] sm:$0xff]  ;;  %v1500_v8 = vld [vmem:[#allocation10 + $0x1738] sm:$0xff] }
 0x281   :  { %2545 = vmatpush1.msra.mxu0 %v898_v9  ;;  %2608 = vmatprep.mubr.f32.mxu0 %v5521_v61  ;;  %v790_v9 = vld [vmem:[#allocation10 + $0x108] sm:$0xff] }
 0x282   :  { %2437 = vmatpush2.msra.mxu1 %v1607_v10  ;;  %2546 = vmatprep.subr.mxu0 %v890_v11  ;;  %v1499_v10 = vld [vmem:[#allocation10 + $0x1730] sm:$0xff]  ;;  %v782_v11 = vld [vmem:[#allocation10 + $0xc8] sm:$0xff] }
 0x283   :  { %2438 = vmatprep.subr.mxu1 %v1599_v14  ;;  %2547 = vmatpush1.msra.mxu0 %v889_v15  ;;  %v1491_v14 = vld [vmem:[#allocation10 + $0x16f0] sm:$0xff]  ;;  %v781_v15 = vld [vmem:[#allocation10 + $0xc0] sm:$0xff] }
 0x284   :  { %2439 = vmatpush2.msra.mxu1 %v1598_v16  ;;  %2548 = vmatprep.subr.mxu0 %v881_v56  ;;  %v1490_v16 = vld [vmem:[#allocation10 + $0x16e8] sm:$0xff]  ;;  %v773_v56 = vld [vmem:[#allocation10 + $0x80] sm:$0xff] }
 0x285   :  { %2440 = vmatprep.subr.mxu1 %v1590_v17  ;;  %2549 = vmatpush1.msra.mxu0 %v880_v18  ;;  %v1482_v17 = vld [vmem:[#allocation10 + $0x16a8] sm:$0xff]  ;;  %v772_v18 = vld [vmem:[#allocation10 + $0x78] sm:$0xff] }
 0x286   :  { %2441 = vmatpush2.msra.mxu1 %v1589_v19  ;;  %2550 = vmatprep.subr.mxu0 %v872_v20  ;;  %v1481_v19 = vld [vmem:[#allocation10 + $0x16a0] sm:$0xff]  ;;  %v764_v20 = vld [vmem:[#allocation10 + $0x38] sm:$0xff] }
 0x287   :  { %2442 = vmatprep.subr.mxu1 %v1581_v21  ;;  %2551 = vmatpush1.msra.mxu0 %v871_v22  ;;  %v763_v21 = vld [vmem:[#allocation10 + $0x30] sm:$0xff] }
 0x288   :  { %2443 = vmatpush2.msra.mxu1 %v1580_v23  ;;  %2552 = vmatprep.subr.mxu0 %v863_v24  ;;  %v1187_v22 = vld [vmem:[#allocation10 + $0xd70] sm:$0xff]  ;;  %v1186_v24 = vld [vmem:[#allocation10 + $0xd68] sm:$0xff] }
 0x289   :  { %2444 = vmatprep.subr.mxu1 %v1572_v25  ;;  %2553 = vmatpush1.msra.mxu0 %v862_v26  ;;  %v1043_v23 = vld [vmem:[#allocation10 + $0x8f0] sm:$0xff]  ;;  %v1042_v25 = vld [vmem:[#allocation10 + $0x8e8] sm:$0xff] }
 0x28a   :  { %2445 = vmatpush2.msra.mxu1 %v1571_v27  ;;  %2554 = vmatprep.subr.mxu0 %v854_v28  ;;  %v1178_v26 = vld [vmem:[#allocation10 + $0xd28] sm:$0xff]  ;;  %v1177_v28 = vld [vmem:[#allocation10 + $0xd20] sm:$0xff] }
 0x28b   :  { %2446 = vmatprep.subr.mxu1 %v1563_v31  ;;  %2555 = vmatpush1.msra.mxu0 %v853_v32  ;;  %v1034_v27 = vld [vmem:[#allocation10 + $0x8a8] sm:$0xff]  ;;  %v1033_v31 = vld [vmem:[#allocation10 + $0x8a0] sm:$0xff] }
 0x28c   :  { %2447 = vmatpush2.msra.mxu1 %v1562_v34  ;;  %2556 = vmatprep.subr.mxu0 %v845_v35  ;;  %v1169_v32 = vld [vmem:[#allocation10 + $0xce0] sm:$0xff]  ;;  %v1168_v35 = vld [vmem:[#allocation10 + $0xcd8] sm:$0xff] }
 0x28d   :  { %2448 = vmatprep.subr.mxu1 %v1554_v36  ;;  %2557 = vmatpush1.msra.mxu0 %v844_v37  ;;  %v1025_v34 = vld [vmem:[#allocation10 + $0x860] sm:$0xff]  ;;  %v1024_v36 = vld [vmem:[#allocation10 + $0x858] sm:$0xff] }
 0x28e   :  { %2449 = vmatpush2.msra.mxu1 %v1553_v44  ;;  %2558 = vmatprep.subr.mxu0 %v836_v45  ;;  %v1160_v37 = vld [vmem:[#allocation10 + $0xc98] sm:$0xff]  ;;  %v1159_v45 = vld [vmem:[#allocation10 + $0xc90] sm:$0xff] }
 0x28f   :  { %2450 = vmatprep.subr.mxu1 %v1545_v46  ;;  %2559 = vmatpush1.msra.mxu0 %v835_v47  ;;  %v1016_v44 = vld [vmem:[#allocation10 + $0x818] sm:$0xff]  ;;  %v1015_v46 = vld [vmem:[#allocation10 + $0x810] sm:$0xff] }
 0x290   :  { %2451 = vmatpush2.msra.mxu1 %v1544_v48  ;;  %2560 = vmatprep.subr.mxu0 %v827_v49  ;;  %v1151_v47 = vld [vmem:[#allocation10 + $0xc50] sm:$0xff]  ;;  %v1150_v49 = vld [vmem:[#allocation10 + $0xc48] sm:$0xff] }
 0x291   :  { %2452 = vmatprep.subr.mxu1 %v1536_v50  ;;  %2561 = vmatpush1.msra.mxu0 %v826_v51  ;;  %v1007_v48 = vld [vmem:[#allocation10 + $0x7d0] sm:$0xff]  ;;  %v1006_v50 = vld [vmem:[#allocation10 + $0x7c8] sm:$0xff] }
 0x292   :  { %2453 = vmatpush2.msra.mxu1 %v1535_v52  ;;  %2562 = vmatprep.subr.mxu0 %v818_v53  ;;  %v1142_v51 = vld [vmem:[#allocation10 + $0xc08] sm:$0xff]  ;;  %v1141_v53 = vld [vmem:[#allocation10 + $0xc00] sm:$0xff] }
 0x293   :  { %2454 = vmatprep.subr.mxu1 %v1527_v55  ;;  %2563 = vmatpush1.msra.mxu0 %v817_v57  ;;  %v998_v52 = vld [vmem:[#allocation10 + $0x788] sm:$0xff]  ;;  %v997_v55 = vld [vmem:[#allocation10 + $0x780] sm:$0xff] }
 0x294   :  { %2455 = vmatpush2.msra.mxu1 %v1526_v58  ;;  %2564 = vmatprep.subr.mxu0 %v809_v59  ;;  %v1133_v57 = vld [vmem:[#allocation10 + $0xbc0] sm:$0xff]  ;;  %v1132_v59 = vld [vmem:[#allocation10 + $0xbb8] sm:$0xff] }
 0x295   :  { %2456 = vmatprep.subr.mxu1 %v1518_v60  ;;  %2565 = vmatpush1.msra.mxu0 %v808_v0  ;;  %v989_v58 = vld [vmem:[#allocation10 + $0x740] sm:$0xff]  ;;  %v988_v60 = vld [vmem:[#allocation10 + $0x738] sm:$0xff] }
 0x296   :  { %2457 = vmatpush2.msra.mxu1 %v1517_v1  ;;  %2566 = vmatprep.subr.mxu0 %v800_v41  ;;  %v1124_v0 = vld [vmem:[#allocation10 + $0xb78] sm:$0xff]  ;;  %v1123_v41 = vld [vmem:[#allocation10 + $0xb70] sm:$0xff] }
 0x297   :  { %2458 = vmatprep.subr.mxu1 %v1509_v4  ;;  %2567 = vmatpush1.msra.mxu0 %v799_v5  ;;  %v980_v1 = vld [vmem:[#allocation10 + $0x6f8] sm:$0xff]  ;;  %v979_v4 = vld [vmem:[#allocation10 + $0x6f0] sm:$0xff] }
 0x298   :  { %2459 = vmatpush2.msra.mxu1 %v1508_v6  ;;  %2568 = vmatprep.subr.mxu0 %v791_v7  ;;  %v1115_v5 = vld [vmem:[#allocation10 + $0xb30] sm:$0xff]  ;;  %v1114_v7 = vld [vmem:[#allocation10 + $0xb28] sm:$0xff] }
 0x299   :  { %2460 = vmatprep.subr.mxu1 %v1500_v8  ;;  %2569 = vmatpush1.msra.mxu0 %v790_v9  ;;  %v971_v6 = vld [vmem:[#allocation10 + $0x6b0] sm:$0xff]  ;;  %v970_v8 = vld [vmem:[#allocation10 + $0x6a8] sm:$0xff] }
 0x29a   :  { %2461 = vmatpush2.msra.mxu1 %v1499_v10  ;;  %2570 = vmatprep.subr.mxu0 %v782_v11  ;;  %v1106_v9 = vld [vmem:[#allocation10 + $0xae8] sm:$0xff]  ;;  %v1105_v11 = vld [vmem:[#allocation10 + $0xae0] sm:$0xff] }
 0x29b   :  { %2462 = vmatprep.subr.mxu1 %v1491_v14  ;;  %2571 = vmatpush1.msra.mxu0 %v781_v15  ;;  %v962_v10 = vld [vmem:[#allocation10 + $0x668] sm:$0xff]  ;;  %v961_v14 = vld [vmem:[#allocation10 + $0x660] sm:$0xff] }
 0x29c   :  { %2463 = vmatpush2.msra.mxu1 %v1490_v16  ;;  %2572 = vmatprep.subr.mxu0 %v773_v56  ;;  %v1097_v15 = vld [vmem:[#allocation10 + $0xaa0] sm:$0xff]  ;;  %v1096_v56 = vld [vmem:[#allocation10 + $0xa98] sm:$0xff] }
 0x29d   :  { %2464 = vmatprep.subr.mxu1 %v1482_v17  ;;  %2573 = vmatpush1.msra.mxu0 %v772_v18  ;;  %v953_v16 = vld [vmem:[#allocation10 + $0x620] sm:$0xff]  ;;  %v952_v17 = vld [vmem:[#allocation10 + $0x618] sm:$0xff] }
 0x29e   :  { %2465 = vmatpush2.msra.mxu1 %v1481_v19  ;;  %2574 = vmatprep.subr.mxu0 %v764_v20  ;;  %v1088_v18 = vld [vmem:[#allocation10 + $0xa58] sm:$0xff]  ;;  %v1087_v20 = vld [vmem:[#allocation10 + $0xa50] sm:$0xff] }
 0x29f   :  { %2467 = vmatmul.mubr.f32.vlgmr.msra.gmra.mxu1 %v5553_v63  ;;  %2575 = vmatpush1.msra.mxu0 %v763_v21  ;;  %v944_v19 = vld [vmem:[#allocation10 + $0x5d8] sm:$0xff]  ;;  %v943_v21 = vld [vmem:[#allocation10 + $0x5d0] sm:$0xff] }
 0x2a0   :  { %2615 = vmatprep.subr.mxu1 %v1187_v22  ;;  %2576 = vmatprep.subr.mxu0 %v1043_v23  ;;  %v1079_v22 = vld [vmem:[#allocation10 + $0xa10] sm:$0xff] }
 0x2a1   :  { %2616 = vmatpush1.msra.mxu1 %v1186_v24  ;;  %2679 = vmatprep.mubr.f32.mxu1 %v5523_v62  ;;  %v935_v23 = vld [vmem:[#allocation10 + $0x590] sm:$0xff]  ;;  %v1078_v24 = vld [vmem:[#allocation10 + $0xa08] sm:$0xff] }
 0x2a2   :  { %2577 = vmatpush2.msra.mxu0 %v1042_v25  ;;  %2617 = vmatprep.subr.mxu1 %v1178_v26  ;;  %v934_v25 = vld [vmem:[#allocation10 + $0x588] sm:$0xff] }
 0x2a3   :  { %2578 = vmatprep.subr.mxu0 %v1034_v27  ;;  %2618 = vmatpush1.msra.mxu1 %v1177_v28  ;;  %v1070_v26 = vld [vmem:[#allocation10 + $0x9c8] sm:$0xff]  ;;  %v1069_v28 = vld [vmem:[#allocation10 + $0x9c0] sm:$0xff] }
 0x2a4   :  { %2579 = vmatpush2.msra.mxu0 %v1033_v31  ;;  %2619 = vmatprep.subr.mxu1 %v1169_v32  ;;  %v926_v27 = vld [vmem:[#allocation10 + $0x548] sm:$0xff]  ;;  %v925_v31 = vld [vmem:[#allocation10 + $0x540] sm:$0xff] }
 0x2a5   :  { %2580 = vmatprep.subr.mxu0 %v1025_v34  ;;  %2620 = vmatpush1.msra.mxu1 %v1168_v35  ;;  %v1061_v32 = vld [vmem:[#allocation10 + $0x980] sm:$0xff]  ;;  %v1060_v35 = vld [vmem:[#allocation10 + $0x978] sm:$0xff] }
 0x2a6   :  { %2581 = vmatpush2.msra.mxu0 %v1024_v36  ;;  %2621 = vmatprep.subr.mxu1 %v1160_v37  ;;  %v917_v34 = vld [vmem:[#allocation10 + $0x500] sm:$0xff]  ;;  %v916_v36 = vld [vmem:[#allocation10 + $0x4f8] sm:$0xff] }
 0x2a7   :  { %2582 = vmatprep.subr.mxu0 %v1016_v44  ;;  %2622 = vmatpush1.msra.mxu1 %v1159_v45  ;;  %v1052_v37 = vld [vmem:[#allocation10 + $0x938] sm:$0xff]  ;;  %v1051_v45 = vld [vmem:[#allocation10 + $0x930] sm:$0xff] }
 0x2a8   :  { %2583 = vmatpush2.msra.mxu0 %v1015_v46  ;;  %2623 = vmatprep.subr.mxu1 %v1151_v47  ;;  %v908_v44 = vld [vmem:[#allocation10 + $0x4b8] sm:$0xff]  ;;  %v907_v46 = vld [vmem:[#allocation10 + $0x4b0] sm:$0xff] }
 0x2a9   :  { %2584 = vmatprep.subr.mxu0 %v1007_v48  ;;  %2624 = vmatpush1.msra.mxu1 %v1150_v49  ;;  %v1331_v47 = vld [vmem:[#allocation10 + $0x11f0] sm:$0xff]  ;;  %v1330_v48 = vld [vmem:[#allocation10 + $0x11e8] sm:$0xff] }
 0x2aa   :  { %2585 = vmatpush2.msra.mxu0 %v1006_v50  ;;  %2625 = vmatprep.subr.mxu1 %v1142_v51  ;;  %v1475_v49 = vld [vmem:[#allocation10 + $0x1670] sm:$0xff]  ;;  %v1322_v50 = vld [vmem:[#allocation10 + $0x11a8] sm:$0xff] }
 0x2ab   :  { %2586 = vmatprep.subr.mxu0 %v998_v52  ;;  %2626 = vmatpush1.msra.mxu1 %v1141_v53  ;;  %v1474_v51 = vld [vmem:[#allocation10 + $0x1668] sm:$0xff]  ;;  %v1321_v52 = vld [vmem:[#allocation10 + $0x11a0] sm:$0xff] }
 0x2ac   :  { %2587 = vmatpush2.msra.mxu0 %v997_v55  ;;  %2627 = vmatprep.subr.mxu1 %v1133_v57  ;;  %v1466_v53 = vld [vmem:[#allocation10 + $0x1628] sm:$0xff]  ;;  %v1313_v55 = vld [vmem:[#allocation10 + $0x1160] sm:$0xff] }
 0x2ad   :  { %2588 = vmatprep.subr.mxu0 %v989_v58  ;;  %2628 = vmatpush1.msra.mxu1 %v1132_v59  ;;  %v1465_v57 = vld [vmem:[#allocation10 + $0x1620] sm:$0xff]  ;;  %v1312_v58 = vld [vmem:[#allocation10 + $0x1158] sm:$0xff] }
 0x2ae   :  { %2589 = vmatpush2.msra.mxu0 %v988_v60  ;;  %2629 = vmatprep.subr.mxu1 %v1124_v0  ;;  %v1457_v59 = vld [vmem:[#allocation10 + $0x15e0] sm:$0xff]  ;;  %v1304_v60 = vld [vmem:[#allocation10 + $0x1118] sm:$0xff] }
 0x2af   :  { %2590 = vmatprep.subr.mxu0 %v980_v1  ;;  %2630 = vmatpush1.msra.mxu1 %v1123_v41  ;;  %v1456_v0 = vld [vmem:[#allocation10 + $0x15d8] sm:$0xff]  ;;  %v1303_v1 = vld [vmem:[#allocation10 + $0x1110] sm:$0xff] }
 0x2b0   :  { %2591 = vmatpush2.msra.mxu0 %v979_v4  ;;  %2631 = vmatprep.subr.mxu1 %v1115_v5  ;;  %v1448_v41 = vld [vmem:[#allocation10 + $0x1598] sm:$0xff]  ;;  %v1295_v4 = vld [vmem:[#allocation10 + $0x10d0] sm:$0xff] }
 0x2b1   :  { %2592 = vmatprep.subr.mxu0 %v971_v6  ;;  %2632 = vmatpush1.msra.mxu1 %v1114_v7  ;;  %v1447_v5 = vld [vmem:[#allocation10 + $0x1590] sm:$0xff]  ;;  %v1294_v6 = vld [vmem:[#allocation10 + $0x10c8] sm:$0xff] }
 0x2b2   :  { %2593 = vmatpush2.msra.mxu0 %v970_v8  ;;  %2633 = vmatprep.subr.mxu1 %v1106_v9  ;;  %v1439_v7 = vld [vmem:[#allocation10 + $0x1550] sm:$0xff]  ;;  %v1286_v8 = vld [vmem:[#allocation10 + $0x1088] sm:$0xff] }
 0x2b3   :  { %2594 = vmatprep.subr.mxu0 %v962_v10  ;;  %2634 = vmatpush1.msra.mxu1 %v1105_v11  ;;  %v1438_v9 = vld [vmem:[#allocation10 + $0x1548] sm:$0xff]  ;;  %v1285_v10 = vld [vmem:[#allocation10 + $0x1080] sm:$0xff] }
 0x2b4   :  { %2595 = vmatpush2.msra.mxu0 %v961_v14  ;;  %2635 = vmatprep.subr.mxu1 %v1097_v15  ;;  %v1430_v11 = vld [vmem:[#allocation10 + $0x1508] sm:$0xff]  ;;  %v1277_v14 = vld [vmem:[#allocation10 + $0x1040] sm:$0xff] }
 0x2b5   :  { %2596 = vmatprep.subr.mxu0 %v953_v16  ;;  %2636 = vmatpush1.msra.mxu1 %v1096_v56  ;;  %v1429_v15 = vld [vmem:[#allocation10 + $0x1500] sm:$0xff]  ;;  %v1276_v16 = vld [vmem:[#allocation10 + $0x1038] sm:$0xff] }
 0x2b6   :  { %2597 = vmatpush2.msra.mxu0 %v952_v17  ;;  %2637 = vmatprep.subr.mxu1 %v1088_v18  ;;  %v1421_v56 = vld [vmem:[#allocation10 + $0x14c0] sm:$0xff]  ;;  %v1268_v17 = vld [vmem:[#allocation10 + $0xff8] sm:$0xff] }
 0x2b7   :  { %2598 = vmatprep.subr.mxu0 %v944_v19  ;;  %2638 = vmatpush1.msra.mxu1 %v1087_v20  ;;  %v1420_v18 = vld [vmem:[#allocation10 + $0x14b8] sm:$0xff]  ;;  %v1267_v19 = vld [vmem:[#allocation10 + $0xff0] sm:$0xff] }
 0x2b8   :  { %2599 = vmatpush2.msra.mxu0 %v943_v21  ;;  %2639 = vmatprep.subr.mxu1 %v1079_v22  ;;  %v1412_v20 = vld [vmem:[#allocation10 + $0x1478] sm:$0xff]  ;;  %v1259_v21 = vld [vmem:[#allocation10 + $0xfb0] sm:$0xff] }
 0x2b9   :  { %2600 = vmatprep.subr.mxu0 %v935_v23  ;;  %2640 = vmatpush1.msra.mxu1 %v1078_v24  ;;  %v1411_v22 = vld [vmem:[#allocation10 + $0x1470] sm:$0xff]  ;;  %v1258_v23 = vld [vmem:[#allocation10 + $0xfa8] sm:$0xff] }
 0x2ba   :  { %2601 = vmatpush2.msra.mxu0 %v934_v25  ;;  %2641 = vmatprep.subr.mxu1 %v1070_v26  ;;  %v1403_v24 = vld [vmem:[#allocation10 + $0x1430] sm:$0xff]  ;;  %v1250_v25 = vld [vmem:[#allocation10 + $0xf68] sm:$0xff] }
 0x2bb   :  { %2602 = vmatprep.subr.mxu0 %v926_v27  ;;  %2642 = vmatpush1.msra.mxu1 %v1069_v28  ;;  %v1402_v26 = vld [vmem:[#allocation10 + $0x1428] sm:$0xff]  ;;  %v1249_v27 = vld [vmem:[#allocation10 + $0xf60] sm:$0xff] }
 0x2bc   :  { %2603 = vmatpush2.msra.mxu0 %v925_v31  ;;  %2643 = vmatprep.subr.mxu1 %v1061_v32  ;;  %v1394_v28 = vld [vmem:[#allocation10 + $0x13e8] sm:$0xff]  ;;  %v1241_v31 = vld [vmem:[#allocation10 + $0xf20] sm:$0xff] }
 0x2bd   :  { %2604 = vmatprep.subr.mxu0 %v917_v34  ;;  %2644 = vmatpush1.msra.mxu1 %v1060_v35  ;;  %v1393_v32 = vld [vmem:[#allocation10 + $0x13e0] sm:$0xff]  ;;  %v1240_v34 = vld [vmem:[#allocation10 + $0xf18] sm:$0xff] }
 0x2be   :  { %2605 = vmatpush2.msra.mxu0 %v916_v36  ;;  %2645 = vmatprep.subr.mxu1 %v1052_v37  ;;  %v1385_v35 = vld [vmem:[#allocation10 + $0x13a0] sm:$0xff]  ;;  %v1232_v36 = vld [vmem:[#allocation10 + $0xed8] sm:$0xff] }
 0x2bf   :  { %2606 = vmatprep.subr.mxu0 %v908_v44  ;;  %2646 = vmatpush1.msra.mxu1 %v1051_v45  ;;  %v1384_v37 = vld [vmem:[#allocation10 + $0x1398] sm:$0xff]  ;;  %v1231_v44 = vld [vmem:[#allocation10 + $0xed0] sm:$0xff] }
 0x2c0   :  { %2607 = vmatpush2.msra.mxu0 %v907_v46  ;;  %2647 = vmatprep.subr.mxu1 %v1331_v47  ;;  %v1376_v45 = vld [vmem:[#allocation10 + $0x1358] sm:$0xff]  ;;  %v1223_v46 = vld [vmem:[#allocation10 + $0xe90] sm:$0xff] }
 0x2c1   :  { %2609 = vmatmul.mubr.f32.vlgmr.msra.gmra.mxu0 %v5525_v2  ;;  %2648 = vmatpush2.msra.mxu1 %v1330_v48  ;;  %v1375_v47 = vld [vmem:[#allocation10 + $0x1350] sm:$0xff]  ;;  %v1222_v48 = vld [vmem:[#allocation10 + $0xe88] sm:$0xff] }
 0x2c2   :  { %2686 = vmatprep.subr.mxu0 %v1475_v49  ;;  %2649 = vmatprep.subr.mxu1 %v1322_v50  ;;  %v1367_v49 = vld [vmem:[#allocation10 + $0x1310] sm:$0xff]  ;;  %v1214_v50 = vld [vmem:[#allocation10 + $0xe48] sm:$0xff] }
 0x2c3   :  { %2687 = vmatpush1.msra.mxu0 %v1474_v51  ;;  %2750 = vmatprep.mubr.f32.mxu0 %v5551_v12  ;;  %v1366_v51 = vld [vmem:[#allocation10 + $0x1308] sm:$0xff] }
 0x2c4   :  { %2650 = vmatpush2.msra.mxu1 %v1321_v52  ;;  %2688 = vmatprep.subr.mxu0 %v1466_v53  ;;  %v1213_v52 = vld [vmem:[#allocation10 + $0xe40] sm:$0xff]  ;;  %v1358_v53 = vld [vmem:[#allocation10 + $0x12c8] sm:$0xff] }
 0x2c5   :  { %2651 = vmatprep.subr.mxu1 %v1313_v55  ;;  %2689 = vmatpush1.msra.mxu0 %v1465_v57  ;;  %v1205_v55 = vld [vmem:[#allocation10 + $0xe00] sm:$0xff] }
 0x2c6   :  { %2652 = vmatpush2.msra.mxu1 %v1312_v58  ;;  %2690 = vmatprep.subr.mxu0 %v1457_v59  ;;  %v1357_v57 = vld [vmem:[#allocation10 + $0x12c0] sm:$0xff]  ;;  %v1204_v58 = vld [vmem:[#allocation10 + $0xdf8] sm:$0xff] }
 0x2c7   :  { %2653 = vmatprep.subr.mxu1 %v1304_v60  ;;  %2691 = vmatpush1.msra.mxu0 %v1456_v0  ;;  %v1349_v59 = vld [vmem:[#allocation10 + $0x1280] sm:$0xff]  ;;  %v1196_v60 = vld [vmem:[#allocation10 + $0xdb8] sm:$0xff] }
 0x2c8   :  { %2654 = vmatpush2.msra.mxu1 %v1303_v1  ;;  %2692 = vmatprep.subr.mxu0 %v1448_v41  ;;  %v1348_v0 = vld [vmem:[#allocation10 + $0x1278] sm:$0xff]  ;;  %v1195_v1 = vld [vmem:[#allocation10 + $0xdb0] sm:$0xff] }
 0x2c9   :  { %2655 = vmatprep.subr.mxu1 %v1295_v4  ;;  %2693 = vmatpush1.msra.mxu0 %v1447_v5  ;;  %v1340_v41 = vld [vmem:[#allocation10 + $0x1238] sm:$0xff]  ;;  %v1339_v4 = vld [vmem:[#allocation10 + $0x1230] sm:$0xff]  ;;  %v1637_v5 = vld [vmem:[#allocation10 + $0x1b80] sm:$0xff] }
 0x2ca   :  { %2656 = vmatpush2.msra.mxu1 %v1294_v6  ;;  %2694 = vmatprep.subr.mxu0 %v1439_v7  ;;  %v1619_v6 = vld [vmem:[#allocation10 + $0x1af0] sm:$0xff]  ;;  %v1636_v7 = vld [vmem:[#allocation10 + $0x1b78] sm:$0xff] }
 0x2cb   :  { %2657 = vmatprep.subr.mxu1 %v1286_v8  ;;  %2695 = vmatpush1.msra.mxu0 %v1438_v9  ;;  %v1618_v8 = vld [vmem:[#allocation10 + $0x1ae8] sm:$0xff]  ;;  %v1628_v9 = vld [vmem:[#allocation10 + $0x1b38] sm:$0xff] }
 0x2cc   :  { %2658 = vmatpush2.msra.mxu1 %v1285_v10  ;;  %2696 = vmatprep.subr.mxu0 %v1430_v11  ;;  %v1610_v10 = vld [vmem:[#allocation10 + $0x1aa8] sm:$0xff]  ;;  %v1627_v11 = vld [vmem:[#allocation10 + $0x1b30] sm:$0xff] }
 0x2cd   :  { %2659 = vmatprep.subr.mxu1 %v1277_v14  ;;  %2697 = vmatpush1.msra.mxu0 %v1429_v15  ;;  %v1609_v14 = vld [vmem:[#allocation10 + $0x1aa0] sm:$0xff]  ;;  %v1044_v15 = vld [vmem:[#allocation10 + $0x8f8] sm:$0xff] }
 0x2ce   :  { %2660 = vmatpush2.msra.mxu1 %v1276_v16  ;;  %2698 = vmatprep.subr.mxu0 %v1421_v56  ;;  %v1601_v16 = vld [vmem:[#allocation10 + $0x1a60] sm:$0xff]  ;;  %v900_v56 = vld [vmem:[#allocation10 + $0x478] sm:$0xff] }
 0x2cf   :  { %2661 = vmatprep.subr.mxu1 %v1268_v17  ;;  %2699 = vmatpush1.msra.mxu0 %v1420_v18  ;;  %v1600_v17 = vld [vmem:[#allocation10 + $0x1a58] sm:$0xff]  ;;  %v1035_v18 = vld [vmem:[#allocation10 + $0x8b0] sm:$0xff] }
 0x2d0   :  { %2662 = vmatpush2.msra.mxu1 %v1267_v19  ;;  %2700 = vmatprep.subr.mxu0 %v1412_v20  ;;  %v1592_v19 = vld [vmem:[#allocation10 + $0x1a18] sm:$0xff]  ;;  %v891_v20 = vld [vmem:[#allocation10 + $0x430] sm:$0xff] }
 0x2d1   :  { %2663 = vmatprep.subr.mxu1 %v1259_v21  ;;  %2701 = vmatpush1.msra.mxu0 %v1411_v22  ;;  %v1591_v21 = vld [vmem:[#allocation10 + $0x1a10] sm:$0xff]  ;;  %v1026_v22 = vld [vmem:[#allocation10 + $0x868] sm:$0xff] }
 0x2d2   :  { %2664 = vmatpush2.msra.mxu1 %v1258_v23  ;;  %2702 = vmatprep.subr.mxu0 %v1403_v24  ;;  %v1583_v23 = vld [vmem:[#allocation10 + $0x19d0] sm:$0xff]  ;;  %v882_v24 = vld [vmem:[#allocation10 + $0x3e8] sm:$0xff] }
 0x2d3   :  { %2665 = vmatprep.subr.mxu1 %v1250_v25  ;;  %2703 = vmatpush1.msra.mxu0 %v1402_v26  ;;  %v1582_v25 = vld [vmem:[#allocation10 + $0x19c8] sm:$0xff]  ;;  %v1017_v26 = vld [vmem:[#allocation10 + $0x820] sm:$0xff] }
 0x2d4   :  { %2666 = vmatpush2.msra.mxu1 %v1249_v27  ;;  %2704 = vmatprep.subr.mxu0 %v1394_v28  ;;  %v1574_v27 = vld [vmem:[#allocation10 + $0x1988] sm:$0xff]  ;;  %v873_v28 = vld [vmem:[#allocation10 + $0x3a0] sm:$0xff] }
 0x2d5   :  { %2667 = vmatprep.subr.mxu1 %v1241_v31  ;;  %2705 = vmatpush1.msra.mxu0 %v1393_v32  ;;  %v1573_v31 = vld [vmem:[#allocation10 + $0x1980] sm:$0xff]  ;;  %v1008_v32 = vld [vmem:[#allocation10 + $0x7d8] sm:$0xff] }
 0x2d6   :  { %2668 = vmatpush2.msra.mxu1 %v1240_v34  ;;  %2706 = vmatprep.subr.mxu0 %v1385_v35  ;;  %v1565_v34 = vld [vmem:[#allocation10 + $0x1940] sm:$0xff]  ;;  %v1564_v35 = vld [vmem:[#allocation10 + $0x1938] sm:$0xff] }
 0x2d7   :  { %2669 = vmatprep.subr.mxu1 %v1232_v36  ;;  %2707 = vmatpush1.msra.mxu0 %v1384_v37  ;;  %v999_v36 = vld [vmem:[#allocation10 + $0x790] sm:$0xff]  ;;  %v1556_v37 = vld [vmem:[#allocation10 + $0x18f8] sm:$0xff] }
 0x2d8   :  { %2670 = vmatpush2.msra.mxu1 %v1231_v44  ;;  %2708 = vmatprep.subr.mxu0 %v1376_v45  ;;  %v855_v44 = vld [vmem:[#allocation10 + $0x310] sm:$0xff] }
 0x2d9   :  { %2671 = vmatprep.subr.mxu1 %v1223_v46  ;;  %2709 = vmatpush1.msra.mxu0 %v1375_v47  ;;  %v1555_v45 = vld [vmem:[#allocation10 + $0x18f0] sm:$0xff]  ;;  %v990_v46 = vld [vmem:[#allocation10 + $0x748] sm:$0xff] }
 0x2da   :  { %2672 = vmatpush2.msra.mxu1 %v1222_v48  ;;  %2710 = vmatprep.subr.mxu0 %v1367_v49  ;;  %v1547_v47 = vld [vmem:[#allocation10 + $0x18b0] sm:$0xff]  ;;  %v846_v48 = vld [vmem:[#allocation10 + $0x2c8] sm:$0xff] }
 0x2db   :  { %2673 = vmatprep.subr.mxu1 %v1214_v50  ;;  %2711 = vmatpush1.msra.mxu0 %v1366_v51  ;;  %v1546_v49 = vld [vmem:[#allocation10 + $0x18a8] sm:$0xff]  ;;  %v981_v50 = vld [vmem:[#allocation10 + $0x700] sm:$0xff] }
 0x2dc   :  { %2674 = vmatpush2.msra.mxu1 %v1213_v52  ;;  %2712 = vmatprep.subr.mxu0 %v1358_v53  ;;  %v1538_v51 = vld [vmem:[#allocation10 + $0x1868] sm:$0xff]  ;;  %v837_v52 = vld [vmem:[#allocation10 + $0x280] sm:$0xff] }
 0x2dd   :  { %2675 = vmatprep.subr.mxu1 %v1205_v55  ;;  %2713 = vmatpush1.msra.mxu0 %v1357_v57  ;;  %v1537_v53 = vld [vmem:[#allocation10 + $0x1860] sm:$0xff]  ;;  %v972_v55 = vld [vmem:[#allocation10 + $0x6b8] sm:$0xff] }
 0x2de   :  { %2676 = vmatpush2.msra.mxu1 %v1204_v58  ;;  %2714 = vmatprep.subr.mxu0 %v1349_v59  ;;  %v1529_v57 = vld [vmem:[#allocation10 + $0x1820] sm:$0xff]  ;;  %v828_v58 = vld [vmem:[#allocation10 + $0x238] sm:$0xff] }
 0x2df   :  { %2677 = vmatprep.subr.mxu1 %v1196_v60  ;;  %2715 = vmatpush1.msra.mxu0 %v1348_v0  ;;  %v1528_v59 = vld [vmem:[#allocation10 + $0x1818] sm:$0xff]  ;;  %v963_v60 = vld [vmem:[#allocation10 + $0x670] sm:$0xff] }
 0x2e0   :  { %2678 = vmatpush2.msra.mxu1 %v1195_v1  ;;  %2716 = vmatprep.subr.mxu0 %v1340_v41  ;;  %v1520_v0 = vld [vmem:[#allocation10 + $0x17d8] sm:$0xff]  ;;  %v819_v1 = vld [vmem:[#allocation10 + $0x1f0] sm:$0xff] }
 0x2e1   :  { %2680 = vmatmul.mubr.f32.vlgmr.msra.gmra.mxu1 %v5527_v3  ;;  %2717 = vmatpush1.msra.mxu0 %v1339_v4  ;;  %v1519_v41 = vld [vmem:[#allocation10 + $0x17d0] sm:$0xff]  ;;  %v954_v4 = vld [vmem:[#allocation10 + $0x628] sm:$0xff] }
 0x2e2   :  { %2785 = vmatprep.subr.mxu1 %v1637_v5  ;;  %2718 = vmatprep.subr.mxu0 %v1619_v6  ;;  %v1511_v5 = vld [vmem:[#allocation10 + $0x1790] sm:$0xff]  ;;  %v810_v6 = vld [vmem:[#allocation10 + $0x1a8] sm:$0xff] }
 0x2e3   :  { %2786 = vmatpush1.msra.mxu1 %v1636_v7  ;;  %2719 = vmatpush2.msra.mxu0 %v1618_v8  ;;  %v1510_v7 = vld [vmem:[#allocation10 + $0x1788] sm:$0xff]  ;;  %v945_v8 = vld [vmem:[#allocation10 + $0x5e0] sm:$0xff] }
 0x2e4   :  { %2787 = vmatprep.subr.mxu1 %v1628_v9  ;;  %2720 = vmatprep.subr.mxu0 %v1610_v10  ;;  %v1502_v9 = vld [vmem:[#allocation10 + $0x1748] sm:$0xff]  ;;  %v801_v10 = vld [vmem:[#allocation10 + $0x160] sm:$0xff] }
 0x2e5   :  { %2788 = vmatpush1.msra.mxu1 %v1627_v11  ;;  %2821 = vmatprep.mubr.f32.mxu1 %v4699_v13  ;;  %v1501_v11 = vld [vmem:[#allocation10 + $0x1740] sm:$0xff] }
 0x2e6   :  { %2721 = vmatpush2.msra.mxu0 %v1609_v14  ;;  %4005 = vmatmul.mubr.msk.f32.vlgmr.msra.gmra.mxu1 %vm1688_vm5, %v5538_v54  ;;  %v936_v14 = vld [vmem:[#allocation10 + $0x598] sm:$0xff] }
 0x2e7   :  { %4051 = vmatprep.subr.mxu1 %v1044_v15  ;;  %2722 = vmatprep.subr.mxu0 %v1601_v16  ;;  %v1493_v15 = vld [vmem:[#allocation10 + $0x1700] sm:$0xff]  ;;  %v792_v16 = vld [vmem:[#allocation10 + $0x118] sm:$0xff] }
 0x2e8   :  { %4052 = vmatpush3.msra.mxu1 %v900_v56  ;;  %2892 = vmatprep.mubr.f32.mxu1 %v5521_v61  ;;  %v864_v61 = vld [vmem:[#allocation10 + $0x358] sm:$0xff] }
 0x2e9   :  { %2723 = vmatpush2.msra.mxu0 %v1600_v17  ;;  %4053 = vmatprep.subr.mxu1 %v1035_v18  ;;  %v1492_v56 = vld [vmem:[#allocation10 + $0x16f8] sm:$0xff]  ;;  %v927_v17 = vld [vmem:[#allocation10 + $0x550] sm:$0xff] }
 0x2ea   :  { %2724 = vmatprep.subr.mxu0 %v1592_v19  ;;  %4054 = vmatpush3.msra.mxu1 %v891_v20  ;;  %v1484_v18 = vld [vmem:[#allocation10 + $0x16b8] sm:$0xff]  ;;  %v783_v19 = vld [vmem:[#allocation10 + $0xd0] sm:$0xff] }
 0x2eb   :  { %2725 = vmatpush2.msra.mxu0 %v1591_v21  ;;  %4055 = vmatprep.subr.mxu1 %v1026_v22  ;;  %v1483_v20 = vld [vmem:[#allocation10 + $0x16b0] sm:$0xff]  ;;  %v918_v21 = vld [vmem:[#allocation10 + $0x508] sm:$0xff] }
 0x2ec   :  { %2726 = vmatprep.subr.mxu0 %v1583_v23  ;;  %4056 = vmatpush3.msra.mxu1 %v882_v24  ;;  %v774_v22 = vld [vmem:[#allocation10 + $0x88] sm:$0xff]  ;;  %v1332_v23 = vld [vmem:[#allocation10 + $0x11f8] sm:$0xff]  ;;  %v909_v24 = vld [vmem:[#allocation10 + $0x4c0] sm:$0xff] }
 0x2ed   :  { %2727 = vmatpush2.msra.mxu0 %v1582_v25  ;;  %4057 = vmatprep.subr.mxu1 %v1017_v26  ;;  %v1188_v25 = vld [vmem:[#allocation10 + $0xd78] sm:$0xff]  ;;  %v765_v26 = vld [vmem:[#allocation10 + $0x40] sm:$0xff] }
 0x2ee   :  { %2728 = vmatprep.subr.mxu0 %v1574_v27  ;;  %4058 = vmatpush3.msra.mxu1 %v873_v28  ;;  %v1323_v27 = vld [vmem:[#allocation10 + $0x11b0] sm:$0xff] }
 0x2ef   :  { %2729 = vmatpush2.msra.mxu0 %v1573_v31  ;;  %4059 = vmatprep.subr.mxu1 %v1008_v32  ;;  %v1179_v28 = vld [vmem:[#allocation10 + $0xd30] sm:$0xff]  ;;  %v1620_v31 = vld [vmem:[#allocation10 + $0x1af8] sm:$0xff]  ;;  %v1314_v32 = vld [vmem:[#allocation10 + $0x1168] sm:$0xff] }
 0x2f0   :  { %2730 = vmatprep.subr.mxu0 %v1565_v34  ;;  %4060 = vmatpush3.msra.mxu1 %v864_v61  ;;  %v1476_v34 = vld [vmem:[#allocation10 + $0x1678] sm:$0xff]  ;;  %v1170_v61 = vld [vmem:[#allocation10 + $0xce8] sm:$0xff] }
 0x2f1   :  { %2731 = vmatpush2.msra.mxu0 %v1564_v35  ;;  %4061 = vmatprep.subr.mxu1 %v999_v36  ;;  %v1611_v35 = vld [vmem:[#allocation10 + $0x1ab0] sm:$0xff]  ;;  %v1305_v36 = vld [vmem:[#allocation10 + $0x1120] sm:$0xff] }
 0x2f2   :  { %2732 = vmatprep.subr.mxu0 %v1556_v37  ;;  %4062 = vmatpush3.msra.mxu1 %v855_v44  ;;  %v1467_v37 = vld [vmem:[#allocation10 + $0x1630] sm:$0xff]  ;;  %v1161_v44 = vld [vmem:[#allocation10 + $0xca0] sm:$0xff] }
 0x2f3   :  { %2733 = vmatpush2.msra.mxu0 %v1555_v45  ;;  %4063 = vmatprep.subr.mxu1 %v990_v46  ;;  %v1602_v45 = vld [vmem:[#allocation10 + $0x1a68] sm:$0xff]  ;;  %v5587_v46 = vpop.f32.mrf.mxu0 }
 0x2f4   :  { %2734 = vmatprep.subr.mxu0 %v1547_v47  ;;  %4064 = vmatpush3.msra.mxu1 %v846_v48  ;;  %v1458_v47 = vld [vmem:[#allocation10 + $0x15e8] sm:$0xff]  ;;  %v1593_v48 = vld [vmem:[#allocation10 + $0x1a20] sm:$0xff] }
 0x2f5   :  { %2735 = vmatpush2.msra.mxu0 %v1546_v49  ;;  %4065 = vmatprep.subr.mxu1 %v981_v50  ;;  %v1287_v49 = vld [vmem:[#allocation10 + $0x1090] sm:$0xff]  ;;  %v1449_v50 = vld [vmem:[#allocation10 + $0x15a0] sm:$0xff] }
 0x2f6   :  { %2736 = vmatprep.subr.mxu0 %v1538_v51  ;;  %4066 = vmatpush3.msra.mxu1 %v837_v52  ;;  %v1143_v51 = vld [vmem:[#allocation10 + $0xc10] sm:$0xff]  ;;  %v1278_v52 = vld [vmem:[#allocation10 + $0x1048] sm:$0xff] }
 0x2f7   :  { %2737 = vmatpush2.msra.mxu0 %v1537_v53  ;;  %4067 = vmatprep.subr.mxu1 %v972_v55  ;;  %v5589_v53 = vpop.f32.mrf.mxu1  ;;  %v5591_v55 = vpop.f32.mrf.mxu0 }
 0x2f8   :  { %2738 = vmatprep.subr.mxu0 %v1529_v57  ;;  %4068 = vmatpush3.msra.mxu1 %v828_v58  ;;  %v1440_v57 = vld [vmem:[#allocation10 + $0x1558] sm:$0xff]  ;;  %v1134_v58 = vld [vmem:[#allocation10 + $0xbc8] sm:$0xff] }
 0x2f9   :  { %2739 = vmatpush2.msra.mxu0 %v1528_v59  ;;  %4069 = vmatprep.subr.mxu1 %v963_v60  ;;  %v1575_v59 = vld [vmem:[#allocation10 + $0x1990] sm:$0xff]  ;;  %v1269_v60 = vld [vmem:[#allocation10 + $0x1000] sm:$0xff] }
 0x2fa   :  { %2740 = vmatprep.subr.mxu0 %v1520_v0  ;;  %4070 = vmatpush3.msra.mxu1 %v819_v1  ;;  %v5593_v0 = vpop.f32.mrf.mxu0  ;;  %v1431_v1 = vld [vmem:[#allocation10 + $0x1510] sm:$0xff] }
 0x2fb   :  { %2741 = vmatpush2.msra.mxu0 %v1519_v41  ;;  %4071 = vmatprep.subr.mxu1 %v954_v4  ;;  %v1125_v41 = vld [vmem:[#allocation10 + $0xb80] sm:$0xff]  ;;  %v1566_v4 = vld [vmem:[#allocation10 + $0x1948] sm:$0xff] }
 0x2fc   :  { %2742 = vmatprep.subr.mxu0 %v1511_v5  ;;  %4072 = vmatpush3.msra.mxu1 %v810_v6  ;;  %v1260_v5 = vld [vmem:[#allocation10 + $0xfb8] sm:$0xff]  ;;  %v1760_v6 = vpop.f32.mrf.mxu1 }
 0x2fd   :  { %2743 = vmatpush2.msra.mxu0 %v1510_v7  ;;  %4073 = vmatprep.subr.mxu1 %v945_v8  ;;  %v1422_v7 = vld [vmem:[#allocation10 + $0x14c8] sm:$0xff]  ;;  %v1116_v8 = vld [vmem:[#allocation10 + $0xb38] sm:$0xff] }
 0x2fe   :  { %2744 = vmatprep.subr.mxu0 %v1502_v9  ;;  %4074 = vmatpush3.msra.mxu1 %v801_v10  ;;  %v1557_v9 = vld [vmem:[#allocation10 + $0x1900] sm:$0xff]  ;;  %v1251_v10 = vld [vmem:[#allocation10 + $0xf70] sm:$0xff] }
 0x2ff   :  { %2745 = vmatpush2.msra.mxu0 %v1501_v11  ;;  %4075 = vmatprep.subr.mxu1 %v936_v14  ;;  %v5595_v11 = vld [vmem:[#allocation11] sm:$0xff]  ;;  %v5597_v14 = vpop.f32.mrf.mxu0 }
 0x300   :  { %2746 = vmatprep.subr.mxu0 %v1493_v15  ;;  %4076 = vmatpush3.msra.mxu1 %v792_v16  ;;  %v5599_v15 = vpop.f32.mrf.mxu1  ;;  %v1413_v16 = vld [vmem:[#allocation10 + $0x1480] sm:$0xff] }
 0x301   :  { %2747 = vmatpush2.msra.mxu0 %v1492_v56  ;;  %4077 = vmatprep.subr.mxu1 %v927_v17  ;;  %v1107_v56 = vld [vmem:[#allocation10 + $0xaf0] sm:$0xff]  ;;  %v1650_v17 = vrot.slane %v5595_v11, %v413_v42 }
 0x302   :  { %2748 = vmatprep.subr.mxu0 %v1484_v18  ;;  %4078 = vmatpush3.msra.mxu1 %v783_v19  ;;  %v1548_v18 = vld [vmem:[#allocation10 + $0x18b8] sm:$0xff]  ;;  %v1242_v19 = vld [vmem:[#allocation10 + $0xf28] sm:$0xff] }
 0x303   :  { %2749 = vmatpush2.msra.mxu0 %v1483_v20  ;;  %4079 = vmatprep.subr.mxu1 %v918_v21  ;;  %v5604_v20 = vpop.f32.mrf.mxu0  ;;  %v1404_v21 = vld [vmem:[#allocation10 + $0x1438] sm:$0xff]  ;;  %v1761_v42 = vadd.f32 %v1760_v6, %v1650_v17 }
 0x304   :  { %2751 = vmatmul.mubr.f32.vlgmr.msra.gmra.mxu0 %v5553_v63  ;;  %4080 = vmatpush3.msra.mxu1 %v774_v22  ;;  %v1098_v22 = vld [vmem:[#allocation10 + $0xaa8] sm:$0xff] }
 0x305   :  { %4086 = vmatprep.subr.mxu0 %v1332_v23  ;;  %4081 = vmatprep.subr.mxu1 %v909_v24  ;;  %v1539_v23 = vld [vmem:[#allocation10 + $0x1870] sm:$0xff]  ;;  %v1233_v24 = vld [vmem:[#allocation10 + $0xee0] sm:$0xff] }
 0x306   :  { %4087 = vmatpush3.msra.mxu0 %v1188_v25  ;;  %2962 = vmatprep.mubr.f32.mxu0 %v5523_v62  ;;  %v1296_v62 = vld [vmem:[#allocation10 + $0x10d8] sm:$0xff]  ;;  %v1902_v25 = vpop.f32.mrf.mxu1 }
 0x307   :  { %4082 = vmatpush3.msra.mxu1 %v765_v26  ;;  %4088 = vmatprep.subr.mxu0 %v1323_v27  ;;  %v1395_v26 = vld [vmem:[#allocation10 + $0x13f0] sm:$0xff]  ;;  %v1089_v27 = vld [vmem:[#allocation10 + $0xa60] sm:$0xff] }
 0x308   :  { %2893 = vmatmul.mubr.f32.vlgmr.msra.gmra.mxu1 %v5525_v2  ;;  %4089 = vmatpush3.msra.mxu0 %v1179_v28  ;;  %v1152_v2 = vld [vmem:[#allocation10 + $0xc58] sm:$0xff]  ;;  %v1530_v28 = vld [vmem:[#allocation10 + $0x1828] sm:$0xff] }
 0x309   :  { %4121 = vmatprep.subr.mxu1 %v1620_v31  ;;  %4090 = vmatprep.subr.mxu0 %v1314_v32  ;;  %v1224_v31 = vld [vmem:[#allocation10 + $0xe98] sm:$0xff]  ;;  %v2044_v32 = vpop.f32.mrf.mxu0 }
 0x30a   :  { %4122 = vmatpush3.msra.mxu1 %v1476_v34  ;;  %3032 = vmatprep.mubr.f32.mxu1 %v5551_v12  ;;  %v1584_v12 = vld [vmem:[#allocation10 + $0x19d8] sm:$0xff]  ;;  %v5606_v34 = vpop.f32.mrf.mxu1 }
 0x30b   :  { %4091 = vmatpush3.msra.mxu0 %v1170_v61  ;;  %4123 = vmatprep.subr.mxu1 %v1611_v35  ;;  %v1386_v61 = vld [vmem:[#allocation10 + $0x13a8] sm:$0xff]  ;;  %v1080_v35 = vld [vmem:[#allocation10 + $0xa18] sm:$0xff] }
 0x30c   :  { %4092 = vmatprep.subr.mxu0 %v1305_v36  ;;  %4124 = vmatpush3.msra.mxu1 %v1467_v37  ;;  %v1658_v36 = vrot.slane %v5595_v11, %v421_v43  ;;  %v1521_v37 = vld [vmem:[#allocation10 + $0x17e0] sm:$0xff]  ;;  %v1368_v43 = vld [vmem:[#allocation10 + $0x1318] sm:$0xff] }
 0x30d   :  { %4093 = vmatpush3.msra.mxu0 %v1161_v44  ;;  %4125 = vmatprep.subr.mxu1 %v1602_v45  ;;  %v1215_v44 = vld [vmem:[#allocation10 + $0xe50] sm:$0xff]  ;;  %v5611_v45 = vpop.f32.mrf.mxu0 }
 0x30e   :  { %4094 = vmatprep.subr.mxu0 %v1296_v62  ;;  %4126 = vmatpush3.msra.mxu1 %v1458_v47  ;;  %v1377_v62 = vld [vmem:[#allocation10 + $0x1360] sm:$0xff]  ;;  %v1071_v47 = vld [vmem:[#allocation10 + $0x9d0] sm:$0xff] }
 0x30f   :  { %4095 = vmatpush3.msra.mxu0 %v1152_v2  ;;  %4127 = vmatprep.subr.mxu1 %v1593_v48  ;;  %v1832_v2 = vadd.f32 %v5591_v55, %v1761_v42  ;;  %v1512_v48 = vld [vmem:[#allocation10 + $0x1798] sm:$0xff]  ;;  %v1053_v55 = vld [vmem:[#allocation10 + $0x940] sm:$0xff] }
 0x310   :  { %4096 = vmatprep.subr.mxu0 %v1287_v49  ;;  %4128 = vmatpush3.msra.mxu1 %v1449_v50  ;;  %v1206_v49 = vld [vmem:[#allocation10 + $0xe08] sm:$0xff]  ;;  %v2115_v50 = vpop.f32.mrf.mxu1  ;;  %v3148_v42 = vld [vmem:[%s6168_s7 + $0x68] sm:$0xff] }
 0x311   :  { %4097 = vmatpush3.msra.mxu0 %v1143_v51  ;;  %4129 = vmatprep.subr.mxu1 %v1584_v12  ;;  %v1062_v51 = vld [vmem:[#allocation10 + $0x988] sm:$0xff]  ;;  %v1903_v12 = vadd.f32 %v1902_v25, %v1832_v2  ;;  %v3161_v2 = vld [vmem:[%s6168_s7 + $0xd0] sm:$0xff] }
 0x312   :  { %4098 = vmatprep.subr.mxu0 %v1278_v52  ;;  %4130 = vmatpush3.msra.mxu1 %v1440_v57  ;;  %v2045_v52 = vadd.f32 %v2044_v32, %v1658_v36  ;;  %v1503_v57 = vld [vmem:[#allocation10 + $0x1750] sm:$0xff]  ;;  %v3180_v36 = vld [vmem:[%s6168_s7 + $0x168] sm:$0xff] }
 0x313   :  { %4099 = vmatpush3.msra.mxu0 %v1134_v58  ;;  %4131 = vmatprep.subr.mxu1 %v1575_v59  ;;  %v1197_v58 = vld [vmem:[#allocation10 + $0xdc0] sm:$0xff]  ;;  %v2186_v59 = vpop.f32.mrf.mxu0  ;;  %v1974_v6 = vadd.f32 %v5597_v14, %v1903_v12  ;;  %v3166_v14 = vld [vmem:[%s6168_s7 + $0xf8] sm:$0xff]  ;;  %v3163_v32 = vld [vmem:[%s6168_s7 + $0xe0] sm:$0xff] }
 0x314   :  { %4100 = vmatprep.subr.mxu0 %v1269_v60  ;;  %4132 = vmatpush3.msra.mxu1 %v1431_v1  ;;  %v1359_v60 = vld [vmem:[#allocation10 + $0x12d0] sm:$0xff]  ;;  %v2116_v1 = vadd.f32 %v2115_v50, %v2045_v52  ;;  %v3178_v50 = vld [vmem:[%s6168_s7 + $0x158] sm:$0xff]  ;;  %v3193_v12 = vld [vmem:[%s6168_s7 + $0x1d0] sm:$0xff] }
 0x315   :  { %4101 = vmatpush3.msra.mxu0 %v1125_v41  ;;  %4133 = vmatprep.subr.mxu1 %v1566_v4  ;;  %v1494_v41 = vld [vmem:[#allocation10 + $0x1708] sm:$0xff]  ;;  %v5614_v4 = vpop.f32.mrf.mxu1  ;;  %vm3109_vm9 = vcmp.ge.f32.partialorder %v1974_v6, 0.0  ;;  %v3144_v52 = vld [vmem:[%s6168_s7 + $0x48] sm:$0xff] }
 0x316   :  { %4102 = vmatprep.subr.mxu0 %v1260_v5  ;;  %4134 = vmatpush3.msra.mxu1 %v1422_v7  ;;  %v1350_v5 = vld [vmem:[#allocation10 + $0x1288] sm:$0xff]  ;;  %v2187_v7 = vadd.f32 %v2186_v59, %v2116_v1  ;;  %v3143_v59 = vld [vmem:[%s6168_s7 + $0x40] sm:$0xff]  ;;  %v1654_v1 = vrot.slane %v5595_v11, %v417_v40 }
 0x317   :  { %4103 = vmatpush3.msra.mxu0 %v1116_v8  ;;  %4135 = vmatprep.subr.mxu1 %v1557_v9  ;;  %v1485_v8 = vld [vmem:[#allocation10 + $0x16c0] sm:$0xff]  ;;  %v1638_v9 = vld [vmem:[#allocation10 + $0x1b88] sm:$0xff]  ;;  %v3175_v40 = vld [vmem:[%s6168_s7 + $0x140] sm:$0xff] }
 0x318   :  { %4104 = vmatprep.subr.mxu0 %v1251_v10  ;;  %4136 = vmatpush3.msra.mxu1 %v1413_v16  ;;  %v1341_v10 = vld [vmem:[#allocation10 + $0x1240] sm:$0xff] }
 0x319   :  { %4105 = vmatpush3.msra.mxu0 %v1107_v56  ;;  %4137 = vmatprep.subr.mxu1 %v1548_v18  ;;  %v1629_v16 = vld [vmem:[#allocation10 + $0x1b40] sm:$0xff]  ;;  %v2257_v56 = vpop.f32.mrf.mxu1  ;;  %v3118_v18 = vmul.f32 0.01, %v1974_v6 }
 0x31a   :  { %4106 = vmatprep.subr.mxu0 %v1242_v19  ;;  %4138 = vmatpush3.msra.mxu1 %v1404_v21  ;;  %v2258_v17 = vadd.f32 %v2257_v56, %v2187_v7  ;;  %v3150_v19 = vld [vmem:[%s6168_s7 + $0x78] sm:$0xff]  ;;  %v3156_v56 = vld [vmem:[%s6168_s7 + $0xa8] sm:$0xff] }
 0x31b   :  { %4107 = vmatpush3.msra.mxu0 %v1098_v22  ;;  %4139 = vmatprep.subr.mxu1 %v1539_v23  ;;  %v3198_v21 = vld [vmem:[%s6168_s7 + $0x1f8] sm:$0xff]  ;;  %v3127_v22 = vsel %vm3109_vm9, %v1974_v6, %v3118_v18  ;;  %v3279_v23 = vld [vmem:[#allocation5] sm:$0x3]  ;;  %v3157_v6 = vld [vmem:[%s6168_s7 + $0xb0] sm:$0xff]  ;;  %vm3904_vm9 = vcmask 261120  }
 0x31c   :  { %4108 = vmatprep.subr.mxu0 %v1233_v24  ;;  %4140 = vmatpush3.msra.mxu1 %v1395_v26  ;;  %v3149_v24 = vld [vmem:[%s6168_s7 + $0x70] sm:$0xff]  ;;  %v3120_v25 = vmul.f32 0.01, %v2258_v17  ;;  %v3164_v26 = vld [vmem:[%s6168_s7 + $0xe8] sm:$0xff]  ;;  %vm3111_vm12 = vcmp.ge.f32.partialorder %v2258_v17, 0.0  ;;  %v3190_v7 = vld [vmem:[%s6168_s7 + $0x1b8] sm:$0xff] }
 0x31d   :  { %4109 = vmatpush3.msra.mxu0 %v1089_v27  ;;  %4141 = vmatprep.subr.mxu1 %v1530_v28  ;;  %v3197_v27 = vld [vmem:[%s6168_s7 + $0x1f0] sm:$0xff] }
 0x31e   :  { %4110 = vmatprep.subr.mxu0 %v1224_v31  ;;  %4142 = vmatpush3.msra.mxu1 %v1386_v61  ;;  %v3181_v28 = vld [vmem:[%s6168_s7 + $0x170] sm:$0xff]  ;;  %v3129_v31 = vsel %vm3111_vm12, %v2258_v17, %v3120_v25  ;;  %v3196_v61 = vld [vmem:[%s6168_s7 + $0x1e8] sm:$0xff] }
 0x31f   :  { %4111 = vmatpush3.msra.mxu0 %v1080_v35  ;;  %4143 = vmatprep.subr.mxu1 %v1521_v37  ;;  %v3147_v35 = vld [vmem:[%s6168_s7 + $0x60] sm:$0xff]  ;;  %v3162_v37 = vld [vmem:[%s6168_s7 + $0xd8] sm:$0xff]  ;;  %v3189_v17 = vld [vmem:[%s6168_s7 + $0x1b0] sm:$0xff] }
 0x320   :  { %4112 = vmatprep.subr.mxu0 %v1215_v44  ;;  %4144 = vmatpush3.msra.mxu1 %v1377_v62  ;;  %v3195_v44 = vld [vmem:[%s6168_s7 + $0x1e0] sm:$0xff]  ;;  %v3146_v62 = vld [vmem:[%s6168_s7 + $0x58] sm:$0xff]  ;;  %v3153_v25 = vld [vmem:[%s6168_s7 + $0x90] sm:$0xff] }
 0x321   :  { %4113 = vmatpush3.msra.mxu0 %v1071_v47  ;;  %4145 = vmatprep.subr.mxu1 %v1512_v48  ;;  %v3179_v47 = vld [vmem:[%s6168_s7 + $0x160] sm:$0xff]  ;;  %v3194_v48 = vld [vmem:[%s6168_s7 + $0x1d8] sm:$0xff] }
 0x322   :  { %4114 = vmatprep.subr.mxu0 %v1206_v49  ;;  %4146 = vmatpush3.msra.mxu1 %v1368_v43  ;;  %v3145_v49 = vld [vmem:[%s6168_s7 + $0x50] sm:$0xff]  ;;  %v1646_v43 = vrot.slane %v5595_v11, %v409_v39 }
 0x323   :  { %4115 = vmatpush3.msra.mxu0 %v1062_v51  ;;  %4147 = vmatprep.subr.mxu1 %v1503_v57  ;;  %v3160_v51 = vld [vmem:[%s6168_s7 + $0xc8] sm:$0xff]  ;;  %v3177_v39 = vld [vmem:[%s6168_s7 + $0x150] sm:$0xff]  ;;  %v3159_v57 = vld [vmem:[%s6168_s7 + $0xc0] sm:$0xff] }
 0x324   :  { %4116 = vmatprep.subr.mxu0 %v1197_v58  ;;  %4148 = vmatpush3.msra.mxu1 %v1359_v60  ;;  %v3192_v58 = vld [vmem:[%s6168_s7 + $0x1c8] sm:$0xff] }
 0x325   :  { %4117 = vmatpush3.msra.mxu0 %v1053_v55  ;;  %4149 = vmatprep.subr.mxu1 %v1494_v41  ;;  %v3176_v60 = vld [vmem:[%s6168_s7 + $0x148] sm:$0xff]  ;;  %v1759_v55 = vadd.f32 %v5589_v53, %v1646_v43  ;;  %v3158_v41 = vld [vmem:[%s6168_s7 + $0xb8] sm:$0xff] }
 0x326   :  { %2963 = vmatmul.mubr.f32.vlgmr.msra.gmra.mxu0 %v5527_v3  ;;  %4150 = vmatpush3.msra.mxu1 %v1350_v5  ;;  %v3280_v3 = vld [vmem:[#allocation13] sm:$0xf]  ;;  %v3191_v5 = vld [vmem:[%s6168_s7 + $0x1c0] sm:$0xff]  ;;  %v3142_v53 = vld [vmem:[%s6168_s7 + $0x38] sm:$0xff] }
 0x327   :  { %4334 = vmatprep.subr.mxu0 %v4699_v13  ;;  %4151 = vmatprep.subr.mxu1 %v1485_v8  ;;  %v3141_v8 = vld [vmem:[%s6168_s7 + $0x30] sm:$0xff]  ;;  %v3262_v43 = vld [vmem:[%s6168_s7 + $0x3f8] sm:$0xff] }
 0x328   :  { %4335 = vmatpush3.msra.mxu0 %v1638_v9  ;;  %4152 = vmatpush3.msra.mxu1 %v1341_v10  ;;  %v3174_v9 = vld [vmem:[%s6168_s7 + $0x138] sm:$0xff]  ;;  %v1830_v10 = vadd.f32 %v5587_v46, %v1759_v55  ;;  %v3173_v46 = vld [vmem:[%s6168_s7 + $0x130] sm:$0xff]  ;;  %v3260_v55 = vld [vmem:[%s6168_s7 + $0x3e8] sm:$0xff] }
 0x329   :  { %4336 = vmatprep.subr.mxu0 %v4699_v13  ;;  %3033 = vmatmul.mubr.f32.vlgmr.msra.gmra.mxu1 %v5553_v63  ;;  %v3165_v63 = vld [vmem:[%s6168_s7 + $0xf0] sm:$0xff] }
 0x32a   :  { %4337 = vmatpush3.msra.mxu0 %v1629_v16  ;;  %4338 = vmatprep.mubr.msk.f32.mxu0 %vm4700_vm10, %v4699_v13  ;;  %v2043_v16 = vadd.f32 %v5604_v20, %v1654_v1  ;;  %v1901_v20 = vadd.f32 %v5599_v15, %v1830_v10  ;;  %v3172_v15 = vld [vmem:[%s6168_s7 + $0x128] sm:$0xff]  ;;  %v3211_v1 = vld [vmem:[%s6168_s7 + $0x260] sm:$0xff] }
 0x32b   :  { %4341 = vmatprep.subr.mxu1 %v4699_v13  ;;  %4339 = vmatmul.mubr.msk.f32.vlgmr.msra.gmra.mxu0 %vm1688_vm5, %v5538_v54  ;;  %v3182_v54 = vld [vmem:[%s6168_s7 + $0x178] sm:$0xff] }
 0x32c   :  { %4161 = vmatprep.subr.mxu0 %v3166_v14  ;;  %4342 = vmatpush3.msk.msra.mxu1 %vm3285_vm8, %v3280_v3  ;;  %v3140_v14 = vld [vmem:[%s6168_s7 + $0x28] sm:$0xff]  ;;  %v2114_v18 = vadd.f32 %v5606_v34, %v2043_v16  ;;  %v3155_v3 = vld [vmem:[%s6168_s7 + $0xa0] sm:$0xff]  ;;  %v3209_v16 = vld [vmem:[%s6168_s7 + $0x250] sm:$0xff] }
 0x32d   :  { %4162 = vmatpush3.msra.mxu0 %v3150_v19  ;;  %3423 = vmatprep.mubr.f32.mxu0 %v3127_v22  ;;  %v3188_v19 = vld [vmem:[%s6168_s7 + $0x1a8] sm:$0xff]  ;;  %v3187_v22 = vld [vmem:[%s6168_s7 + $0x1a0] sm:$0xff] }
 0x32e   :  { %4343 = vmatprep.mubr.msk.f32.mxu1 %vm4700_vm10, %v4699_v13  ;;  %4163 = vmatprep.subr.mxu0 %v3165_v63  ;;  %v3139_v63 = vld [vmem:[%s6168_s7 + $0x20] sm:$0xff]  ;;  %v2185_v34 = vadd.f32 %v5611_v45, %v2114_v18  ;;  %v1662_v18 = vrot.slane %v5595_v11, %v425_v30 }
 0x32f   :  { %4196 = vmatprep.subr.mxu1 %v3198_v21  ;;  %4344 = vmatmul.mubr.msk.f32.vlgmr.msra.gmra.mxu1 %vm3281_vm11, %v3279_v23  ;;  %v3154_v21 = vld [vmem:[%s6168_s7 + $0x98] sm:$0xff]  ;;  %v3171_v45 = vld [vmem:[%s6168_s7 + $0x120] sm:$0xff] }
 0x330   :  { %4164 = vmatpush3.msra.mxu0 %v3149_v24  ;;  %4197 = vmatpush3.msra.mxu1 %v3182_v54  ;;  %v3138_v23 = vld [vmem:[%s6168_s7 + $0x18] sm:$0xff]  ;;  %v1972_v24 = vadd.f32 %v5593_v0, %v1901_v20  ;;  %v3241_v20 = vld [vmem:[%s6168_s7 + $0x350] sm:$0xff]  ;;  %v3207_v30 = vld [vmem:[%s6168_s7 + $0x240] sm:$0xff] }
 0x331   :  { %4165 = vmatprep.subr.mxu0 %v3164_v26  ;;  %4198 = vmatprep.subr.mxu1 %v3197_v27  ;;  %v3186_v54 = vld [vmem:[%s6168_s7 + $0x198] sm:$0xff]  ;;  %v3137_v26 = vld [vmem:[%s6168_s7 + $0x10] sm:$0xff]  ;;  %v2256_v27 = vadd.f32 %v5614_v4, %v2185_v34 }
 0x332   :  { %3493 = vmatprep.mubr.f32.mxu1 %v3129_v31  ;;  %4166 = vmatpush3.msra.mxu0 %v3148_v42  ;;  %v3170_v0 = vld [vmem:[%s6168_s7 + $0x118] sm:$0xff]  ;;  %v3152_v42 = vld [vmem:[%s6168_s7 + $0x88] sm:$0xff]  ;;  %v3169_v4 = vld [vmem:[%s6168_s7 + $0x110] sm:$0xff]  ;;  %vm3108_vm13 = vcmp.ge.f32.partialorder %v1972_v24, 0.0 }
 0x333   :  { %4199 = vmatpush3.msra.mxu1 %v3181_v28  ;;  %4167 = vmatprep.subr.mxu0 %v3163_v32  ;;  %v3185_v28 = vld [vmem:[%s6168_s7 + $0x190] sm:$0xff]  ;;  %v3136_v31 = vld [vmem:[%s6168_s7 + $0x8] sm:$0xff]  ;;  %v3117_v32 = vmul.f32 0.01, %v1972_v24  ;;  %vm3110_vm14 = vcmp.ge.f32.partialorder %v2256_v27, 0.0 }
 0x334   :  { %4200 = vmatprep.subr.mxu1 %v3196_v61  ;;  %4168 = vmatpush3.msra.mxu0 %v3147_v35  ;;  %v3151_v61 = vld [vmem:[%s6168_s7 + $0x80] sm:$0xff]  ;;  %v3184_v35 = vld [vmem:[%s6168_s7 + $0x188] sm:$0xff] }
 0x335   :  { %4201 = vmatpush3.msra.mxu1 %v3180_v36  ;;  %4169 = vmatprep.subr.mxu0 %v3162_v37  ;;  %v3135_v36 = vld [vmem:[%s6168_s7] sm:$0xff]  ;;  %v3168_v37 = vld [vmem:[%s6168_s7 + $0x108] sm:$0xff] }
 0x336   :  { %4202 = vmatprep.subr.mxu1 %v3195_v44  ;;  %4170 = vmatpush3.msra.mxu0 %v3146_v62  ;;  %v3119_v44 = vmul.f32 0.01, %v2256_v27  ;;  %v3183_v62 = vld [vmem:[%s6168_s7 + $0x180] sm:$0xff] }
 0x337   :  { %4203 = vmatpush3.msra.mxu1 %v3179_v47  ;;  %4171 = vmatprep.subr.mxu0 %v3161_v2  ;;  %v3167_v47 = vld [vmem:[%s6168_s7 + $0x100] sm:$0xff]  ;;  %v3230_v2 = vld [vmem:[%s6168_s7 + $0x2f8] sm:$0xff] }
 0x338   :  { %4204 = vmatprep.subr.mxu1 %v3194_v48  ;;  %4172 = vmatpush3.msra.mxu0 %v3145_v49  ;;  %v3126_v48 = vsel %vm3108_vm13, %v1972_v24, %v3117_v32  ;;  %v3214_v49 = vld [vmem:[%s6168_s7 + $0x278] sm:$0xff]  ;;  %v3220_v32 = vld [vmem:[%s6168_s7 + $0x2a8] sm:$0xff] }
 0x339   :  { %4205 = vmatpush3.msra.mxu1 %v3178_v50  ;;  %4173 = vmatprep.subr.mxu0 %v3160_v51  ;;  %v3229_v50 = vld [vmem:[%s6168_s7 + $0x2f0] sm:$0xff]  ;;  %v3128_v51 = vsel %vm3110_vm14, %v2256_v27, %v3119_v44 }
 0x33a   :  { %4206 = vmatprep.subr.mxu1 %v3193_v12  ;;  %4174 = vmatpush3.msra.mxu0 %v3144_v52  ;;  %v3213_v12 = vld [vmem:[%s6168_s7 + $0x270] sm:$0xff]  ;;  %v3246_v52 = vld [vmem:[%s6168_s7 + $0x378] sm:$0xff]  ;;  %v2397_v10 = vpop.f32.mrf.mxu0 }
 0x33b   :  { %4207 = vmatpush3.msra.mxu1 %v3177_v39  ;;  %4175 = vmatprep.subr.mxu0 %v3159_v57  ;;  %v3228_v39 = vld [vmem:[%s6168_s7 + $0x2e8] sm:$0xff]  ;;  %v3261_v57 = vld [vmem:[%s6168_s7 + $0x3f0] sm:$0xff] }
 0x33c   :  { %4208 = vmatprep.subr.mxu1 %v3192_v58  ;;  %4176 = vmatpush3.msra.mxu0 %v3143_v59  ;;  %v3212_v58 = vld [vmem:[%s6168_s7 + $0x268] sm:$0xff]  ;;  %v3245_v59 = vld [vmem:[%s6168_s7 + $0x370] sm:$0xff]  ;;  %v2399_v34 = vpop.f32.mrf.mxu0 }
 0x33d   :  { %4209 = vmatpush3.msra.mxu1 %v3176_v60  ;;  %4177 = vmatprep.subr.mxu0 %v3158_v41  ;;  %v3227_v60 = vld [vmem:[%s6168_s7 + $0x2e0] sm:$0xff]  ;;  %v3244_v41 = vld [vmem:[%s6168_s7 + $0x368] sm:$0xff]  ;;  %v3205_v27 = vld [vmem:[%s6168_s7 + $0x230] sm:$0xff] }
 0x33e   :  { %4210 = vmatprep.subr.mxu1 %v3191_v5  ;;  %4178 = vmatpush3.msra.mxu0 %v3142_v53  ;;  %v3226_v5 = vld [vmem:[%s6168_s7 + $0x2d8] sm:$0xff]  ;;  %v3259_v53 = vld [vmem:[%s6168_s7 + $0x3e0] sm:$0xff] }
 0x33f   :  { %4211 = vmatpush3.msra.mxu1 %v3175_v40  ;;  %4179 = vmatprep.subr.mxu0 %v3157_v6  ;;  %v3210_v40 = vld [vmem:[%s6168_s7 + $0x258] sm:$0xff]  ;;  %v3243_v6 = vld [vmem:[%s6168_s7 + $0x360] sm:$0xff] }
 0x340   :  { %4212 = vmatprep.subr.mxu1 %v3190_v7  ;;  %4180 = vmatpush3.msra.mxu0 %v3141_v8  ;;  %v3225_v7 = vld [vmem:[%s6168_s7 + $0x2d0] sm:$0xff]  ;;  %v3258_v8 = vld [vmem:[%s6168_s7 + $0x3d8] sm:$0xff] }
 0x341   :  { %4213 = vmatpush3.msra.mxu1 %v3174_v9  ;;  %4181 = vmatprep.subr.mxu0 %v3156_v56  ;;  %v2326_v9 = vpop.f32.mrf.mxu1  ;;  %v3242_v56 = vld [vmem:[%s6168_s7 + $0x358] sm:$0xff] }
 0x342   :  { %4214 = vmatprep.subr.mxu1 %v3189_v17  ;;  %4182 = vmatpush3.msra.mxu0 %v3140_v14  ;;  %v3224_v17 = vld [vmem:[%s6168_s7 + $0x2c8] sm:$0xff]  ;;  %v3257_v14 = vld [vmem:[%s6168_s7 + $0x3d0] sm:$0xff]  ;;  %v2327_v24 = vadd.f32 %v2326_v9, %v1662_v18  ;;  %v3199_v9 = vld [vmem:[%s6168_s7 + $0x200] sm:$0xff] }
 0x343   :  { %4215 = vmatpush3.msra.mxu1 %v3173_v46  ;;  %4183 = vmatprep.subr.mxu0 %v3155_v3  ;;  %v3208_v46 = vld [vmem:[%s6168_s7 + $0x248] sm:$0xff]  ;;  %v1666_v3 = vrot.slane %v5595_v11, %v429_v33 }
 0x344   :  { %4216 = vmatprep.subr.mxu1 %v3188_v19  ;;  %4184 = vmatpush3.msra.mxu0 %v3139_v63  ;;  %v3223_v19 = vld [vmem:[%s6168_s7 + $0x2c0] sm:$0xff]  ;;  %v3256_v63 = vld [vmem:[%s6168_s7 + $0x3c8] sm:$0xff] }
 0x345   :  { %4217 = vmatpush3.msra.mxu1 %v3172_v15  ;;  %4185 = vmatprep.subr.mxu0 %v3154_v21  ;;  %v2328_v15 = vpop.f32.mrf.mxu1  ;;  %v3240_v33 = vld [vmem:[%s6168_s7 + $0x348] sm:$0xff]  ;;  %v3222_v21 = vld [vmem:[%s6168_s7 + $0x2b8] sm:$0xff] }
 0x346   :  { %4218 = vmatprep.subr.mxu1 %v3187_v22  ;;  %4186 = vmatpush3.msra.mxu0 %v3138_v23  ;;  %v3255_v22 = vld [vmem:[%s6168_s7 + $0x3c0] sm:$0xff]  ;;  %v3206_v23 = vld [vmem:[%s6168_s7 + $0x238] sm:$0xff]  ;;  %v3276_v18 = vld [vmem:[%s6168_s7 + $0x468] sm:$0xff] }
 0x347   :  { %4219 = vmatpush3.msra.mxu1 %v3171_v45  ;;  %4187 = vmatprep.subr.mxu0 %v3153_v25  ;;  %v3239_v45 = vld [vmem:[%s6168_s7 + $0x340] sm:$0xff]  ;;  %v2329_v25 = vadd.f32 %v2328_v15, %v1666_v3  ;;  %v3272_v15 = vld [vmem:[%s6168_s7 + $0x448] sm:$0xff] }
 0x348   :  { %4220 = vmatprep.subr.mxu1 %v3186_v54  ;;  %4188 = vmatpush3.msra.mxu0 %v3137_v26  ;;  %v3221_v54 = vld [vmem:[%s6168_s7 + $0x2b0] sm:$0xff]  ;;  %v3254_v26 = vld [vmem:[%s6168_s7 + $0x3b8] sm:$0xff]  ;;  %v3275_v3 = vld [vmem:[%s6168_s7 + $0x460] sm:$0xff] }
 0x349   :  { %4221 = vmatpush3.msra.mxu1 %v3170_v0  ;;  %4189 = vmatprep.subr.mxu0 %v3152_v42  ;;  %v2539_v0 = vpop.f32.mrf.mxu0 }
 0x34a   :  { %4222 = vmatprep.subr.mxu1 %v3185_v28  ;;  %4190 = vmatpush3.msra.mxu0 %v3136_v31  ;;  %v3238_v28 = vld [vmem:[%s6168_s7 + $0x338] sm:$0xff]  ;;  %v2398_v31 = vadd.f32 %v2397_v10, %v2327_v24  ;;  %v3248_v10 = vld [vmem:[%s6168_s7 + $0x388] sm:$0xff] }
 0x34b   :  { %4223 = vmatpush3.msra.mxu1 %v3169_v4  ;;  %4191 = vmatprep.subr.mxu0 %v3151_v61  ;;  %v2400_v4 = vadd.f32 %v2399_v34, %v2329_v25  ;;  %v3253_v61 = vld [vmem:[%s6168_s7 + $0x3b0] sm:$0xff]  ;;  %v3271_v34 = vld [vmem:[%s6168_s7 + $0x440] sm:$0xff]  ;;  %v3264_v24 = vld [vmem:[%s6168_s7 + $0x408] sm:$0xff] }
 0x34c   :  { %4224 = vmatprep.subr.mxu1 %v3184_v35  ;;  %4192 = vmatpush3.msra.mxu0 %v3135_v36  ;;  %v3204_v35 = vld [vmem:[%s6168_s7 + $0x228] sm:$0xff]  ;;  %v3263_v25 = vld [vmem:[%s6168_s7 + $0x400] sm:$0xff] }
 0x34d   :  { %4225 = vmatpush3.msra.mxu1 %v3168_v37  ;;  %3424 = vmatmul.mubr.f32.vlgmr.msra.gmra.mxu0 %v3126_v48  ;;  %v3237_v37 = vld [vmem:[%s6168_s7 + $0x330] sm:$0xff]  ;;  %v2541_v48 = vpop.f32.mrf.mxu0 }
 0x34e   :  { %4226 = vmatprep.subr.mxu1 %v3183_v62  ;;  %4231 = vmatprep.subr.mxu0 %v3230_v2  ;;  %v3219_v62 = vld [vmem:[%s6168_s7 + $0x2a0] sm:$0xff]  ;;  %v3252_v2 = vld [vmem:[%s6168_s7 + $0x3a8] sm:$0xff] }
 0x34f   :  { %4227 = vmatpush3.msra.mxu1 %v3167_v47  ;;  %4232 = vmatpush3.msra.mxu0 %v3214_v49  ;;  %v3203_v49 = vld [vmem:[%s6168_s7 + $0x220] sm:$0xff] }
 0x350   :  { %3494 = vmatmul.mubr.f32.vlgmr.msra.gmra.mxu1 %v3128_v51  ;;  %4233 = vmatprep.subr.mxu0 %v3229_v50  ;;  %v3236_v50 = vld [vmem:[%s6168_s7 + $0x328] sm:$0xff]  ;;  %v3218_v51 = vld [vmem:[%s6168_s7 + $0x298] sm:$0xff] }
 0x351   :  { %4266 = vmatprep.subr.mxu1 %v3262_v43  ;;  %4234 = vmatpush3.msra.mxu0 %v3213_v12  ;;  %v3251_v12 = vld [vmem:[%s6168_s7 + $0x3a0] sm:$0xff] }
 0x352   :  { %4267 = vmatpush3.msra.mxu1 %v3246_v52  ;;  %4235 = vmatprep.subr.mxu0 %v3228_v39  ;;  %v3202_v52 = vld [vmem:[%s6168_s7 + $0x218] sm:$0xff]  ;;  %v3235_v39 = vld [vmem:[%s6168_s7 + $0x320] sm:$0xff] }
 0x353   :  { %4268 = vmatprep.subr.mxu1 %v3261_v57  ;;  %4236 = vmatpush3.msra.mxu0 %v3212_v58  ;;  %v3217_v58 = vld [vmem:[%s6168_s7 + $0x290] sm:$0xff] }
 0x354   :  { %4269 = vmatpush3.msra.mxu1 %v3245_v59  ;;  %4237 = vmatprep.subr.mxu0 %v3227_v60  ;;  %v3201_v60 = vld [vmem:[%s6168_s7 + $0x210] sm:$0xff] }
 0x355   :  { %4270 = vmatprep.subr.mxu1 %v3260_v55  ;;  %4238 = vmatpush3.msra.mxu0 %v3211_v1  ;;  %v3250_v55 = vld [vmem:[%s6168_s7 + $0x398] sm:$0xff]  ;;  %v3216_v1 = vld [vmem:[%s6168_s7 + $0x288] sm:$0xff] }
 0x356   :  { %4271 = vmatpush3.msra.mxu1 %v3244_v41  ;;  %4239 = vmatprep.subr.mxu0 %v3226_v5  ;;  %v3234_v5 = vld [vmem:[%s6168_s7 + $0x318] sm:$0xff] }
 0x357   :  { %4272 = vmatprep.subr.mxu1 %v3259_v53  ;;  %4240 = vmatpush3.msra.mxu0 %v3210_v40  ;;  %v3200_v53 = vld [vmem:[%s6168_s7 + $0x208] sm:$0xff]  ;;  %v3249_v40 = vld [vmem:[%s6168_s7 + $0x390] sm:$0xff] }
 0x358   :  { %4273 = vmatpush3.msra.mxu1 %v3243_v6  ;;  %4241 = vmatprep.subr.mxu0 %v3225_v7  ;;  %v3215_v7 = vld [vmem:[%s6168_s7 + $0x280] sm:$0xff] }
 0x359   :  { %4274 = vmatprep.subr.mxu1 %v3258_v8  ;;  %4242 = vmatpush3.msra.mxu0 %v3209_v16  ;;  %v3233_v8 = vld [vmem:[%s6168_s7 + $0x310] sm:$0xff]  ;;  %v3232_v16 = vld [vmem:[%s6168_s7 + $0x308] sm:$0xff] }
 0x35a   :  { %4275 = vmatpush3.msra.mxu1 %v3242_v56  ;;  %4243 = vmatprep.subr.mxu0 %v3224_v17  ;;  %v3247_v56 = vld [vmem:[%s6168_s7 + $0x380] sm:$0xff] }
 0x35b   :  { %4276 = vmatprep.subr.mxu1 %v3257_v14  ;;  %4244 = vmatpush3.msra.mxu0 %v3208_v46  ;;  %v3231_v14 = vld [vmem:[%s6168_s7 + $0x300] sm:$0xff]  ;;  %v3278_v46 = vld [vmem:[%s6168_s7 + $0x478] sm:$0xff] }
 0x35c   :  { %4277 = vmatpush3.msra.mxu1 %v3241_v20  ;;  %4245 = vmatprep.subr.mxu0 %v3223_v19  ;;  %v3277_v20 = vld [vmem:[%s6168_s7 + $0x470] sm:$0xff]  ;;  %v3274_v19 = vld [vmem:[%s6168_s7 + $0x458] sm:$0xff] }
 0x35d   :  { %4278 = vmatprep.subr.mxu1 %v3256_v63  ;;  %4246 = vmatpush3.msra.mxu0 %v3207_v30  ;;  %v3273_v63 = vld [vmem:[%s6168_s7 + $0x450] sm:$0xff]  ;;  %v3270_v30 = vld [vmem:[%s6168_s7 + $0x438] sm:$0xff] }
 0x35e   :  { %4279 = vmatpush3.msra.mxu1 %v3240_v33  ;;  %4247 = vmatprep.subr.mxu0 %v3222_v21  ;;  %v3269_v33 = vld [vmem:[%s6168_s7 + $0x430] sm:$0xff]  ;;  %v3268_v21 = vld [vmem:[%s6168_s7 + $0x428] sm:$0xff] }
 0x35f   :  { %v2468_v42 = vpop.f32.mrf.mxu1  ;;  %4280 = vmatprep.subr.mxu1 %v3255_v22  ;;  %4248 = vmatpush3.msra.mxu0 %v3206_v23  ;;  %v3267_v22 = vld [vmem:[%s6168_s7 + $0x420] sm:$0xff]  ;;  %v3266_v23 = vld [vmem:[%s6168_s7 + $0x418] sm:$0xff] }
 0x360   :  { %4281 = vmatpush3.msra.mxu1 %v3239_v45  ;;  %4249 = vmatprep.subr.mxu0 %v3221_v54  ;;  %v2469_v44 = vadd.f32 %v2468_v42, %v2398_v31  ;;  %v3265_v45 = vld [vmem:[%s6168_s7 + $0x410] sm:$0xff]  ;;  %v1673_v54 = vsub.s32 7, %v5501_v38 }
 0x361   :  { %v2470_v36 = vpop.f32.mrf.mxu1  ;;  %4282 = vmatprep.subr.mxu1 %v3254_v26  ;;  %4250 = vmatpush3.msra.mxu0 %v3205_v27  ;;  %v1670_v27 = vrot.slane %v5595_v11, %v433_v29 }
 0x362   :  { %v2471_v47 = vadd.f32 %v2470_v36, %v2400_v4  ;;  %4283 = vmatpush3.msra.mxu1 %v3238_v28  ;;  %4251 = vmatprep.subr.mxu0 %v3220_v32  ;;  %v2540_v57 = vadd.f32 %v2539_v0, %v2469_v44  ;;  %v1674_v42 = vrot.slane %v5595_v11, %v1673_v54  ;;  %v3710_v11 = vld [vmem:[#allocation14] sm:$0x3] }
 0x363   :  { %4284 = vmatprep.subr.mxu1 %v3253_v61  ;;  %4252 = vmatpush3.msra.mxu0 %v3204_v35 }
 0x364   :  { %v2542_v43 = vadd.f32 %v2541_v48, %v2471_v47  ;;  %4285 = vmatpush3.msra.mxu1 %v3237_v37  ;;  %4253 = vmatprep.subr.mxu0 %v3219_v62  ;;  %v3121_v6 = vmul.f32 0.01, %v2540_v57  ;;  %vm3112_vm0 = vcmp.ge.f32.partialorder %v2540_v57, 0.0 }
 0x365   :  { %4286 = vmatprep.subr.mxu1 %v3252_v2  ;;  %4254 = vmatpush3.msra.mxu0 %v3203_v49 }
 0x366   :  { %vm3113_vm15 = vcmp.ge.f32.partialorder %v2542_v43, 0.0  ;;  %v3122_v59 = vmul.f32 0.01, %v2542_v43  ;;  %4287 = vmatpush3.msra.mxu1 %v3236_v50  ;;  %4255 = vmatprep.subr.mxu0 %v3218_v51  ;;  %v3130_v17 = vsel %vm3112_vm0, %v2540_v57, %v3121_v6  ;;  %v3709_v51 = vld [vmem:[#allocation7] sm:$0x3] }
 0x367   :  { %4288 = vmatprep.subr.mxu1 %v3251_v12  ;;  %4256 = vmatpush3.msra.mxu0 %v3202_v52  ;;  %v4001_v57 = vld [vmem:[#allocation11 + $0x8] ss:$0 sm:$0xff] }
 0x368   :  { %v3131_v41 = vsel %vm3113_vm15, %v2542_v43, %v3122_v59  ;;  %4289 = vmatpush3.msra.mxu1 %v3235_v39  ;;  %4257 = vmatprep.subr.mxu0 %v3217_v58 }
 0x369   :  { %3563 = vmatprep.mubr.f32.mxu0 %v3131_v41  ;;  %4258 = vmatpush3.msra.mxu0 %v3201_v60 }
 0x36a   :  { %4290 = vmatprep.subr.mxu1 %v3250_v55  ;;  %4259 = vmatprep.subr.mxu0 %v3216_v1 }
 0x36b   :  { %4291 = vmatpush3.msra.mxu1 %v3234_v5  ;;  %4260 = vmatpush3.msra.mxu0 %v3200_v53 }
 0x36c   :  { %4292 = vmatprep.subr.mxu1 %v3249_v40  ;;  %4261 = vmatprep.subr.mxu0 %v3215_v7 }
 0x36d   :  { %4293 = vmatpush3.msra.mxu1 %v3233_v8  ;;  %4262 = vmatpush3.msra.mxu0 %v3199_v9 }
 0x36e   :  { %4294 = vmatprep.subr.mxu1 %v3248_v10  ;;  %3564 = vmatmul.mubr.f32.vlgmr.msra.gmra.mxu0 %v3130_v17  ;;  %v3808_v17 = vld [vmem:[%s6172_s11 + $0x38] sm:$0xff] }
 0x36f   :  { %4295 = vmatpush3.msra.mxu1 %v3232_v16  ;;  %4346 = vmatprep.subr.mxu0 %v4699_v13 }
 0x370   :  { %4296 = vmatprep.subr.mxu1 %v3247_v56  ;;  %4347 = vmatpush3.msra.mxu0 %v3278_v46  ;;  %v3806_v46 = vld [vmem:[%s6172_s11 + $0x28] sm:$0xff] }
 0x371   :  { %4297 = vmatpush3.msra.mxu1 %v3231_v14  ;;  %4348 = vmatprep.subr.mxu0 %v4699_v13  ;;  %v3807_v14 = vld [vmem:[%s6172_s11 + $0x30] sm:$0xff] }
 0x372   :  { %4381 = vmatprep.subr.mxu1 %v4699_v13  ;;  %4349 = vmatpush3.msra.mxu0 %v3277_v20  ;;  %v3805_v20 = vld [vmem:[%s6172_s11 + $0x20] sm:$0xff] }
 0x373   :  { %4378 = vmatprep.mubr.msk.f32.mxu0 %vm4700_vm10, %v4699_v13  ;;  %4350 = vmatprep.subr.mxu0 %v4699_v13 }
 0x374   :  { %4351 = vmatpush3.msra.mxu0 %v3276_v18  ;;  %v3804_v18 = vld [vmem:[%s6172_s11 + $0x18] sm:$0xff] }
 0x375   :  { %4352 = vmatprep.subr.mxu0 %v4699_v13 }
 0x376   :  { %4353 = vmatpush3.msra.mxu0 %v3275_v3  ;;  %v3803_v3 = vld [vmem:[%s6172_s11 + $0x10] sm:$0xff] }
 0x377   :  { %4354 = vmatprep.subr.mxu0 %v4699_v13 }
 0x378   :  { %4355 = vmatpush3.msra.mxu0 %v3274_v19  ;;  %v3802_v19 = vld [vmem:[%s6172_s11 + $0x8] sm:$0xff] }
 0x379   :  { %4356 = vmatprep.subr.mxu0 %v4699_v13 }
 0x37a   :  { %4357 = vmatpush3.msra.mxu0 %v3273_v63  ;;  %v3801_v63 = vld [vmem:[%s6172_s11] sm:$0xff] }
 0x37b   :  { %4358 = vmatprep.subr.mxu0 %v4699_v13 }
 0x37c   :  { %4359 = vmatpush3.msra.mxu0 %v3272_v15 }
 0x37d   :  { %4360 = vmatprep.subr.mxu0 %v4699_v13 }
 0x37e   :  { %4361 = vmatpush3.msra.mxu0 %v3271_v34 }
 0x37f   :  { %4362 = vmatprep.subr.mxu0 %v4699_v13 }
 0x380   :  { %4363 = vmatpush3.msra.mxu0 %v3270_v30 }
 0x381   :  { %4364 = vmatprep.subr.mxu0 %v4699_v13  ;;  %v2610_v26 = vpop.f32.mrf.mxu0 }
 0x382   :  { %4365 = vmatpush3.msra.mxu0 %v3269_v33  ;;  %v2611_v4 = vadd.f32 %v2610_v26, %v1670_v27 }
 0x383   :  { %4366 = vmatprep.subr.mxu0 %v4699_v13  ;;  %v2612_v28 = vpop.f32.mrf.mxu0 }
 0x384   :  { %4367 = vmatpush3.msra.mxu0 %v3268_v21  ;;  %v2613_v32 = vadd.f32 %v2612_v28, %v1674_v42 }
 0x385   :  { %4368 = vmatprep.subr.mxu0 %v4699_v13 }
 0x386   :  { %4369 = vmatpush3.msra.mxu0 %v3267_v22 }
 0x387   :  { %4370 = vmatprep.subr.mxu0 %v4699_v13 }
 0x388   :  { %4371 = vmatpush3.msra.mxu0 %v3266_v23 }
 0x389   :  { %4372 = vmatprep.subr.mxu0 %v4699_v13 }
 0x38a   :  { %4373 = vmatpush3.msra.mxu0 %v3265_v45 }
 0x38b   :  { %4374 = vmatprep.subr.mxu0 %v4699_v13 }
 0x38c   :  { %4375 = vmatpush3.msra.mxu0 %v3264_v24 }
 0x38d   :  { %4376 = vmatprep.subr.mxu0 %v4699_v13 }
 0x38e   :  { %4377 = vmatpush3.msra.mxu0 %v3263_v25 }
 0x3a1   :  { %v2681_v0 = vpop.f32.mrf.mxu1 }
 0x3a2   :  { %v2682_v61 = vadd.f32 %v2681_v0, %v2611_v4 }
 0x3a3   :  { %v2683_v31 = vpop.f32.mrf.mxu1 }
 0x3a4   :  { %v2684_v37 = vadd.f32 %v2683_v31, %v2613_v32 }
 0x3a6   :  { %v2823_v35 = vpop.f32.mrf.mxu1 }
 0x3a8   :  { %v2825_v48 = vpop.f32.mrf.mxu1 }
 0x3c4   :  { %v2752_v36 = vpop.f32.mrf.mxu0 }
 0x3c5   :  { %v2753_v44 = vadd.f32 %v2752_v36, %v2682_v61 }
 0x3c6   :  { %v2754_v62 = vpop.f32.mrf.mxu0 }
 0x3c7   :  { %v2824_v47 = vadd.f32 %v2823_v35, %v2753_v44  ;;  %v2755_v2 = vadd.f32 %v2754_v62, %v2684_v37  ;;  %v4011_v35 = vld [vmem:[#allocation16] ss:$0 sm:$0xff] }
 0x3c8   :  { %v4083_v12 = vpop.f32.mrf.mxu1 }
 0x3c9   :  { %v2826_v49 = vadd.f32 %v2825_v48, %v2755_v2  ;;  %v3123_v50 = vmul.f32 0.01, %v2824_v47  ;;  %vm3114_vm2 = vcmp.ge.f32.partialorder %v2824_v47, 0.0  ;;  %v3895_v48 = vld [vmem:[%s6174_s13 + $0x10] sm:$0xff] }
 0x3ca   :  { %v4084_v52 = vpop.f32.mrf.mxu1 }
 0x3cb   :  { %vm3115_vm1 = vcmp.ge.f32.partialorder %v2826_v49, 0.0  ;;  %v3124_v38 = vmul.f32 0.01, %v2826_v49  ;;  %v3132_v43 = vsel %vm3114_vm2, %v2824_v47, %v3123_v50  ;;  %v4085_v39 = vadd.f32 %v4084_v52, %v4083_v12  ;;  %v3896_v47 = vld [vmem:[%s6174_s13 + $0x18] sm:$0xff]  ;;  %v3893_v50 = vld [vmem:[%s6174_s13] sm:$0xff] }
 0x3cc   :  { %v4014_v52 = vld [vmem:[#allocation19] ss:$0 sm:$0xff] }
 0x3cd   :  { %v3133_v29 = vsel %vm3115_vm1, %v2826_v49, %v3124_v38  ;;  %v2895_v60 = vadd.f32 %v4085_v39, %v4001_v57  ;;  %v3894_v49 = vld [vmem:[%s6174_s13 + $0x8] sm:$0xff]  ;;  %v4012_v38 = vld [vmem:[#allocation17] ss:$0 sm:$0xff]  ;;  %s4652_s13 = scalar_lea.vmem %s3987_s16, 32 }
 0x3ce   :  { %3633 = vmatprep.mubr.f32.mxu1 %v3133_v29  ;;  %p4653_p13 = scmp.ne.s32.totalorder %s3987_s16, %s4652_s13  ;;  %p4658_p1 = scmp.lt.s32.totalorder %s4652_s13, %s4652_s13 }
 0x3cf   :  { %3634 = vmatmul.mubr.f32.vlgmr.msra.gmra.mxu1 %v3132_v43 }
 0x3d0   :  { %4382 = vmatpush3.msk.msra.mxu1 %vm3715_vm3, %v3710_v11  ;;  %4383 = vmatprep.mubr.msk.f32.mxu1 %vm4700_vm10, %v4699_v13  ;;  %p4659_p2 = por %p4658_p1, %p4657_p0 }
 0x3d1   :  { %4386 = vmatprep.subr.mxu1 %v4699_v13 }
 0x3d2   :  { %p4660_p3 = pnand %p4659_p2, %p4653_p13 }
 0x3d3   :  { %4384 = vmatmul.mubr.msk.f32.vlgmr.msra.gmra.mxu1 %vm3711_vm4, %v3709_v51 }
 0x3d4   :  { %4402 = vmatprep.mubr.msk.f32.mxu1 %vm4700_vm10, %v4699_v13  ;;  %4387 = vmatpush3.msra.mxu1 %v3808_v17 }
 0x3d5   :  { %4388 = vmatprep.subr.mxu1 %v4699_v13 }
 0x3d6   :  { %4389 = vmatpush3.msra.mxu1 %v3807_v14 }
 0x3d7   :  { %4390 = vmatprep.subr.mxu1 %v4699_v13 }
 0x3d8   :  { %4391 = vmatpush3.msra.mxu1 %v3806_v46 }
 0x3d9   :  { %4392 = vmatprep.subr.mxu1 %v4699_v13 }
 0x3da   :  { %4393 = vmatpush3.msra.mxu1 %v3805_v20 }
 0x3db   :  { %4394 = vmatprep.subr.mxu1 %v4699_v13 }
 0x3dc   :  { %4395 = vmatpush3.msra.mxu1 %v3804_v18 }
 0x3dd   :  { %4396 = vmatprep.subr.mxu1 %v4699_v13 }
 0x3de   :  { %4397 = vmatpush3.msra.mxu1 %v3803_v3 }
 0x3df   :  { %4398 = vmatprep.subr.mxu1 %v4699_v13 }
 0x3e0   :  { %4399 = vmatpush3.msra.mxu1 %v3802_v19 }
 0x3e1   :  { %4400 = vmatprep.subr.mxu1 %v4699_v13 }
 0x3e2   :  { %4401 = vmatpush3.msra.mxu1 %v3801_v63 }
 0x3e3   :  { %4405 = vmatprep.subr.mxu1 %v4699_v13 }
 0x3e6   :  { %v4118_v58 = vpop.f32.mrf.mxu0 }
 0x3e8   :  { %v4119_v59 = vpop.f32.mrf.mxu0 }
 0x3e9   :  { %v4120_v55 = vadd.f32 %v4119_v59, %v4118_v58  ;;  %v4153_v1 = vpop.f32.mrf.mxu1 }
 0x3eb   :  { %v2965_v41 = vadd.f32 %v4120_v55, %v2895_v60  ;;  %v3104_v5 = vpop.f32.mrf.mxu0  ;;  %v4154_v53 = vpop.f32.mrf.mxu1 }
 0x3ec   :  { %v4155_v40 = vadd.f32 %v4154_v53, %v4153_v1 }
 0x3ed   :  { %v4340_v6 = vpop.f32.mrf.mxu0 }
 0x3ee   :  { %v3035_v7 = vadd.f32 %v4155_v40, %v2965_v41 }
 0x3ef   :  { %v3355_v8 = vpop.f32.mrf.mxu1 }
 0x3f0   :  { %v3105_v9 = vadd.f32 %v3104_v5, %v3035_v7 }
 0x3f1   :  { %v4345_v10 = vpop.f32.mrf.mxu1 }
 0x3f2   :  { %vm3116_vm5 = vcmp.ge.f32.partialorder %v3105_v9, 0.0  ;;  %v3125_v16 = vmul.f32 0.01, %v3105_v9 }
 0x3f4   :  { %v3134_v56 = vsel %vm3116_vm5, %v3105_v9, %v3125_v16 }
 0x3f5   :  { %4379 = vmatmul.mubr.f32.vlgmr.msra.gmra.mxu0 %v3134_v56 }
 0x40d   :  { %v4193_v23 = vpop.f32.mrf.mxu0 }
 0x40f   :  { %v4194_v45 = vpop.f32.mrf.mxu0 }
 0x410   :  { %v4228_v15 = vpop.f32.mrf.mxu1  ;;  %v4195_v25 = vadd.f32 %v4194_v45, %v4193_v23 }
 0x412   :  { %v4229_v34 = vpop.f32.mrf.mxu1  ;;  %v3426_v26 = vadd.f32 %v4195_v25, %v3355_v8 }
 0x413   :  { %v4230_v0 = vadd.f32 %v4229_v34, %v4228_v15 }
 0x415   :  { %v3496_v42 = vadd.f32 %v4230_v0, %v3426_v26 }
 0x42e   :  { %v4263_v24 = vpop.f32.mrf.mxu0 }
 0x430   :  { %v4264_v54 = vpop.f32.mrf.mxu0 }
 0x431   :  { %v4265_v27 = vadd.f32 %v4264_v54, %v4263_v24 }
 0x433   :  { %v3566_v31 = vadd.f32 %v4265_v27, %v3496_v42 }
 0x48f   :  { %v4298_v30 = vpop.f32.mrf.mxu1 }
 0x491   :  { %v4299_v33 = vpop.f32.mrf.mxu1 }
 0x492   :  { %v4300_v28 = vadd.f32 %v4299_v33, %v4298_v30 }
 0x493   :  { %v3785_v21 = vpop.f32.mrf.mxu1 }
 0x494   :  { %v3636_v4 = vadd.f32 %v4300_v28, %v3566_v31 }
 0x495   :  { %v4385_v22 = vpop.f32.mrf.mxu1 }
 0x4b5   :  { %v3705_v32 = vpop.f32.mrf.mxu0 }
 0x4b6   :  { %v3706_v61 = vadd.f32 %v3705_v32, %v3636_v4 }
 0x4b7   :  { %v4380_v36 = vpop.f32.mrf.mxu0 }
 0x4b8   :  { %v3789_v37 = vadd.f32 %v3785_v21, %v3706_v61 }
 0x4ba   :  { %v3797_v44 = vadd.f32 %v4011_v35, %v3789_v37 }
 0x4bc   :  { %vm3798_vm6 = vcmp.ge.f32.partialorder %v3797_v44, 0.0  ;;  %v3799_v62 = vmul.f32 0.01, %v3797_v44 }
 0x4be   :  { %v3800_v2 = vsel %vm3798_vm6, %v3797_v44, %v3799_v62 }
 0x4bf   :  { %4403 = vmatmul.mubr.msk.f32.vlgmr.msra.gmra.mxu1 %vm3816_vm7, %v3800_v2 }
 0x4c0   :  { %4406 = vmatpush3.msra.mxu1 %v3896_v47  ;;  %4413 = vmatprep.mubr.msk.f32.mxu1 %vm4700_vm10, %v4699_v13  ;;  %vm3978_vm10 = vcmask 66560  }
 0x4c1   :  { %4407 = vmatprep.subr.mxu1 %v4699_v13 }
 0x4c2   :  { %4408 = vmatpush3.msra.mxu1 %v3895_v48 }
 0x4c3   :  { %4409 = vmatprep.subr.mxu1 %v4699_v13 }
 0x4c4   :  { %4410 = vmatpush3.msra.mxu1 %v3894_v49 }
 0x4c5   :  { %4411 = vmatprep.subr.mxu1 %v4699_v13 }
 0x4c6   :  { %4412 = vmatpush3.msra.mxu1 %v3893_v50 }
 0x57f   :  { %v3886_v29 = vpop.f32.mrf.mxu1 }
 0x580   :  { %v3887_v11 = vadd.f32 %v4012_v38, %v3886_v29 }
 0x581   :  { %v4404_v43 = vpop.f32.mrf.mxu1 }
 0x582   :  { %vm3890_vm8 = vcmp.ge.f32.partialorder %v3887_v11, 0.0  ;;  %v3891_v51 = vmul.f32 0.01, %v3887_v11 }
 0x584   :  { %v3892_v12 = vsel %vm3890_vm8, %v3887_v11, %v3891_v51 }
 0x585   :  { %4414 = vmatmul.mubr.msk.f32.vlgmr.msra.gmra.mxu1 %vm3904_vm9, %v3892_v12 }
 0x645   :  { %v3974_v39 = vpop.f32.mrf.mxu1 }
 0x646   :  { %v3975_v57 = vadd.f32 %v4014_v52, %v3974_v39 }
 0x647   :  { %v4415_v58 = vpop.f32.mrf.mxu1 }
 0x648   :  { %3979 = vst.msk [vmem:[#allocation20] sm:$0x3] %vm3978_vm10, %v3975_v57 }
 0x649   :  { %4663 = shalt.err (!%p4660_p3)
}
 0x64a   :  { %3989 = dma.vmem_to_hbm [thread:$0]  %s3987_s16, 32, %s6176_s15, [#allocation4]  }
 0x64b   :  { %4684 = dma.done.wait [#allocation4], 32  }
 0x64c   :  { %4685 = vsyncadd [#allocation4], 4294967264 }
 0x64d   :  { %3993 = vsyncpa [#allocation3], 1 }
 0x64e   :  { %3994 = vsyncpa [#allocation6], 1 }
 0x64f   :  { %3995 = vsyncpa [#allocation9], 1 }
 0x650   :  { %3996 = vsyncpa [#allocation12], 1 }
 0x651   :  { %3997 = vsyncpa [#allocation15], 1 }
 0x652   :  { %3998 = vsyncpa [#allocation18], 1 }
 0x653   :  { %3999 = vsyncpa [#allocation4], 1 }

</bundles_post_ra>
